<compile_context>
chip_gen: v6e
topology: v6e:2x2x1
jax: 0.10.0
libtpu: 0.0.40
codegen_flags: <defaults>
</compile_context>

<pallas_src>
import math

import jax
import jax.numpy as jnp
from jax.experimental import pallas as pl
from jax.experimental.pallas import tpu as pltpu

INPUT_SIZE = 9
IN_PAD = 16               # layer-0 input features zero-padded to a sublane multiple
HIDDEN_SIZE = 32          # reduced from the PyTorch default 256 for the small test shape
OUTPUT_SIZE = 1
NUM_LAYERS = 3
BATCH = 2
SEQ = 8

H = HIDDEN_SIZE
G2 = 8 * H                # stacked gate width: 4 gates x 2 directions


# ----------------------------------------------------------------------------
# Static row layout of the packed LSTM weight slab (width G2, f32).
# Per layer: [w_ih (d_in rows) | w_hh (2H rows) | bias (8 rows, row 0 valid)].
# All block starts are multiples of 8 (sublane aligned).
# ----------------------------------------------------------------------------
def _layer_offsets():
    offs, row = [], 0
    for layer in range(NUM_LAYERS):
        d_in = IN_PAD if layer == 0 else 2 * H
        w_ih_off = row; row += d_in
        w_hh_off = row; row += 2 * H
        b_off = row; row += 8
        offs.append((w_ih_off, d_in, w_hh_off, b_off))
    return offs, row


LAYER_OFFS, LSTM_ROWS = _layer_offsets()

# Head slab (width 2H): rows 0..2H-1 attn_w (cols 0..H-1), then attn_b, v, fc_w, fc_b.
HEAD_ATTN_W = 0
HEAD_ATTN_B = 2 * H
HEAD_V = 2 * H + 1
HEAD_FC_W = 2 * H + 2
HEAD_FC_B = 2 * H + 3
HEAD_ROWS = 72            # padded to a multiple of 8


# ----------------------------------------------------------------------------
# Single fused kernel: 3 bidirectional LSTM layers + attention + fc.
# ----------------------------------------------------------------------------
def _fused_lstm_attn_kernel(x_ref, lstm_ref, head_ref, out_ref, seq_f_ref, seq_b_ref):
    B, T, _ = x_ref.shape

    # Lane mask selecting the forward-direction strip of each 2H-wide gate group.
    gate_col = jax.lax.broadcasted_iota(jnp.int32, (B, G2), 1)
    gate_is_fwd = (gate_col % (2 * H)) < H                    # (B, 8H)

    def bidir_layer(x_btd, w_ih_off, d_in, w_hh_off, b_off):
        """x_btd: (B, T, d_in) -> (B, T, 2H) bidirectional layer output."""
        w_ih = lstm_ref[w_ih_off:w_ih_off + d_in, :]          # (d_in, 8H)
        w_hh = lstm_ref[w_hh_off:w_hh_off + 2 * H, :]         # (2H, 8H) block-diagonal
        b = lstm_ref[b_off:b_off + 1, :]                      # (1, 8H)

        # Hoisted input projection: all timesteps, both directions, bias folded in.
        proj = (
            jnp.dot(x_btd.reshape(B * T, d_in), w_ih,
                    preferred_element_type=jnp.float32) + b
        ).reshape(B, T, G2)                                   # (B, T, 8H)

        # Hoisted direction select (independent of h/c, so OFF the serial chain):
        # fwd strips read time t, bwd strips read time T-1-t.
        p_steps = [jnp.where(gate_is_fwd, proj[:, t, :], proj[:, T - 1 - t, :])
                   for t in range(T)]

        # Fused recurrent state: [:, :H] = forward direction, [:, H:] = backward.
        h = jnp.zeros((B, 2 * H), jnp.float32)
        c = jnp.zeros((B, 2 * H), jnp.float32)
        for t in range(T):                                    # statically unrolled
            # One block-diagonal MXU matmul computes both directions' gates.
            # (RHS is identical each step; MXU staging left to the compiler here.)
            gates = jnp.dot(h, w_hh,
                            preferred_element_type=jnp.float32) + p_steps[t]  # (B, 8H)
            # Gate layout [i|f|o|g]: the three sigmoid gates are one contiguous strip.
            sig = jax.nn.sigmoid(gates[:, :6 * H])
            i = sig[:, 0 * 2 * H:1 * 2 * H]
            f = sig[:, 1 * 2 * H:2 * 2 * H]
            o = sig[:, 2 * 2 * H:3 * 2 * H]
            g = jnp.tanh(gates[:, 6 * H:])
            c = f * c + i * g
            h = o * jnp.tanh(c)
            # Direct per-step writes (no stack/reverse/select at the end):
            # fwd output for time t; bwd step t processed x[T-1-t] -> output time T-1-t.
            seq_f_ref[:, t, :] = h[:, :H]
            seq_b_ref[:, T - 1 - t, :] = h[:, H:]

        return jnp.concatenate([seq_f_ref[...], seq_b_ref[...]], axis=-1)  # (B, T, 2H)

    acts = x_ref[...]                                         # (B, T, IN_PAD)
    for (w_ih_off, d_in, w_hh_off, b_off) in LAYER_OFFS:
        acts = bidir_layer(acts, w_ih_off, d_in, w_hh_off, b_off)
        # TODO(synk): inter-layer dropout (p=0.2) skipped — inference semantics.

    # Attention head (tanh-Linear + v + softmax over time + weighted sum) + fc.
    flat = acts.reshape(B * T, 2 * H)
    aw = head_ref[HEAD_ATTN_W:HEAD_ATTN_W + 2 * H, :]         # (2H, 2H) cols H.. are 0
    ab = head_ref[HEAD_ATTN_B:HEAD_ATTN_B + 1, :]             # (1, 2H)  cols H.. are 0
    vr = head_ref[HEAD_V:HEAD_V + 1, :]                       # (1, 2H)  cols H.. are 0
    fr = head_ref[HEAD_FC_W:HEAD_FC_W + 1, :]                 # (1, 2H)
    fb = head_ref[HEAD_FC_B:HEAD_FC_B + 1, 0:1]               # (1, 1)

    e = jnp.tanh(jnp.dot(flat, aw, preferred_element_type=jnp.float32) + ab)
    # 1-output-lane matmuls replaced by VPU multiply + lane reduction.
    s = jnp.sum(e * vr, axis=-1, keepdims=True).reshape(B, T, 1)
    s = s - jnp.max(s, axis=1, keepdims=True)                 # softmax over seq (dim=1)
    p = jnp.exp(s)
    p = p / jnp.sum(p, axis=1, keepdims=True)
    context = jnp.sum(p * acts, axis=1)                       # (B, 2H)
    out_ref[...] = jnp.sum(context * fr, axis=-1, keepdims=True) + fb


# ----------------------------------------------------------------------------
# Host-side weight packing into the two VMEM slabs.
# ----------------------------------------------------------------------------
def _interleave_gates(a_f, a_b):
    """[..., 4H] (PyTorch order i,f,g,o) x2 -> [..., 8H] laid out
    [i_f,i_b,f_f,f_b,o_f,o_b,g_f,g_b] (sigmoid gates contiguous, tanh last)."""
    parts = []
    for gi in (0, 1, 3, 2):   # i, f, o, g
        parts.append(a_f[..., gi * H:(gi + 1) * H])
        parts.append(a_b[..., gi * H:(gi + 1) * H])
    return jnp.concatenate(parts, axis=-1)


def pack_params(params):
    lstm_blocks = []
    for li, layer in enumerate(params['lstm']):
        w_ih_f, w_hh_f, b_f = layer['fwd']
        w_ih_b, w_hh_b, b_b = layer['bwd']
        w_ih = _interleave_gates(w_ih_f, w_ih_b)                           # (d_in, 8H)
        if li == 0:
            w_ih = jnp.pad(w_ih, ((0, IN_PAD - INPUT_SIZE), (0, 0)))      # (16, 8H)
        zeros = jnp.zeros_like(w_hh_f)
        # Block-diagonal: rows 0:H (h_fwd) only feed fwd gate strips; rows H:2H feed bwd.
        w_hh = jnp.concatenate([_interleave_gates(w_hh_f, zeros),
                                _interleave_gates(zeros, w_hh_b)], axis=0)  # (2H, 8H)
        b = jnp.pad(_interleave_gates(b_f, b_b)[None, :], ((0, 7), (0, 0)))  # (8, 8H)
        lstm_blocks += [w_ih, w_hh, b]
    lstm_slab = jnp.concatenate(lstm_blocks, axis=0)
    assert lstm_slab.shape == (LSTM_ROWS, G2), lstm_slab.shape

    head = jnp.zeros((HEAD_ROWS, 2 * H), jnp.float32)
    head = head.at[HEAD_ATTN_W:HEAD_ATTN_W + 2 * H, 0:H].set(params['attn_w'])
    head = head.at[HEAD_ATTN_B, 0:H].set(params['attn_b'])
    head = head.at[HEAD_V, 0:H].set(params['v_w'][:, 0])
    head = head.at[HEAD_FC_W, :].set(params['fc_w'][:, 0])
    head = head.at[HEAD_FC_B, 0].set(params['fc_b'][0])
    return {'lstm_slab': lstm_slab, 'head_slab': head}


# ----------------------------------------------------------------------------
# Parameter init (deterministic, PyTorch-style uniform bounds) + forward glue.
# ----------------------------------------------------------------------------
def init_params(key):
    k = 1.0 / math.sqrt(H)
    lstm = []
    for layer in range(NUM_LAYERS):
        d_in = INPUT_SIZE if layer == 0 else 2 * H
        per_dir = {}
        for d in ('fwd', 'bwd'):
            key, k1, k2, k3, k4 = jax.random.split(key, 5)
            w_ih = jax.random.uniform(k1, (d_in, 4 * H), jnp.float32, -k, k)
            w_hh = jax.random.uniform(k2, (H, 4 * H), jnp.float32, -k, k)
            b_ih = jax.random.uniform(k3, (4 * H,), jnp.float32, -k, k)
            b_hh = jax.random.uniform(k4, (4 * H,), jnp.float32, -k, k)
            per_dir[d] = (w_ih, w_hh, b_ih + b_hh)            # combined bias (4H,)
        lstm.append(per_dir)

    key, k1, k2, k3, k4, k5 = jax.random.split(key, 6)
    ka = 1.0 / math.sqrt(2 * H)
    kv = 1.0 / math.sqrt(H)
    return {
        'lstm': lstm,
        'attn_w': jax.random.uniform(k1, (2 * H, H), jnp.float32, -ka, ka),
        'attn_b': jax.random.uniform(k2, (H,), jnp.float32, -ka, ka),
        'v_w': jax.random.uniform(k3, (H, 1), jnp.float32, -kv, kv),
        'fc_w': jax.random.uniform(k4, (2 * H, OUTPUT_SIZE), jnp.float32, -ka, ka),
        'fc_b': jax.random.uniform(k5, (OUTPUT_SIZE,), jnp.float32, -ka, ka),
    }


def lstm_model_forward(x, packed):
    """x: (B, T, INPUT_SIZE) -> (B, OUTPUT_SIZE), matching LSTMModel.forward (eval)."""
    B, T, _ = x.shape
    x_pad = jnp.pad(x, ((0, 0), (0, 0), (0, IN_PAD - INPUT_SIZE)))
    return pl.pallas_call(
        _fused_lstm_attn_kernel,
        out_shape=jax.ShapeDtypeStruct((B, OUTPUT_SIZE), jnp.float32),
        in_specs=[pl.BlockSpec(memory_space=pltpu.MemorySpace.VMEM)] * 3,
        out_specs=pl.BlockSpec(memory_space=pltpu.MemorySpace.VMEM),
        scratch_shapes=[pltpu.VMEM((B, T, H), jnp.float32),   # fwd per-time outputs
                        pltpu.VMEM((B, T, H), jnp.float32)],  # bwd per-time outputs
    )(x_pad, packed['lstm_slab'], packed['head_slab'])


if __name__ == "__main__":
    key = jax.random.PRNGKey(0)
    kx, kp = jax.random.split(key)
    x = jax.random.normal(kx, (BATCH, SEQ, INPUT_SIZE), jnp.float32)
    params = init_params(kp)
    packed = pack_params(params)          # packed once, reused every call

    out = jax.jit(lstm_model_forward)(x, packed)
    out = jax.block_until_ready(out)
    assert out.shape == (BATCH, OUTPUT_SIZE), out.shape
    assert bool(jnp.all(jnp.isfinite(out)))
    print("KERNEL_OK")
</pallas_src>

<mosaic_0001>
module attributes {stable_mosaic.version = 11 : i64} {
  func.func @_fused_lstm_attn_kernel(%arg0: memref<2x8x16xf32, #tpu.memory_space<vmem>>, %arg1: memref<360x256xf32, #tpu.memory_space<vmem>>, %arg2: memref<72x64xf32, #tpu.memory_space<vmem>>, %arg3: memref<2x1xf32, #tpu.memory_space<vmem>>, %arg4: memref<2x8x32xf32, #tpu.memory_space<vmem>>, %arg5: memref<2x8x32xf32, #tpu.memory_space<vmem>>) attributes {dimension_semantics = [], scalar_prefetch = 0 : i64, scratch_operands = 2 : i64, tpu.core_type = #tpu.core_type<tc>} {
    %0 = tpu.iota {dimensions = array<i32: 1>} : vector<2x256xi32>
    %c64_i32 = arith.constant 64 : i32
    %c0_i32 = arith.constant 0 : i32
    %1 = arith.cmpi eq, %c64_i32, %c0_i32 : i32
    %c1_i32 = arith.constant 1 : i32
    %2 = arith.select %1, %c1_i32, %c64_i32 : i32
    %3 = vector.broadcast %2 : i32 to vector<2x256xi32>
    %4 = arith.remsi %0, %3 : vector<2x256xi32>
    %c0_i32_0 = arith.constant 0 : i32
    %5 = vector.broadcast %c0_i32_0 : i32 to vector<2x256xi32>
    %6 = arith.cmpi ne, %4, %5 : vector<2x256xi32>
    %c0_i32_1 = arith.constant 0 : i32
    %7 = vector.broadcast %c0_i32_1 : i32 to vector<2x256xi32>
    %8 = arith.cmpi slt, %4, %7 : vector<2x256xi32>
    %c0_i32_2 = arith.constant 0 : i32
    %9 = arith.cmpi slt, %2, %c0_i32_2 : i32
    %10 = vector.broadcast %9 : i1 to vector<2x256xi1>
    %11 = vector.broadcast %10 : vector<2x256xi1> to vector<2x256xi1>
    %12 = arith.xori %8, %11 : vector<2x256xi1>
    %13 = arith.andi %12, %6 : vector<2x256xi1>
    %14 = vector.broadcast %2 : i32 to vector<2x256xi32>
    %15 = arith.addi %4, %14 : vector<2x256xi32>
    %16 = arith.select %13, %15, %4 : vector<2x256xi1>, vector<2x256xi32>
    %c32_i32 = arith.constant 32 : i32
    %17 = vector.broadcast %c32_i32 : i32 to vector<2x256xi32>
    %18 = arith.cmpi slt, %16, %17 : vector<2x256xi32>
    %c0 = arith.constant 0 : index
    %c0_3 = arith.constant 0 : index
    %c0_4 = arith.constant 0 : index
    %19 = vector.load %arg0[%c0, %c0_3, %c0_4] : memref<2x8x16xf32, #tpu.memory_space<vmem>>, vector<2x8x16xf32>
    %c0_5 = arith.constant 0 : index
    %c0_6 = arith.constant 0 : index
    %20 = vector.load %arg1[%c0_5, %c0_6] : memref<360x256xf32, #tpu.memory_space<vmem>>, vector<16x256xf32>
    %c16 = arith.constant 16 : index
    %c0_7 = arith.constant 0 : index
    %21 = vector.load %arg1[%c16, %c0_7] : memref<360x256xf32, #tpu.memory_space<vmem>>, vector<64x256xf32>
    %c80 = arith.constant 80 : index
    %c0_8 = arith.constant 0 : index
    %22 = vector.load %arg1[%c80, %c0_8] : memref<360x256xf32, #tpu.memory_space<vmem>>, vector<1x256xf32>
    %23 = vector.shape_cast %19 : vector<2x8x16xf32> to vector<16x16xf32>
    %cst = arith.constant dense<0.000000e+00> : vector<16x256xf32>
    %24 = tpu.matmul %23, %20, %cst {dimension_numbers = #tpu.dot_dimension_numbers<[1], [0], [0], [1], [0, 0, 1, 1], [], []>} : vector<16x16xf32>, vector<16x256xf32>, vector<16x256xf32> -> vector<16x256xf32>
    %25 = vector.broadcast %22 : vector<1x256xf32> to vector<16x256xf32>
    %26 = arith.addf %24, %25 : vector<16x256xf32>
    %27 = vector.shape_cast %26 : vector<16x256xf32> to vector<2x8x256xf32>
    %28 = vector.extract_strided_slice %27 {offsets = [0, 0, 0], sizes = [2, 1, 256], strides = [1, 1, 1]} : vector<2x8x256xf32> to vector<2x1x256xf32>
    %29 = vector.shape_cast %28 : vector<2x1x256xf32> to vector<2x256xf32>
    %30 = vector.extract_strided_slice %27 {offsets = [0, 7, 0], sizes = [2, 1, 256], strides = [1, 1, 1]} : vector<2x8x256xf32> to vector<2x1x256xf32>
    %31 = vector.shape_cast %30 : vector<2x1x256xf32> to vector<2x256xf32>
    %32 = arith.select %18, %29, %31 : vector<2x256xi1>, vector<2x256xf32>
    %33 = vector.extract_strided_slice %27 {offsets = [0, 1, 0], sizes = [2, 1, 256], strides = [1, 1, 1]} : vector<2x8x256xf32> to vector<2x1x256xf32>
    %34 = vector.shape_cast %33 : vector<2x1x256xf32> to vector<2x256xf32>
    %35 = vector.extract_strided_slice %27 {offsets = [0, 6, 0], sizes = [2, 1, 256], strides = [1, 1, 1]} : vector<2x8x256xf32> to vector<2x1x256xf32>
    %36 = vector.shape_cast %35 : vector<2x1x256xf32> to vector<2x256xf32>
    %37 = arith.select %18, %34, %36 : vector<2x256xi1>, vector<2x256xf32>
    %38 = vector.extract_strided_slice %27 {offsets = [0, 2, 0], sizes = [2, 1, 256], strides = [1, 1, 1]} : vector<2x8x256xf32> to vector<2x1x256xf32>
    %39 = vector.shape_cast %38 : vector<2x1x256xf32> to vector<2x256xf32>
    %40 = vector.extract_strided_slice %27 {offsets = [0, 5, 0], sizes = [2, 1, 256], strides = [1, 1, 1]} : vector<2x8x256xf32> to vector<2x1x256xf32>
    %41 = vector.shape_cast %40 : vector<2x1x256xf32> to vector<2x256xf32>
    %42 = arith.select %18, %39, %41 : vector<2x256xi1>, vector<2x256xf32>
    %43 = vector.extract_strided_slice %27 {offsets = [0, 3, 0], sizes = [2, 1, 256], strides = [1, 1, 1]} : vector<2x8x256xf32> to vector<2x1x256xf32>
    %44 = vector.shape_cast %43 : vector<2x1x256xf32> to vector<2x256xf32>
    %45 = vector.extract_strided_slice %27 {offsets = [0, 4, 0], sizes = [2, 1, 256], strides = [1, 1, 1]} : vector<2x8x256xf32> to vector<2x1x256xf32>
    %46 = vector.shape_cast %45 : vector<2x1x256xf32> to vector<2x256xf32>
    %47 = arith.select %18, %44, %46 : vector<2x256xi1>, vector<2x256xf32>
    %48 = vector.extract_strided_slice %27 {offsets = [0, 4, 0], sizes = [2, 1, 256], strides = [1, 1, 1]} : vector<2x8x256xf32> to vector<2x1x256xf32>
    %49 = vector.shape_cast %48 : vector<2x1x256xf32> to vector<2x256xf32>
    %50 = vector.extract_strided_slice %27 {offsets = [0, 3, 0], sizes = [2, 1, 256], strides = [1, 1, 1]} : vector<2x8x256xf32> to vector<2x1x256xf32>
    %51 = vector.shape_cast %50 : vector<2x1x256xf32> to vector<2x256xf32>
    %52 = arith.select %18, %49, %51 : vector<2x256xi1>, vector<2x256xf32>
    %53 = vector.extract_strided_slice %27 {offsets = [0, 5, 0], sizes = [2, 1, 256], strides = [1, 1, 1]} : vector<2x8x256xf32> to vector<2x1x256xf32>
    %54 = vector.shape_cast %53 : vector<2x1x256xf32> to vector<2x256xf32>
    %55 = vector.extract_strided_slice %27 {offsets = [0, 2, 0], sizes = [2, 1, 256], strides = [1, 1, 1]} : vector<2x8x256xf32> to vector<2x1x256xf32>
    %56 = vector.shape_cast %55 : vector<2x1x256xf32> to vector<2x256xf32>
    %57 = arith.select %18, %54, %56 : vector<2x256xi1>, vector<2x256xf32>
    %58 = vector.extract_strided_slice %27 {offsets = [0, 6, 0], sizes = [2, 1, 256], strides = [1, 1, 1]} : vector<2x8x256xf32> to vector<2x1x256xf32>
    %59 = vector.shape_cast %58 : vector<2x1x256xf32> to vector<2x256xf32>
    %60 = vector.extract_strided_slice %27 {offsets = [0, 1, 0], sizes = [2, 1, 256], strides = [1, 1, 1]} : vector<2x8x256xf32> to vector<2x1x256xf32>
    %61 = vector.shape_cast %60 : vector<2x1x256xf32> to vector<2x256xf32>
    %62 = arith.select %18, %59, %61 : vector<2x256xi1>, vector<2x256xf32>
    %63 = vector.extract_strided_slice %27 {offsets = [0, 7, 0], sizes = [2, 1, 256], strides = [1, 1, 1]} : vector<2x8x256xf32> to vector<2x1x256xf32>
    %64 = vector.shape_cast %63 : vector<2x1x256xf32> to vector<2x256xf32>
    %65 = vector.extract_strided_slice %27 {offsets = [0, 0, 0], sizes = [2, 1, 256], strides = [1, 1, 1]} : vector<2x8x256xf32> to vector<2x1x256xf32>
    %66 = vector.shape_cast %65 : vector<2x1x256xf32> to vector<2x256xf32>
    %67 = arith.select %18, %64, %66 : vector<2x256xi1>, vector<2x256xf32>
    %cst_9 = arith.constant 0.000000e+00 : f32
    %68 = vector.broadcast %cst_9 : f32 to vector<2x64xf32>
    %cst_10 = arith.constant 0.000000e+00 : f32
    %69 = vector.broadcast %cst_10 : f32 to vector<2x64xf32>
    %cst_11 = arith.constant dense<0.000000e+00> : vector<2x256xf32>
    %70 = tpu.matmul %68, %21, %cst_11 {dimension_numbers = #tpu.dot_dimension_numbers<[1], [0], [0], [1], [0, 0, 1, 1], [], []>} : vector<2x64xf32>, vector<64x256xf32>, vector<2x256xf32> -> vector<2x256xf32>
    %71 = arith.addf %70, %32 : vector<2x256xf32>
    %72 = vector.extract_strided_slice %71 {offsets = [0, 0], sizes = [2, 192], strides = [1, 1]} : vector<2x256xf32> to vector<2x192xf32>
    %73 = arith.negf %72 : vector<2x192xf32>
    %74 = math.exp %73 : vector<2x192xf32>
    %cst_12 = arith.constant 1.000000e+00 : f32
    %75 = vector.broadcast %cst_12 : f32 to vector<2x192xf32>
    %76 = arith.addf %75, %74 : vector<2x192xf32>
    %77 = arith.divf %75, %76 : vector<2x192xf32>
    %78 = vector.extract_strided_slice %77 {offsets = [0, 0], sizes = [2, 64], strides = [1, 1]} : vector<2x192xf32> to vector<2x64xf32>
    %79 = vector.extract_strided_slice %77 {offsets = [0, 64], sizes = [2, 64], strides = [1, 1]} : vector<2x192xf32> to vector<2x64xf32>
    %80 = vector.extract_strided_slice %77 {offsets = [0, 128], sizes = [2, 64], strides = [1, 1]} : vector<2x192xf32> to vector<2x64xf32>
    %81 = vector.extract_strided_slice %71 {offsets = [0, 192], sizes = [2, 64], strides = [1, 1]} : vector<2x256xf32> to vector<2x64xf32>
    %82 = math.tanh %81 : vector<2x64xf32>
    %83 = arith.mulf %79, %69 : vector<2x64xf32>
    %84 = arith.mulf %78, %82 : vector<2x64xf32>
    %85 = arith.addf %83, %84 : vector<2x64xf32>
    %86 = math.tanh %85 : vector<2x64xf32>
    %87 = arith.mulf %80, %86 : vector<2x64xf32>
    %88 = vector.extract_strided_slice %87 {offsets = [0, 0], sizes = [2, 32], strides = [1, 1]} : vector<2x64xf32> to vector<2x32xf32>
    %c0_13 = arith.constant 0 : index
    %c0_14 = arith.constant 0 : index
    %c0_15 = arith.constant 0 : index
    %89 = vector.load %arg4[%c0_13, %c0_14, %c0_15] : memref<2x8x32xf32, #tpu.memory_space<vmem>>, vector<2x1x32xf32>
    %90 = vector.shape_cast %89 : vector<2x1x32xf32> to vector<2x32xf32>
    %91 = vector.shape_cast %88 : vector<2x32xf32> to vector<2x1x32xf32>
    tpu.vector_store %arg4[%c0_13, %c0_14, %c0_15], %91 {strides = array<i32>} : memref<2x8x32xf32, #tpu.memory_space<vmem>>, vector<2x1x32xf32>,
    %92 = vector.extract_strided_slice %87 {offsets = [0, 32], sizes = [2, 32], strides = [1, 1]} : vector<2x64xf32> to vector<2x32xf32>
    %c0_16 = arith.constant 0 : index
    %c7 = arith.constant 7 : index
    %c0_17 = arith.constant 0 : index
    %93 = vector.load %arg5[%c0_16, %c7, %c0_17] : memref<2x8x32xf32, #tpu.memory_space<vmem>>, vector<2x1x32xf32>
    %94 = vector.shape_cast %93 : vector<2x1x32xf32> to vector<2x32xf32>
    %95 = vector.shape_cast %92 : vector<2x32xf32> to vector<2x1x32xf32>
    tpu.vector_store %arg5[%c0_16, %c7, %c0_17], %95 {strides = array<i32>} : memref<2x8x32xf32, #tpu.memory_space<vmem>>, vector<2x1x32xf32>,
    %cst_18 = arith.constant dense<0.000000e+00> : vector<2x256xf32>
    %96 = tpu.matmul %87, %21, %cst_18 {dimension_numbers = #tpu.dot_dimension_numbers<[1], [0], [0], [1], [0, 0, 1, 1], [], []>} : vector<2x64xf32>, vector<64x256xf32>, vector<2x256xf32> -> vector<2x256xf32>
    %97 = arith.addf %96, %37 : vector<2x256xf32>
    %98 = vector.extract_strided_slice %97 {offsets = [0, 0], sizes = [2, 192], strides = [1, 1]} : vector<2x256xf32> to vector<2x192xf32>
    %99 = arith.negf %98 : vector<2x192xf32>
    %100 = math.exp %99 : vector<2x192xf32>
    %cst_19 = arith.constant 1.000000e+00 : f32
    %101 = vector.broadcast %cst_19 : f32 to vector<2x192xf32>
    %102 = arith.addf %101, %100 : vector<2x192xf32>
    %103 = arith.divf %101, %102 : vector<2x192xf32>
    %104 = vector.extract_strided_slice %103 {offsets = [0, 0], sizes = [2, 64], strides = [1, 1]} : vector<2x192xf32> to vector<2x64xf32>
    %105 = vector.extract_strided_slice %103 {offsets = [0, 64], sizes = [2, 64], strides = [1, 1]} : vector<2x192xf32> to vector<2x64xf32>
    %106 = vector.extract_strided_slice %103 {offsets = [0, 128], sizes = [2, 64], strides = [1, 1]} : vector<2x192xf32> to vector<2x64xf32>
    %107 = vector.extract_strided_slice %97 {offsets = [0, 192], sizes = [2, 64], strides = [1, 1]} : vector<2x256xf32> to vector<2x64xf32>
    %108 = math.tanh %107 : vector<2x64xf32>
    %109 = arith.mulf %105, %85 : vector<2x64xf32>
    %110 = arith.mulf %104, %108 : vector<2x64xf32>
    %111 = arith.addf %109, %110 : vector<2x64xf32>
    %112 = math.tanh %111 : vector<2x64xf32>
    %113 = arith.mulf %106, %112 : vector<2x64xf32>
    %114 = vector.extract_strided_slice %113 {offsets = [0, 0], sizes = [2, 32], strides = [1, 1]} : vector<2x64xf32> to vector<2x32xf32>
    %c0_20 = arith.constant 0 : index
    %c1 = arith.constant 1 : index
    %c0_21 = arith.constant 0 : index
    %115 = vector.load %arg4[%c0_20, %c1, %c0_21] : memref<2x8x32xf32, #tpu.memory_space<vmem>>, vector<2x1x32xf32>
    %116 = vector.shape_cast %115 : vector<2x1x32xf32> to vector<2x32xf32>
    %117 = vector.shape_cast %114 : vector<2x32xf32> to vector<2x1x32xf32>
    tpu.vector_store %arg4[%c0_20, %c1, %c0_21], %117 {strides = array<i32>} : memref<2x8x32xf32, #tpu.memory_space<vmem>>, vector<2x1x32xf32>,
    %118 = vector.extract_strided_slice %113 {offsets = [0, 32], sizes = [2, 32], strides = [1, 1]} : vector<2x64xf32> to vector<2x32xf32>
    %c0_22 = arith.constant 0 : index
    %c6 = arith.constant 6 : index
    %c0_23 = arith.constant 0 : index
    %119 = vector.load %arg5[%c0_22, %c6, %c0_23] : memref<2x8x32xf32, #tpu.memory_space<vmem>>, vector<2x1x32xf32>
    %120 = vector.shape_cast %119 : vector<2x1x32xf32> to vector<2x32xf32>
    %121 = vector.shape_cast %118 : vector<2x32xf32> to vector<2x1x32xf32>
    tpu.vector_store %arg5[%c0_22, %c6, %c0_23], %121 {strides = array<i32>} : memref<2x8x32xf32, #tpu.memory_space<vmem>>, vector<2x1x32xf32>,
    %cst_24 = arith.constant dense<0.000000e+00> : vector<2x256xf32>
    %122 = tpu.matmul %113, %21, %cst_24 {dimension_numbers = #tpu.dot_dimension_numbers<[1], [0], [0], [1], [0, 0, 1, 1], [], []>} : vector<2x64xf32>, vector<64x256xf32>, vector<2x256xf32> -> vector<2x256xf32>
    %123 = arith.addf %122, %42 : vector<2x256xf32>
    %124 = vector.extract_strided_slice %123 {offsets = [0, 0], sizes = [2, 192], strides = [1, 1]} : vector<2x256xf32> to vector<2x192xf32>
    %125 = arith.negf %124 : vector<2x192xf32>
    %126 = math.exp %125 : vector<2x192xf32>
    %cst_25 = arith.constant 1.000000e+00 : f32
    %127 = vector.broadcast %cst_25 : f32 to vector<2x192xf32>
    %128 = arith.addf %127, %126 : vector<2x192xf32>
    %129 = arith.divf %127, %128 : vector<2x192xf32>
    %130 = vector.extract_strided_slice %129 {offsets = [0, 0], sizes = [2, 64], strides = [1, 1]} : vector<2x192xf32> to vector<2x64xf32>
    %131 = vector.extract_strided_slice %129 {offsets = [0, 64], sizes = [2, 64], strides = [1, 1]} : vector<2x192xf32> to vector<2x64xf32>
    %132 = vector.extract_strided_slice %129 {offsets = [0, 128], sizes = [2, 64], strides = [1, 1]} : vector<2x192xf32> to vector<2x64xf32>
    %133 = vector.extract_strided_slice %123 {offsets = [0, 192], sizes = [2, 64], strides = [1, 1]} : vector<2x256xf32> to vector<2x64xf32>
    %134 = math.tanh %133 : vector<2x64xf32>
    %135 = arith.mulf %131, %111 : vector<2x64xf32>
    %136 = arith.mulf %130, %134 : vector<2x64xf32>
    %137 = arith.addf %135, %136 : vector<2x64xf32>
    %138 = math.tanh %137 : vector<2x64xf32>
    %139 = arith.mulf %132, %138 : vector<2x64xf32>
    %140 = vector.extract_strided_slice %139 {offsets = [0, 0], sizes = [2, 32], strides = [1, 1]} : vector<2x64xf32> to vector<2x32xf32>
    %c0_26 = arith.constant 0 : index
    %c2 = arith.constant 2 : index
    %c0_27 = arith.constant 0 : index
    %141 = vector.load %arg4[%c0_26, %c2, %c0_27] : memref<2x8x32xf32, #tpu.memory_space<vmem>>, vector<2x1x32xf32>
    %142 = vector.shape_cast %141 : vector<2x1x32xf32> to vector<2x32xf32>
    %143 = vector.shape_cast %140 : vector<2x32xf32> to vector<2x1x32xf32>
    tpu.vector_store %arg4[%c0_26, %c2, %c0_27], %143 {strides = array<i32>} : memref<2x8x32xf32, #tpu.memory_space<vmem>>, vector<2x1x32xf32>,
    %144 = vector.extract_strided_slice %139 {offsets = [0, 32], sizes = [2, 32], strides = [1, 1]} : vector<2x64xf32> to vector<2x32xf32>
    %c0_28 = arith.constant 0 : index
    %c5 = arith.constant 5 : index
    %c0_29 = arith.constant 0 : index
    %145 = vector.load %arg5[%c0_28, %c5, %c0_29] : memref<2x8x32xf32, #tpu.memory_space<vmem>>, vector<2x1x32xf32>
    %146 = vector.shape_cast %145 : vector<2x1x32xf32> to vector<2x32xf32>
    %147 = vector.shape_cast %144 : vector<2x32xf32> to vector<2x1x32xf32>
    tpu.vector_store %arg5[%c0_28, %c5, %c0_29], %147 {strides = array<i32>} : memref<2x8x32xf32, #tpu.memory_space<vmem>>, vector<2x1x32xf32>,
    %cst_30 = arith.constant dense<0.000000e+00> : vector<2x256xf32>
    %148 = tpu.matmul %139, %21, %cst_30 {dimension_numbers = #tpu.dot_dimension_numbers<[1], [0], [0], [1], [0, 0, 1, 1], [], []>} : vector<2x64xf32>, vector<64x256xf32>, vector<2x256xf32> -> vector<2x256xf32>
    %149 = arith.addf %148, %47 : vector<2x256xf32>
    %150 = vector.extract_strided_slice %149 {offsets = [0, 0], sizes = [2, 192], strides = [1, 1]} : vector<2x256xf32> to vector<2x192xf32>
    %151 = arith.negf %150 : vector<2x192xf32>
    %152 = math.exp %151 : vector<2x192xf32>
    %cst_31 = arith.constant 1.000000e+00 : f32
    %153 = vector.broadcast %cst_31 : f32 to vector<2x192xf32>
    %154 = arith.addf %153, %152 : vector<2x192xf32>
    %155 = arith.divf %153, %154 : vector<2x192xf32>
    %156 = vector.extract_strided_slice %155 {offsets = [0, 0], sizes = [2, 64], strides = [1, 1]} : vector<2x192xf32> to vector<2x64xf32>
    %157 = vector.extract_strided_slice %155 {offsets = [0, 64], sizes = [2, 64], strides = [1, 1]} : vector<2x192xf32> to vector<2x64xf32>
    %158 = vector.extract_strided_slice %155 {offsets = [0, 128], sizes = [2, 64], strides = [1, 1]} : vector<2x192xf32> to vector<2x64xf32>
    %159 = vector.extract_strided_slice %149 {offsets = [0, 192], sizes = [2, 64], strides = [1, 1]} : vector<2x256xf32> to vector<2x64xf32>
    %160 = math.tanh %159 : vector<2x64xf32>
    %161 = arith.mulf %157, %137 : vector<2x64xf32>
    %162 = arith.mulf %156, %160 : vector<2x64xf32>
    %163 = arith.addf %161, %162 : vector<2x64xf32>
    %164 = math.tanh %163 : vector<2x64xf32>
    %165 = arith.mulf %158, %164 : vector<2x64xf32>
    %166 = vector.extract_strided_slice %165 {offsets = [0, 0], sizes = [2, 32], strides = [1, 1]} : vector<2x64xf32> to vector<2x32xf32>
    %c0_32 = arith.constant 0 : index
    %c3 = arith.constant 3 : index
    %c0_33 = arith.constant 0 : index
    %167 = vector.load %arg4[%c0_32, %c3, %c0_33] : memref<2x8x32xf32, #tpu.memory_space<vmem>>, vector<2x1x32xf32>
    %168 = vector.shape_cast %167 : vector<2x1x32xf32> to vector<2x32xf32>
    %169 = vector.shape_cast %166 : vector<2x32xf32> to vector<2x1x32xf32>
    tpu.vector_store %arg4[%c0_32, %c3, %c0_33], %169 {strides = array<i32>} : memref<2x8x32xf32, #tpu.memory_space<vmem>>, vector<2x1x32xf32>,
    %170 = vector.extract_strided_slice %165 {offsets = [0, 32], sizes = [2, 32], strides = [1, 1]} : vector<2x64xf32> to vector<2x32xf32>
    %c0_34 = arith.constant 0 : index
    %c4 = arith.constant 4 : index
    %c0_35 = arith.constant 0 : index
    %171 = vector.load %arg5[%c0_34, %c4, %c0_35] : memref<2x8x32xf32, #tpu.memory_space<vmem>>, vector<2x1x32xf32>
    %172 = vector.shape_cast %171 : vector<2x1x32xf32> to vector<2x32xf32>
    %173 = vector.shape_cast %170 : vector<2x32xf32> to vector<2x1x32xf32>
    tpu.vector_store %arg5[%c0_34, %c4, %c0_35], %173 {strides = array<i32>} : memref<2x8x32xf32, #tpu.memory_space<vmem>>, vector<2x1x32xf32>,
    %cst_36 = arith.constant dense<0.000000e+00> : vector<2x256xf32>
    %174 = tpu.matmul %165, %21, %cst_36 {dimension_numbers = #tpu.dot_dimension_numbers<[1], [0], [0], [1], [0, 0, 1, 1], [], []>} : vector<2x64xf32>, vector<64x256xf32>, vector<2x256xf32> -> vector<2x256xf32>
    %175 = arith.addf %174, %52 : vector<2x256xf32>
    %176 = vector.extract_strided_slice %175 {offsets = [0, 0], sizes = [2, 192], strides = [1, 1]} : vector<2x256xf32> to vector<2x192xf32>
    %177 = arith.negf %176 : vector<2x192xf32>
    %178 = math.exp %177 : vector<2x192xf32>
    %cst_37 = arith.constant 1.000000e+00 : f32
    %179 = vector.broadcast %cst_37 : f32 to vector<2x192xf32>
    %180 = arith.addf %179, %178 : vector<2x192xf32>
    %181 = arith.divf %179, %180 : vector<2x192xf32>
    %182 = vector.extract_strided_slice %181 {offsets = [0, 0], sizes = [2, 64], strides = [1, 1]} : vector<2x192xf32> to vector<2x64xf32>
    %183 = vector.extract_strided_slice %181 {offsets = [0, 64], sizes = [2, 64], strides = [1, 1]} : vector<2x192xf32> to vector<2x64xf32>
    %184 = vector.extract_strided_slice %181 {offsets = [0, 128], sizes = [2, 64], strides = [1, 1]} : vector<2x192xf32> to vector<2x64xf32>
    %185 = vector.extract_strided_slice %175 {offsets = [0, 192], sizes = [2, 64], strides = [1, 1]} : vector<2x256xf32> to vector<2x64xf32>
    %186 = math.tanh %185 : vector<2x64xf32>
    %187 = arith.mulf %183, %163 : vector<2x64xf32>
    %188 = arith.mulf %182, %186 : vector<2x64xf32>
    %189 = arith.addf %187, %188 : vector<2x64xf32>
    %190 = math.tanh %189 : vector<2x64xf32>
    %191 = arith.mulf %184, %190 : vector<2x64xf32>
    %192 = vector.extract_strided_slice %191 {offsets = [0, 0], sizes = [2, 32], strides = [1, 1]} : vector<2x64xf32> to vector<2x32xf32>
    %c0_38 = arith.constant 0 : index
    %c4_39 = arith.constant 4 : index
    %c0_40 = arith.constant 0 : index
    %193 = vector.load %arg4[%c0_38, %c4_39, %c0_40] : memref<2x8x32xf32, #tpu.memory_space<vmem>>, vector<2x1x32xf32>
    %194 = vector.shape_cast %193 : vector<2x1x32xf32> to vector<2x32xf32>
    %195 = vector.shape_cast %192 : vector<2x32xf32> to vector<2x1x32xf32>
    tpu.vector_store %arg4[%c0_38, %c4_39, %c0_40], %195 {strides = array<i32>} : memref<2x8x32xf32, #tpu.memory_space<vmem>>, vector<2x1x32xf32>,
    %196 = vector.extract_strided_slice %191 {offsets = [0, 32], sizes = [2, 32], strides = [1, 1]} : vector<2x64xf32> to vector<2x32xf32>
    %c0_41 = arith.constant 0 : index
    %c3_42 = arith.constant 3 : index
    %c0_43 = arith.constant 0 : index
    %197 = vector.load %arg5[%c0_41, %c3_42, %c0_43] : memref<2x8x32xf32, #tpu.memory_space<vmem>>, vector<2x1x32xf32>
    %198 = vector.shape_cast %197 : vector<2x1x32xf32> to vector<2x32xf32>
    %199 = vector.shape_cast %196 : vector<2x32xf32> to vector<2x1x32xf32>
    tpu.vector_store %arg5[%c0_41, %c3_42, %c0_43], %199 {strides = array<i32>} : memref<2x8x32xf32, #tpu.memory_space<vmem>>, vector<2x1x32xf32>,
    %cst_44 = arith.constant dense<0.000000e+00> : vector<2x256xf32>
    %200 = tpu.matmul %191, %21, %cst_44 {dimension_numbers = #tpu.dot_dimension_numbers<[1], [0], [0], [1], [0, 0, 1, 1], [], []>} : vector<2x64xf32>, vector<64x256xf32>, vector<2x256xf32> -> vector<2x256xf32>
    %201 = arith.addf %200, %57 : vector<2x256xf32>
    %202 = vector.extract_strided_slice %201 {offsets = [0, 0], sizes = [2, 192], strides = [1, 1]} : vector<2x256xf32> to vector<2x192xf32>
    %203 = arith.negf %202 : vector<2x192xf32>
    %204 = math.exp %203 : vector<2x192xf32>
    %cst_45 = arith.constant 1.000000e+00 : f32
    %205 = vector.broadcast %cst_45 : f32 to vector<2x192xf32>
    %206 = arith.addf %205, %204 : vector<2x192xf32>
    %207 = arith.divf %205, %206 : vector<2x192xf32>
    %208 = vector.extract_strided_slice %207 {offsets = [0, 0], sizes = [2, 64], strides = [1, 1]} : vector<2x192xf32> to vector<2x64xf32>
    %209 = vector.extract_strided_slice %207 {offsets = [0, 64], sizes = [2, 64], strides = [1, 1]} : vector<2x192xf32> to vector<2x64xf32>
    %210 = vector.extract_strided_slice %207 {offsets = [0, 128], sizes = [2, 64], strides = [1, 1]} : vector<2x192xf32> to vector<2x64xf32>
    %211 = vector.extract_strided_slice %201 {offsets = [0, 192], sizes = [2, 64], strides = [1, 1]} : vector<2x256xf32> to vector<2x64xf32>
    %212 = math.tanh %211 : vector<2x64xf32>
    %213 = arith.mulf %209, %189 : vector<2x64xf32>
    %214 = arith.mulf %208, %212 : vector<2x64xf32>
    %215 = arith.addf %213, %214 : vector<2x64xf32>
    %216 = math.tanh %215 : vector<2x64xf32>
    %217 = arith.mulf %210, %216 : vector<2x64xf32>
    %218 = vector.extract_strided_slice %217 {offsets = [0, 0], sizes = [2, 32], strides = [1, 1]} : vector<2x64xf32> to vector<2x32xf32>
    %c0_46 = arith.constant 0 : index
    %c5_47 = arith.constant 5 : index
    %c0_48 = arith.constant 0 : index
    %219 = vector.load %arg4[%c0_46, %c5_47, %c0_48] : memref<2x8x32xf32, #tpu.memory_space<vmem>>, vector<2x1x32xf32>
    %220 = vector.shape_cast %219 : vector<2x1x32xf32> to vector<2x32xf32>
    %221 = vector.shape_cast %218 : vector<2x32xf32> to vector<2x1x32xf32>
    tpu.vector_store %arg4[%c0_46, %c5_47, %c0_48], %221 {strides = array<i32>} : memref<2x8x32xf32, #tpu.memory_space<vmem>>, vector<2x1x32xf32>,
    %222 = vector.extract_strided_slice %217 {offsets = [0, 32], sizes = [2, 32], strides = [1, 1]} : vector<2x64xf32> to vector<2x32xf32>
    %c0_49 = arith.constant 0 : index
    %c2_50 = arith.constant 2 : index
    %c0_51 = arith.constant 0 : index
    %223 = vector.load %arg5[%c0_49, %c2_50, %c0_51] : memref<2x8x32xf32, #tpu.memory_space<vmem>>, vector<2x1x32xf32>
    %224 = vector.shape_cast %223 : vector<2x1x32xf32> to vector<2x32xf32>
    %225 = vector.shape_cast %222 : vector<2x32xf32> to vector<2x1x32xf32>
    tpu.vector_store %arg5[%c0_49, %c2_50, %c0_51], %225 {strides = array<i32>} : memref<2x8x32xf32, #tpu.memory_space<vmem>>, vector<2x1x32xf32>,
    %cst_52 = arith.constant dense<0.000000e+00> : vector<2x256xf32>
    %226 = tpu.matmul %217, %21, %cst_52 {dimension_numbers = #tpu.dot_dimension_numbers<[1], [0], [0], [1], [0, 0, 1, 1], [], []>} : vector<2x64xf32>, vector<64x256xf32>, vector<2x256xf32> -> vector<2x256xf32>
    %227 = arith.addf %226, %62 : vector<2x256xf32>
    %228 = vector.extract_strided_slice %227 {offsets = [0, 0], sizes = [2, 192], strides = [1, 1]} : vector<2x256xf32> to vector<2x192xf32>
    %229 = arith.negf %228 : vector<2x192xf32>
    %230 = math.exp %229 : vector<2x192xf32>
    %cst_53 = arith.constant 1.000000e+00 : f32
    %231 = vector.broadcast %cst_53 : f32 to vector<2x192xf32>
    %232 = arith.addf %231, %230 : vector<2x192xf32>
    %233 = arith.divf %231, %232 : vector<2x192xf32>
    %234 = vector.extract_strided_slice %233 {offsets = [0, 0], sizes = [2, 64], strides = [1, 1]} : vector<2x192xf32> to vector<2x64xf32>
    %235 = vector.extract_strided_slice %233 {offsets = [0, 64], sizes = [2, 64], strides = [1, 1]} : vector<2x192xf32> to vector<2x64xf32>
    %236 = vector.extract_strided_slice %233 {offsets = [0, 128], sizes = [2, 64], strides = [1, 1]} : vector<2x192xf32> to vector<2x64xf32>
    %237 = vector.extract_strided_slice %227 {offsets = [0, 192], sizes = [2, 64], strides = [1, 1]} : vector<2x256xf32> to vector<2x64xf32>
    %238 = math.tanh %237 : vector<2x64xf32>
    %239 = arith.mulf %235, %215 : vector<2x64xf32>
    %240 = arith.mulf %234, %238 : vector<2x64xf32>
    %241 = arith.addf %239, %240 : vector<2x64xf32>
    %242 = math.tanh %241 : vector<2x64xf32>
    %243 = arith.mulf %236, %242 : vector<2x64xf32>
    %244 = vector.extract_strided_slice %243 {offsets = [0, 0], sizes = [2, 32], strides = [1, 1]} : vector<2x64xf32> to vector<2x32xf32>
    %c0_54 = arith.constant 0 : index
    %c6_55 = arith.constant 6 : index
    %c0_56 = arith.constant 0 : index
    %245 = vector.load %arg4[%c0_54, %c6_55, %c0_56] : memref<2x8x32xf32, #tpu.memory_space<vmem>>, vector<2x1x32xf32>
    %246 = vector.shape_cast %245 : vector<2x1x32xf32> to vector<2x32xf32>
    %247 = vector.shape_cast %244 : vector<2x32xf32> to vector<2x1x32xf32>
    tpu.vector_store %arg4[%c0_54, %c6_55, %c0_56], %247 {strides = array<i32>} : memref<2x8x32xf32, #tpu.memory_space<vmem>>, vector<2x1x32xf32>,
    %248 = vector.extract_strided_slice %243 {offsets = [0, 32], sizes = [2, 32], strides = [1, 1]} : vector<2x64xf32> to vector<2x32xf32>
    %c0_57 = arith.constant 0 : index
    %c1_58 = arith.constant 1 : index
    %c0_59 = arith.constant 0 : index
    %249 = vector.load %arg5[%c0_57, %c1_58, %c0_59] : memref<2x8x32xf32, #tpu.memory_space<vmem>>, vector<2x1x32xf32>
    %250 = vector.shape_cast %249 : vector<2x1x32xf32> to vector<2x32xf32>
    %251 = vector.shape_cast %248 : vector<2x32xf32> to vector<2x1x32xf32>
    tpu.vector_store %arg5[%c0_57, %c1_58, %c0_59], %251 {strides = array<i32>} : memref<2x8x32xf32, #tpu.memory_space<vmem>>, vector<2x1x32xf32>,
    %cst_60 = arith.constant dense<0.000000e+00> : vector<2x256xf32>
    %252 = tpu.matmul %243, %21, %cst_60 {dimension_numbers = #tpu.dot_dimension_numbers<[1], [0], [0], [1], [0, 0, 1, 1], [], []>} : vector<2x64xf32>, vector<64x256xf32>, vector<2x256xf32> -> vector<2x256xf32>
    %253 = arith.addf %252, %67 : vector<2x256xf32>
    %254 = vector.extract_strided_slice %253 {offsets = [0, 0], sizes = [2, 192], strides = [1, 1]} : vector<2x256xf32> to vector<2x192xf32>
    %255 = arith.negf %254 : vector<2x192xf32>
    %256 = math.exp %255 : vector<2x192xf32>
    %cst_61 = arith.constant 1.000000e+00 : f32
    %257 = vector.broadcast %cst_61 : f32 to vector<2x192xf32>
    %258 = arith.addf %257, %256 : vector<2x192xf32>
    %259 = arith.divf %257, %258 : vector<2x192xf32>
    %260 = vector.extract_strided_slice %259 {offsets = [0, 0], sizes = [2, 64], strides = [1, 1]} : vector<2x192xf32> to vector<2x64xf32>
    %261 = vector.extract_strided_slice %259 {offsets = [0, 64], sizes = [2, 64], strides = [1, 1]} : vector<2x192xf32> to vector<2x64xf32>
    %262 = vector.extract_strided_slice %259 {offsets = [0, 128], sizes = [2, 64], strides = [1, 1]} : vector<2x192xf32> to vector<2x64xf32>
    %263 = vector.extract_strided_slice %253 {offsets = [0, 192], sizes = [2, 64], strides = [1, 1]} : vector<2x256xf32> to vector<2x64xf32>
    %264 = math.tanh %263 : vector<2x64xf32>
    %265 = arith.mulf %261, %241 : vector<2x64xf32>
    %266 = arith.mulf %260, %264 : vector<2x64xf32>
    %267 = arith.addf %265, %266 : vector<2x64xf32>
    %268 = math.tanh %267 : vector<2x64xf32>
    %269 = arith.mulf %262, %268 : vector<2x64xf32>
    %270 = vector.extract_strided_slice %269 {offsets = [0, 0], sizes = [2, 32], strides = [1, 1]} : vector<2x64xf32> to vector<2x32xf32>
    %c0_62 = arith.constant 0 : index
    %c7_63 = arith.constant 7 : index
    %c0_64 = arith.constant 0 : index
    %271 = vector.load %arg4[%c0_62, %c7_63, %c0_64] : memref<2x8x32xf32, #tpu.memory_space<vmem>>, vector<2x1x32xf32>
    %272 = vector.shape_cast %271 : vector<2x1x32xf32> to vector<2x32xf32>
    %273 = vector.shape_cast %270 : vector<2x32xf32> to vector<2x1x32xf32>
    tpu.vector_store %arg4[%c0_62, %c7_63, %c0_64], %273 {strides = array<i32>} : memref<2x8x32xf32, #tpu.memory_space<vmem>>, vector<2x1x32xf32>,
    %274 = vector.extract_strided_slice %269 {offsets = [0, 32], sizes = [2, 32], strides = [1, 1]} : vector<2x64xf32> to vector<2x32xf32>
    %c0_65 = arith.constant 0 : index
    %c0_66 = arith.constant 0 : index
    %c0_67 = arith.constant 0 : index
    %275 = vector.load %arg5[%c0_65, %c0_66, %c0_67] : memref<2x8x32xf32, #tpu.memory_space<vmem>>, vector<2x1x32xf32>
    %276 = vector.shape_cast %275 : vector<2x1x32xf32> to vector<2x32xf32>
    %277 = vector.shape_cast %274 : vector<2x32xf32> to vector<2x1x32xf32>
    tpu.vector_store %arg5[%c0_65, %c0_66, %c0_67], %277 {strides = array<i32>} : memref<2x8x32xf32, #tpu.memory_space<vmem>>, vector<2x1x32xf32>,
    %c0_68 = arith.constant 0 : index
    %c0_69 = arith.constant 0 : index
    %c0_70 = arith.constant 0 : index
    %278 = vector.load %arg4[%c0_68, %c0_69, %c0_70] : memref<2x8x32xf32, #tpu.memory_space<vmem>>, vector<2x8x32xf32>
    %c0_71 = arith.constant 0 : index
    %c0_72 = arith.constant 0 : index
    %c0_73 = arith.constant 0 : index
    %279 = vector.load %arg5[%c0_71, %c0_72, %c0_73] : memref<2x8x32xf32, #tpu.memory_space<vmem>>, vector<2x8x32xf32>
    %280 = tpu.concatenate %278, %279 in 2 : vector<2x8x32xf32>, vector<2x8x32xf32> -> vector<2x8x64xf32>
    %c88 = arith.constant 88 : index
    %c0_74 = arith.constant 0 : index
    %281 = vector.load %arg1[%c88, %c0_74] : memref<360x256xf32, #tpu.memory_space<vmem>>, vector<64x256xf32>
    %c152 = arith.constant 152 : index
    %c0_75 = arith.constant 0 : index
    %282 = vector.load %arg1[%c152, %c0_75] : memref<360x256xf32, #tpu.memory_space<vmem>>, vector<64x256xf32>
    %c216 = arith.constant 216 : index
    %c0_76 = arith.constant 0 : index
    %283 = vector.load %arg1[%c216, %c0_76] : memref<360x256xf32, #tpu.memory_space<vmem>>, vector<1x256xf32>
    %284 = vector.shape_cast %280 : vector<2x8x64xf32> to vector<16x64xf32>
    %cst_77 = arith.constant dense<0.000000e+00> : vector<16x256xf32>
    %285 = tpu.matmul %284, %281, %cst_77 {dimension_numbers = #tpu.dot_dimension_numbers<[1], [0], [0], [1], [0, 0, 1, 1], [], []>} : vector<16x64xf32>, vector<64x256xf32>, vector<16x256xf32> -> vector<16x256xf32>
    %286 = vector.broadcast %283 : vector<1x256xf32> to vector<16x256xf32>
    %287 = arith.addf %285, %286 : vector<16x256xf32>
    %288 = vector.shape_cast %287 : vector<16x256xf32> to vector<2x8x256xf32>
    %289 = vector.extract_strided_slice %288 {offsets = [0, 0, 0], sizes = [2, 1, 256], strides = [1, 1, 1]} : vector<2x8x256xf32> to vector<2x1x256xf32>
    %290 = vector.shape_cast %289 : vector<2x1x256xf32> to vector<2x256xf32>
    %291 = vector.extract_strided_slice %288 {offsets = [0, 7, 0], sizes = [2, 1, 256], strides = [1, 1, 1]} : vector<2x8x256xf32> to vector<2x1x256xf32>
    %292 = vector.shape_cast %291 : vector<2x1x256xf32> to vector<2x256xf32>
    %293 = arith.select %18, %290, %292 : vector<2x256xi1>, vector<2x256xf32>
    %294 = vector.extract_strided_slice %288 {offsets = [0, 1, 0], sizes = [2, 1, 256], strides = [1, 1, 1]} : vector<2x8x256xf32> to vector<2x1x256xf32>
    %295 = vector.shape_cast %294 : vector<2x1x256xf32> to vector<2x256xf32>
    %296 = vector.extract_strided_slice %288 {offsets = [0, 6, 0], sizes = [2, 1, 256], strides = [1, 1, 1]} : vector<2x8x256xf32> to vector<2x1x256xf32>
    %297 = vector.shape_cast %296 : vector<2x1x256xf32> to vector<2x256xf32>
    %298 = arith.select %18, %295, %297 : vector<2x256xi1>, vector<2x256xf32>
    %299 = vector.extract_strided_slice %288 {offsets = [0, 2, 0], sizes = [2, 1, 256], strides = [1, 1, 1]} : vector<2x8x256xf32> to vector<2x1x256xf32>
    %300 = vector.shape_cast %299 : vector<2x1x256xf32> to vector<2x256xf32>
    %301 = vector.extract_strided_slice %288 {offsets = [0, 5, 0], sizes = [2, 1, 256], strides = [1, 1, 1]} : vector<2x8x256xf32> to vector<2x1x256xf32>
    %302 = vector.shape_cast %301 : vector<2x1x256xf32> to vector<2x256xf32>
    %303 = arith.select %18, %300, %302 : vector<2x256xi1>, vector<2x256xf32>
    %304 = vector.extract_strided_slice %288 {offsets = [0, 3, 0], sizes = [2, 1, 256], strides = [1, 1, 1]} : vector<2x8x256xf32> to vector<2x1x256xf32>
    %305 = vector.shape_cast %304 : vector<2x1x256xf32> to vector<2x256xf32>
    %306 = vector.extract_strided_slice %288 {offsets = [0, 4, 0], sizes = [2, 1, 256], strides = [1, 1, 1]} : vector<2x8x256xf32> to vector<2x1x256xf32>
    %307 = vector.shape_cast %306 : vector<2x1x256xf32> to vector<2x256xf32>
    %308 = arith.select %18, %305, %307 : vector<2x256xi1>, vector<2x256xf32>
    %309 = vector.extract_strided_slice %288 {offsets = [0, 4, 0], sizes = [2, 1, 256], strides = [1, 1, 1]} : vector<2x8x256xf32> to vector<2x1x256xf32>
    %310 = vector.shape_cast %309 : vector<2x1x256xf32> to vector<2x256xf32>
    %311 = vector.extract_strided_slice %288 {offsets = [0, 3, 0], sizes = [2, 1, 256], strides = [1, 1, 1]} : vector<2x8x256xf32> to vector<2x1x256xf32>
    %312 = vector.shape_cast %311 : vector<2x1x256xf32> to vector<2x256xf32>
    %313 = arith.select %18, %310, %312 : vector<2x256xi1>, vector<2x256xf32>
    %314 = vector.extract_strided_slice %288 {offsets = [0, 5, 0], sizes = [2, 1, 256], strides = [1, 1, 1]} : vector<2x8x256xf32> to vector<2x1x256xf32>
    %315 = vector.shape_cast %314 : vector<2x1x256xf32> to vector<2x256xf32>
    %316 = vector.extract_strided_slice %288 {offsets = [0, 2, 0], sizes = [2, 1, 256], strides = [1, 1, 1]} : vector<2x8x256xf32> to vector<2x1x256xf32>
    %317 = vector.shape_cast %316 : vector<2x1x256xf32> to vector<2x256xf32>
    %318 = arith.select %18, %315, %317 : vector<2x256xi1>, vector<2x256xf32>
    %319 = vector.extract_strided_slice %288 {offsets = [0, 6, 0], sizes = [2, 1, 256], strides = [1, 1, 1]} : vector<2x8x256xf32> to vector<2x1x256xf32>
    %320 = vector.shape_cast %319 : vector<2x1x256xf32> to vector<2x256xf32>
    %321 = vector.extract_strided_slice %288 {offsets = [0, 1, 0], sizes = [2, 1, 256], strides = [1, 1, 1]} : vector<2x8x256xf32> to vector<2x1x256xf32>
    %322 = vector.shape_cast %321 : vector<2x1x256xf32> to vector<2x256xf32>
    %323 = arith.select %18, %320, %322 : vector<2x256xi1>, vector<2x256xf32>
    %324 = vector.extract_strided_slice %288 {offsets = [0, 7, 0], sizes = [2, 1, 256], strides = [1, 1, 1]} : vector<2x8x256xf32> to vector<2x1x256xf32>
    %325 = vector.shape_cast %324 : vector<2x1x256xf32> to vector<2x256xf32>
    %326 = vector.extract_strided_slice %288 {offsets = [0, 0, 0], sizes = [2, 1, 256], strides = [1, 1, 1]} : vector<2x8x256xf32> to vector<2x1x256xf32>
    %327 = vector.shape_cast %326 : vector<2x1x256xf32> to vector<2x256xf32>
    %328 = arith.select %18, %325, %327 : vector<2x256xi1>, vector<2x256xf32>
    %cst_78 = arith.constant 0.000000e+00 : f32
    %329 = vector.broadcast %cst_78 : f32 to vector<2x64xf32>
    %cst_79 = arith.constant 0.000000e+00 : f32
    %330 = vector.broadcast %cst_79 : f32 to vector<2x64xf32>
    %cst_80 = arith.constant dense<0.000000e+00> : vector<2x256xf32>
    %331 = tpu.matmul %329, %282, %cst_80 {dimension_numbers = #tpu.dot_dimension_numbers<[1], [0], [0], [1], [0, 0, 1, 1], [], []>} : vector<2x64xf32>, vector<64x256xf32>, vector<2x256xf32> -> vector<2x256xf32>
    %332 = arith.addf %331, %293 : vector<2x256xf32>
    %333 = vector.extract_strided_slice %332 {offsets = [0, 0], sizes = [2, 192], strides = [1, 1]} : vector<2x256xf32> to vector<2x192xf32>
    %334 = arith.negf %333 : vector<2x192xf32>
    %335 = math.exp %334 : vector<2x192xf32>
    %cst_81 = arith.constant 1.000000e+00 : f32
    %336 = vector.broadcast %cst_81 : f32 to vector<2x192xf32>
    %337 = arith.addf %336, %335 : vector<2x192xf32>
    %338 = arith.divf %336, %337 : vector<2x192xf32>
    %339 = vector.extract_strided_slice %338 {offsets = [0, 0], sizes = [2, 64], strides = [1, 1]} : vector<2x192xf32> to vector<2x64xf32>
    %340 = vector.extract_strided_slice %338 {offsets = [0, 64], sizes = [2, 64], strides = [1, 1]} : vector<2x192xf32> to vector<2x64xf32>
    %341 = vector.extract_strided_slice %338 {offsets = [0, 128], sizes = [2, 64], strides = [1, 1]} : vector<2x192xf32> to vector<2x64xf32>
    %342 = vector.extract_strided_slice %332 {offsets = [0, 192], sizes = [2, 64], strides = [1, 1]} : vector<2x256xf32> to vector<2x64xf32>
    %343 = math.tanh %342 : vector<2x64xf32>
    %344 = arith.mulf %340, %330 : vector<2x64xf32>
    %345 = arith.mulf %339, %343 : vector<2x64xf32>
    %346 = arith.addf %344, %345 : vector<2x64xf32>
    %347 = math.tanh %346 : vector<2x64xf32>
    %348 = arith.mulf %341, %347 : vector<2x64xf32>
    %349 = vector.extract_strided_slice %348 {offsets = [0, 0], sizes = [2, 32], strides = [1, 1]} : vector<2x64xf32> to vector<2x32xf32>
    %c0_82 = arith.constant 0 : index
    %c0_83 = arith.constant 0 : index
    %c0_84 = arith.constant 0 : index
    %350 = vector.load %arg4[%c0_82, %c0_83, %c0_84] : memref<2x8x32xf32, #tpu.memory_space<vmem>>, vector<2x1x32xf32>
    %351 = vector.shape_cast %350 : vector<2x1x32xf32> to vector<2x32xf32>
    %352 = vector.shape_cast %349 : vector<2x32xf32> to vector<2x1x32xf32>
    tpu.vector_store %arg4[%c0_82, %c0_83, %c0_84], %352 {strides = array<i32>} : memref<2x8x32xf32, #tpu.memory_space<vmem>>, vector<2x1x32xf32>,
    %353 = vector.extract_strided_slice %348 {offsets = [0, 32], sizes = [2, 32], strides = [1, 1]} : vector<2x64xf32> to vector<2x32xf32>
    %c0_85 = arith.constant 0 : index
    %c7_86 = arith.constant 7 : index
    %c0_87 = arith.constant 0 : index
    %354 = vector.load %arg5[%c0_85, %c7_86, %c0_87] : memref<2x8x32xf32, #tpu.memory_space<vmem>>, vector<2x1x32xf32>
    %355 = vector.shape_cast %354 : vector<2x1x32xf32> to vector<2x32xf32>
    %356 = vector.shape_cast %353 : vector<2x32xf32> to vector<2x1x32xf32>
    tpu.vector_store %arg5[%c0_85, %c7_86, %c0_87], %356 {strides = array<i32>} : memref<2x8x32xf32, #tpu.memory_space<vmem>>, vector<2x1x32xf32>,
    %cst_88 = arith.constant dense<0.000000e+00> : vector<2x256xf32>
    %357 = tpu.matmul %348, %282, %cst_88 {dimension_numbers = #tpu.dot_dimension_numbers<[1], [0], [0], [1], [0, 0, 1, 1], [], []>} : vector<2x64xf32>, vector<64x256xf32>, vector<2x256xf32> -> vector<2x256xf32>
    %358 = arith.addf %357, %298 : vector<2x256xf32>
    %359 = vector.extract_strided_slice %358 {offsets = [0, 0], sizes = [2, 192], strides = [1, 1]} : vector<2x256xf32> to vector<2x192xf32>
    %360 = arith.negf %359 : vector<2x192xf32>
    %361 = math.exp %360 : vector<2x192xf32>
    %cst_89 = arith.constant 1.000000e+00 : f32
    %362 = vector.broadcast %cst_89 : f32 to vector<2x192xf32>
    %363 = arith.addf %362, %361 : vector<2x192xf32>
    %364 = arith.divf %362, %363 : vector<2x192xf32>
    %365 = vector.extract_strided_slice %364 {offsets = [0, 0], sizes = [2, 64], strides = [1, 1]} : vector<2x192xf32> to vector<2x64xf32>
    %366 = vector.extract_strided_slice %364 {offsets = [0, 64], sizes = [2, 64], strides = [1, 1]} : vector<2x192xf32> to vector<2x64xf32>
    %367 = vector.extract_strided_slice %364 {offsets = [0, 128], sizes = [2, 64], strides = [1, 1]} : vector<2x192xf32> to vector<2x64xf32>
    %368 = vector.extract_strided_slice %358 {offsets = [0, 192], sizes = [2, 64], strides = [1, 1]} : vector<2x256xf32> to vector<2x64xf32>
    %369 = math.tanh %368 : vector<2x64xf32>
    %370 = arith.mulf %366, %346 : vector<2x64xf32>
    %371 = arith.mulf %365, %369 : vector<2x64xf32>
    %372 = arith.addf %370, %371 : vector<2x64xf32>
    %373 = math.tanh %372 : vector<2x64xf32>
    %374 = arith.mulf %367, %373 : vector<2x64xf32>
    %375 = vector.extract_strided_slice %374 {offsets = [0, 0], sizes = [2, 32], strides = [1, 1]} : vector<2x64xf32> to vector<2x32xf32>
    %c0_90 = arith.constant 0 : index
    %c1_91 = arith.constant 1 : index
    %c0_92 = arith.constant 0 : index
    %376 = vector.load %arg4[%c0_90, %c1_91, %c0_92] : memref<2x8x32xf32, #tpu.memory_space<vmem>>, vector<2x1x32xf32>
    %377 = vector.shape_cast %376 : vector<2x1x32xf32> to vector<2x32xf32>
    %378 = vector.shape_cast %375 : vector<2x32xf32> to vector<2x1x32xf32>
    tpu.vector_store %arg4[%c0_90, %c1_91, %c0_92], %378 {strides = array<i32>} : memref<2x8x32xf32, #tpu.memory_space<vmem>>, vector<2x1x32xf32>,
    %379 = vector.extract_strided_slice %374 {offsets = [0, 32], sizes = [2, 32], strides = [1, 1]} : vector<2x64xf32> to vector<2x32xf32>
    %c0_93 = arith.constant 0 : index
    %c6_94 = arith.constant 6 : index
    %c0_95 = arith.constant 0 : index
    %380 = vector.load %arg5[%c0_93, %c6_94, %c0_95] : memref<2x8x32xf32, #tpu.memory_space<vmem>>, vector<2x1x32xf32>
    %381 = vector.shape_cast %380 : vector<2x1x32xf32> to vector<2x32xf32>
    %382 = vector.shape_cast %379 : vector<2x32xf32> to vector<2x1x32xf32>
    tpu.vector_store %arg5[%c0_93, %c6_94, %c0_95], %382 {strides = array<i32>} : memref<2x8x32xf32, #tpu.memory_space<vmem>>, vector<2x1x32xf32>,
    %cst_96 = arith.constant dense<0.000000e+00> : vector<2x256xf32>
    %383 = tpu.matmul %374, %282, %cst_96 {dimension_numbers = #tpu.dot_dimension_numbers<[1], [0], [0], [1], [0, 0, 1, 1], [], []>} : vector<2x64xf32>, vector<64x256xf32>, vector<2x256xf32> -> vector<2x256xf32>
    %384 = arith.addf %383, %303 : vector<2x256xf32>
    %385 = vector.extract_strided_slice %384 {offsets = [0, 0], sizes = [2, 192], strides = [1, 1]} : vector<2x256xf32> to vector<2x192xf32>
    %386 = arith.negf %385 : vector<2x192xf32>
    %387 = math.exp %386 : vector<2x192xf32>
    %cst_97 = arith.constant 1.000000e+00 : f32
    %388 = vector.broadcast %cst_97 : f32 to vector<2x192xf32>
    %389 = arith.addf %388, %387 : vector<2x192xf32>
    %390 = arith.divf %388, %389 : vector<2x192xf32>
    %391 = vector.extract_strided_slice %390 {offsets = [0, 0], sizes = [2, 64], strides = [1, 1]} : vector<2x192xf32> to vector<2x64xf32>
    %392 = vector.extract_strided_slice %390 {offsets = [0, 64], sizes = [2, 64], strides = [1, 1]} : vector<2x192xf32> to vector<2x64xf32>
    %393 = vector.extract_strided_slice %390 {offsets = [0, 128], sizes = [2, 64], strides = [1, 1]} : vector<2x192xf32> to vector<2x64xf32>
    %394 = vector.extract_strided_slice %384 {offsets = [0, 192], sizes = [2, 64], strides = [1, 1]} : vector<2x256xf32> to vector<2x64xf32>
    %395 = math.tanh %394 : vector<2x64xf32>
    %396 = arith.mulf %392, %372 : vector<2x64xf32>
    %397 = arith.mulf %391, %395 : vector<2x64xf32>
    %398 = arith.addf %396, %397 : vector<2x64xf32>
    %399 = math.tanh %398 : vector<2x64xf32>
    %400 = arith.mulf %393, %399 : vector<2x64xf32>
    %401 = vector.extract_strided_slice %400 {offsets = [0, 0], sizes = [2, 32], strides = [1, 1]} : vector<2x64xf32> to vector<2x32xf32>
    %c0_98 = arith.constant 0 : index
    %c2_99 = arith.constant 2 : index
    %c0_100 = arith.constant 0 : index
    %402 = vector.load %arg4[%c0_98, %c2_99, %c0_100] : memref<2x8x32xf32, #tpu.memory_space<vmem>>, vector<2x1x32xf32>
    %403 = vector.shape_cast %402 : vector<2x1x32xf32> to vector<2x32xf32>
    %404 = vector.shape_cast %401 : vector<2x32xf32> to vector<2x1x32xf32>
    tpu.vector_store %arg4[%c0_98, %c2_99, %c0_100], %404 {strides = array<i32>} : memref<2x8x32xf32, #tpu.memory_space<vmem>>, vector<2x1x32xf32>,
    %405 = vector.extract_strided_slice %400 {offsets = [0, 32], sizes = [2, 32], strides = [1, 1]} : vector<2x64xf32> to vector<2x32xf32>
    %c0_101 = arith.constant 0 : index
    %c5_102 = arith.constant 5 : index
    %c0_103 = arith.constant 0 : index
    %406 = vector.load %arg5[%c0_101, %c5_102, %c0_103] : memref<2x8x32xf32, #tpu.memory_space<vmem>>, vector<2x1x32xf32>
    %407 = vector.shape_cast %406 : vector<2x1x32xf32> to vector<2x32xf32>
    %408 = vector.shape_cast %405 : vector<2x32xf32> to vector<2x1x32xf32>
    tpu.vector_store %arg5[%c0_101, %c5_102, %c0_103], %408 {strides = array<i32>} : memref<2x8x32xf32, #tpu.memory_space<vmem>>, vector<2x1x32xf32>,
    %cst_104 = arith.constant dense<0.000000e+00> : vector<2x256xf32>
    %409 = tpu.matmul %400, %282, %cst_104 {dimension_numbers = #tpu.dot_dimension_numbers<[1], [0], [0], [1], [0, 0, 1, 1], [], []>} : vector<2x64xf32>, vector<64x256xf32>, vector<2x256xf32> -> vector<2x256xf32>
    %410 = arith.addf %409, %308 : vector<2x256xf32>
    %411 = vector.extract_strided_slice %410 {offsets = [0, 0], sizes = [2, 192], strides = [1, 1]} : vector<2x256xf32> to vector<2x192xf32>
    %412 = arith.negf %411 : vector<2x192xf32>
    %413 = math.exp %412 : vector<2x192xf32>
    %cst_105 = arith.constant 1.000000e+00 : f32
    %414 = vector.broadcast %cst_105 : f32 to vector<2x192xf32>
    %415 = arith.addf %414, %413 : vector<2x192xf32>
    %416 = arith.divf %414, %415 : vector<2x192xf32>
    %417 = vector.extract_strided_slice %416 {offsets = [0, 0], sizes = [2, 64], strides = [1, 1]} : vector<2x192xf32> to vector<2x64xf32>
    %418 = vector.extract_strided_slice %416 {offsets = [0, 64], sizes = [2, 64], strides = [1, 1]} : vector<2x192xf32> to vector<2x64xf32>
    %419 = vector.extract_strided_slice %416 {offsets = [0, 128], sizes = [2, 64], strides = [1, 1]} : vector<2x192xf32> to vector<2x64xf32>
    %420 = vector.extract_strided_slice %410 {offsets = [0, 192], sizes = [2, 64], strides = [1, 1]} : vector<2x256xf32> to vector<2x64xf32>
    %421 = math.tanh %420 : vector<2x64xf32>
    %422 = arith.mulf %418, %398 : vector<2x64xf32>
    %423 = arith.mulf %417, %421 : vector<2x64xf32>
    %424 = arith.addf %422, %423 : vector<2x64xf32>
    %425 = math.tanh %424 : vector<2x64xf32>
    %426 = arith.mulf %419, %425 : vector<2x64xf32>
    %427 = vector.extract_strided_slice %426 {offsets = [0, 0], sizes = [2, 32], strides = [1, 1]} : vector<2x64xf32> to vector<2x32xf32>
    %c0_106 = arith.constant 0 : index
    %c3_107 = arith.constant 3 : index
    %c0_108 = arith.constant 0 : index
    %428 = vector.load %arg4[%c0_106, %c3_107, %c0_108] : memref<2x8x32xf32, #tpu.memory_space<vmem>>, vector<2x1x32xf32>
    %429 = vector.shape_cast %428 : vector<2x1x32xf32> to vector<2x32xf32>
    %430 = vector.shape_cast %427 : vector<2x32xf32> to vector<2x1x32xf32>
    tpu.vector_store %arg4[%c0_106, %c3_107, %c0_108], %430 {strides = array<i32>} : memref<2x8x32xf32, #tpu.memory_space<vmem>>, vector<2x1x32xf32>,
    %431 = vector.extract_strided_slice %426 {offsets = [0, 32], sizes = [2, 32], strides = [1, 1]} : vector<2x64xf32> to vector<2x32xf32>
    %c0_109 = arith.constant 0 : index
    %c4_110 = arith.constant 4 : index
    %c0_111 = arith.constant 0 : index
    %432 = vector.load %arg5[%c0_109, %c4_110, %c0_111] : memref<2x8x32xf32, #tpu.memory_space<vmem>>, vector<2x1x32xf32>
    %433 = vector.shape_cast %432 : vector<2x1x32xf32> to vector<2x32xf32>
    %434 = vector.shape_cast %431 : vector<2x32xf32> to vector<2x1x32xf32>
    tpu.vector_store %arg5[%c0_109, %c4_110, %c0_111], %434 {strides = array<i32>} : memref<2x8x32xf32, #tpu.memory_space<vmem>>, vector<2x1x32xf32>,
    %cst_112 = arith.constant dense<0.000000e+00> : vector<2x256xf32>
    %435 = tpu.matmul %426, %282, %cst_112 {dimension_numbers = #tpu.dot_dimension_numbers<[1], [0], [0], [1], [0, 0, 1, 1], [], []>} : vector<2x64xf32>, vector<64x256xf32>, vector<2x256xf32> -> vector<2x256xf32>
    %436 = arith.addf %435, %313 : vector<2x256xf32>
    %437 = vector.extract_strided_slice %436 {offsets = [0, 0], sizes = [2, 192], strides = [1, 1]} : vector<2x256xf32> to vector<2x192xf32>
    %438 = arith.negf %437 : vector<2x192xf32>
    %439 = math.exp %438 : vector<2x192xf32>
    %cst_113 = arith.constant 1.000000e+00 : f32
    %440 = vector.broadcast %cst_113 : f32 to vector<2x192xf32>
    %441 = arith.addf %440, %439 : vector<2x192xf32>
    %442 = arith.divf %440, %441 : vector<2x192xf32>
    %443 = vector.extract_strided_slice %442 {offsets = [0, 0], sizes = [2, 64], strides = [1, 1]} : vector<2x192xf32> to vector<2x64xf32>
    %444 = vector.extract_strided_slice %442 {offsets = [0, 64], sizes = [2, 64], strides = [1, 1]} : vector<2x192xf32> to vector<2x64xf32>
    %445 = vector.extract_strided_slice %442 {offsets = [0, 128], sizes = [2, 64], strides = [1, 1]} : vector<2x192xf32> to vector<2x64xf32>
    %446 = vector.extract_strided_slice %436 {offsets = [0, 192], sizes = [2, 64], strides = [1, 1]} : vector<2x256xf32> to vector<2x64xf32>
    %447 = math.tanh %446 : vector<2x64xf32>
    %448 = arith.mulf %444, %424 : vector<2x64xf32>
    %449 = arith.mulf %443, %447 : vector<2x64xf32>
    %450 = arith.addf %448, %449 : vector<2x64xf32>
    %451 = math.tanh %450 : vector<2x64xf32>
    %452 = arith.mulf %445, %451 : vector<2x64xf32>
    %453 = vector.extract_strided_slice %452 {offsets = [0, 0], sizes = [2, 32], strides = [1, 1]} : vector<2x64xf32> to vector<2x32xf32>
    %c0_114 = arith.constant 0 : index
    %c4_115 = arith.constant 4 : index
    %c0_116 = arith.constant 0 : index
    %454 = vector.load %arg4[%c0_114, %c4_115, %c0_116] : memref<2x8x32xf32, #tpu.memory_space<vmem>>, vector<2x1x32xf32>
    %455 = vector.shape_cast %454 : vector<2x1x32xf32> to vector<2x32xf32>
    %456 = vector.shape_cast %453 : vector<2x32xf32> to vector<2x1x32xf32>
    tpu.vector_store %arg4[%c0_114, %c4_115, %c0_116], %456 {strides = array<i32>} : memref<2x8x32xf32, #tpu.memory_space<vmem>>, vector<2x1x32xf32>,
    %457 = vector.extract_strided_slice %452 {offsets = [0, 32], sizes = [2, 32], strides = [1, 1]} : vector<2x64xf32> to vector<2x32xf32>
    %c0_117 = arith.constant 0 : index
    %c3_118 = arith.constant 3 : index
    %c0_119 = arith.constant 0 : index
    %458 = vector.load %arg5[%c0_117, %c3_118, %c0_119] : memref<2x8x32xf32, #tpu.memory_space<vmem>>, vector<2x1x32xf32>
    %459 = vector.shape_cast %458 : vector<2x1x32xf32> to vector<2x32xf32>
    %460 = vector.shape_cast %457 : vector<2x32xf32> to vector<2x1x32xf32>
    tpu.vector_store %arg5[%c0_117, %c3_118, %c0_119], %460 {strides = array<i32>} : memref<2x8x32xf32, #tpu.memory_space<vmem>>, vector<2x1x32xf32>,
    %cst_120 = arith.constant dense<0.000000e+00> : vector<2x256xf32>
    %461 = tpu.matmul %452, %282, %cst_120 {dimension_numbers = #tpu.dot_dimension_numbers<[1], [0], [0], [1], [0, 0, 1, 1], [], []>} : vector<2x64xf32>, vector<64x256xf32>, vector<2x256xf32> -> vector<2x256xf32>
    %462 = arith.addf %461, %318 : vector<2x256xf32>
    %463 = vector.extract_strided_slice %462 {offsets = [0, 0], sizes = [2, 192], strides = [1, 1]} : vector<2x256xf32> to vector<2x192xf32>
    %464 = arith.negf %463 : vector<2x192xf32>
    %465 = math.exp %464 : vector<2x192xf32>
    %cst_121 = arith.constant 1.000000e+00 : f32
    %466 = vector.broadcast %cst_121 : f32 to vector<2x192xf32>
    %467 = arith.addf %466, %465 : vector<2x192xf32>
    %468 = arith.divf %466, %467 : vector<2x192xf32>
    %469 = vector.extract_strided_slice %468 {offsets = [0, 0], sizes = [2, 64], strides = [1, 1]} : vector<2x192xf32> to vector<2x64xf32>
    %470 = vector.extract_strided_slice %468 {offsets = [0, 64], sizes = [2, 64], strides = [1, 1]} : vector<2x192xf32> to vector<2x64xf32>
    %471 = vector.extract_strided_slice %468 {offsets = [0, 128], sizes = [2, 64], strides = [1, 1]} : vector<2x192xf32> to vector<2x64xf32>
    %472 = vector.extract_strided_slice %462 {offsets = [0, 192], sizes = [2, 64], strides = [1, 1]} : vector<2x256xf32> to vector<2x64xf32>
    %473 = math.tanh %472 : vector<2x64xf32>
    %474 = arith.mulf %470, %450 : vector<2x64xf32>
    %475 = arith.mulf %469, %473 : vector<2x64xf32>
    %476 = arith.addf %474, %475 : vector<2x64xf32>
    %477 = math.tanh %476 : vector<2x64xf32>
    %478 = arith.mulf %471, %477 : vector<2x64xf32>
    %479 = vector.extract_strided_slice %478 {offsets = [0, 0], sizes = [2, 32], strides = [1, 1]} : vector<2x64xf32> to vector<2x32xf32>
    %c0_122 = arith.constant 0 : index
    %c5_123 = arith.constant 5 : index
    %c0_124 = arith.constant 0 : index
    %480 = vector.load %arg4[%c0_122, %c5_123, %c0_124] : memref<2x8x32xf32, #tpu.memory_space<vmem>>, vector<2x1x32xf32>
    %481 = vector.shape_cast %480 : vector<2x1x32xf32> to vector<2x32xf32>
    %482 = vector.shape_cast %479 : vector<2x32xf32> to vector<2x1x32xf32>
    tpu.vector_store %arg4[%c0_122, %c5_123, %c0_124], %482 {strides = array<i32>} : memref<2x8x32xf32, #tpu.memory_space<vmem>>, vector<2x1x32xf32>,
    %483 = vector.extract_strided_slice %478 {offsets = [0, 32], sizes = [2, 32], strides = [1, 1]} : vector<2x64xf32> to vector<2x32xf32>
    %c0_125 = arith.constant 0 : index
    %c2_126 = arith.constant 2 : index
    %c0_127 = arith.constant 0 : index
    %484 = vector.load %arg5[%c0_125, %c2_126, %c0_127] : memref<2x8x32xf32, #tpu.memory_space<vmem>>, vector<2x1x32xf32>
    %485 = vector.shape_cast %484 : vector<2x1x32xf32> to vector<2x32xf32>
    %486 = vector.shape_cast %483 : vector<2x32xf32> to vector<2x1x32xf32>
    tpu.vector_store %arg5[%c0_125, %c2_126, %c0_127], %486 {strides = array<i32>} : memref<2x8x32xf32, #tpu.memory_space<vmem>>, vector<2x1x32xf32>,
    %cst_128 = arith.constant dense<0.000000e+00> : vector<2x256xf32>
    %487 = tpu.matmul %478, %282, %cst_128 {dimension_numbers = #tpu.dot_dimension_numbers<[1], [0], [0], [1], [0, 0, 1, 1], [], []>} : vector<2x64xf32>, vector<64x256xf32>, vector<2x256xf32> -> vector<2x256xf32>
    %488 = arith.addf %487, %323 : vector<2x256xf32>
    %489 = vector.extract_strided_slice %488 {offsets = [0, 0], sizes = [2, 192], strides = [1, 1]} : vector<2x256xf32> to vector<2x192xf32>
    %490 = arith.negf %489 : vector<2x192xf32>
    %491 = math.exp %490 : vector<2x192xf32>
    %cst_129 = arith.constant 1.000000e+00 : f32
    %492 = vector.broadcast %cst_129 : f32 to vector<2x192xf32>
    %493 = arith.addf %492, %491 : vector<2x192xf32>
    %494 = arith.divf %492, %493 : vector<2x192xf32>
    %495 = vector.extract_strided_slice %494 {offsets = [0, 0], sizes = [2, 64], strides = [1, 1]} : vector<2x192xf32> to vector<2x64xf32>
    %496 = vector.extract_strided_slice %494 {offsets = [0, 64], sizes = [2, 64], strides = [1, 1]} : vector<2x192xf32> to vector<2x64xf32>
    %497 = vector.extract_strided_slice %494 {offsets = [0, 128], sizes = [2, 64], strides = [1, 1]} : vector<2x192xf32> to vector<2x64xf32>
    %498 = vector.extract_strided_slice %488 {offsets = [0, 192], sizes = [2, 64], strides = [1, 1]} : vector<2x256xf32> to vector<2x64xf32>
    %499 = math.tanh %498 : vector<2x64xf32>
    %500 = arith.mulf %496, %476 : vector<2x64xf32>
    %501 = arith.mulf %495, %499 : vector<2x64xf32>
    %502 = arith.addf %500, %501 : vector<2x64xf32>
    %503 = math.tanh %502 : vector<2x64xf32>
    %504 = arith.mulf %497, %503 : vector<2x64xf32>
    %505 = vector.extract_strided_slice %504 {offsets = [0, 0], sizes = [2, 32], strides = [1, 1]} : vector<2x64xf32> to vector<2x32xf32>
    %c0_130 = arith.constant 0 : index
    %c6_131 = arith.constant 6 : index
    %c0_132 = arith.constant 0 : index
    %506 = vector.load %arg4[%c0_130, %c6_131, %c0_132] : memref<2x8x32xf32, #tpu.memory_space<vmem>>, vector<2x1x32xf32>
    %507 = vector.shape_cast %506 : vector<2x1x32xf32> to vector<2x32xf32>
    %508 = vector.shape_cast %505 : vector<2x32xf32> to vector<2x1x32xf32>
    tpu.vector_store %arg4[%c0_130, %c6_131, %c0_132], %508 {strides = array<i32>} : memref<2x8x32xf32, #tpu.memory_space<vmem>>, vector<2x1x32xf32>,
    %509 = vector.extract_strided_slice %504 {offsets = [0, 32], sizes = [2, 32], strides = [1, 1]} : vector<2x64xf32> to vector<2x32xf32>
    %c0_133 = arith.constant 0 : index
    %c1_134 = arith.constant 1 : index
    %c0_135 = arith.constant 0 : index
    %510 = vector.load %arg5[%c0_133, %c1_134, %c0_135] : memref<2x8x32xf32, #tpu.memory_space<vmem>>, vector<2x1x32xf32>
    %511 = vector.shape_cast %510 : vector<2x1x32xf32> to vector<2x32xf32>
    %512 = vector.shape_cast %509 : vector<2x32xf32> to vector<2x1x32xf32>
    tpu.vector_store %arg5[%c0_133, %c1_134, %c0_135], %512 {strides = array<i32>} : memref<2x8x32xf32, #tpu.memory_space<vmem>>, vector<2x1x32xf32>,
    %cst_136 = arith.constant dense<0.000000e+00> : vector<2x256xf32>
    %513 = tpu.matmul %504, %282, %cst_136 {dimension_numbers = #tpu.dot_dimension_numbers<[1], [0], [0], [1], [0, 0, 1, 1], [], []>} : vector<2x64xf32>, vector<64x256xf32>, vector<2x256xf32> -> vector<2x256xf32>
    %514 = arith.addf %513, %328 : vector<2x256xf32>
    %515 = vector.extract_strided_slice %514 {offsets = [0, 0], sizes = [2, 192], strides = [1, 1]} : vector<2x256xf32> to vector<2x192xf32>
    %516 = arith.negf %515 : vector<2x192xf32>
    %517 = math.exp %516 : vector<2x192xf32>
    %cst_137 = arith.constant 1.000000e+00 : f32
    %518 = vector.broadcast %cst_137 : f32 to vector<2x192xf32>
    %519 = arith.addf %518, %517 : vector<2x192xf32>
    %520 = arith.divf %518, %519 : vector<2x192xf32>
    %521 = vector.extract_strided_slice %520 {offsets = [0, 0], sizes = [2, 64], strides = [1, 1]} : vector<2x192xf32> to vector<2x64xf32>
    %522 = vector.extract_strided_slice %520 {offsets = [0, 64], sizes = [2, 64], strides = [1, 1]} : vector<2x192xf32> to vector<2x64xf32>
    %523 = vector.extract_strided_slice %520 {offsets = [0, 128], sizes = [2, 64], strides = [1, 1]} : vector<2x192xf32> to vector<2x64xf32>
    %524 = vector.extract_strided_slice %514 {offsets = [0, 192], sizes = [2, 64], strides = [1, 1]} : vector<2x256xf32> to vector<2x64xf32>
    %525 = math.tanh %524 : vector<2x64xf32>
    %526 = arith.mulf %522, %502 : vector<2x64xf32>
    %527 = arith.mulf %521, %525 : vector<2x64xf32>
    %528 = arith.addf %526, %527 : vector<2x64xf32>
    %529 = math.tanh %528 : vector<2x64xf32>
    %530 = arith.mulf %523, %529 : vector<2x64xf32>
    %531 = vector.extract_strided_slice %530 {offsets = [0, 0], sizes = [2, 32], strides = [1, 1]} : vector<2x64xf32> to vector<2x32xf32>
    %c0_138 = arith.constant 0 : index
    %c7_139 = arith.constant 7 : index
    %c0_140 = arith.constant 0 : index
    %532 = vector.load %arg4[%c0_138, %c7_139, %c0_140] : memref<2x8x32xf32, #tpu.memory_space<vmem>>, vector<2x1x32xf32>
    %533 = vector.shape_cast %532 : vector<2x1x32xf32> to vector<2x32xf32>
    %534 = vector.shape_cast %531 : vector<2x32xf32> to vector<2x1x32xf32>
    tpu.vector_store %arg4[%c0_138, %c7_139, %c0_140], %534 {strides = array<i32>} : memref<2x8x32xf32, #tpu.memory_space<vmem>>, vector<2x1x32xf32>,
    %535 = vector.extract_strided_slice %530 {offsets = [0, 32], sizes = [2, 32], strides = [1, 1]} : vector<2x64xf32> to vector<2x32xf32>
    %c0_141 = arith.constant 0 : index
    %c0_142 = arith.constant 0 : index
    %c0_143 = arith.constant 0 : index
    %536 = vector.load %arg5[%c0_141, %c0_142, %c0_143] : memref<2x8x32xf32, #tpu.memory_space<vmem>>, vector<2x1x32xf32>
    %537 = vector.shape_cast %536 : vector<2x1x32xf32> to vector<2x32xf32>
    %538 = vector.shape_cast %535 : vector<2x32xf32> to vector<2x1x32xf32>
    tpu.vector_store %arg5[%c0_141, %c0_142, %c0_143], %538 {strides = array<i32>} : memref<2x8x32xf32, #tpu.memory_space<vmem>>, vector<2x1x32xf32>,
    %c0_144 = arith.constant 0 : index
    %c0_145 = arith.constant 0 : index
    %c0_146 = arith.constant 0 : index
    %539 = vector.load %arg4[%c0_144, %c0_145, %c0_146] : memref<2x8x32xf32, #tpu.memory_space<vmem>>, vector<2x8x32xf32>
    %c0_147 = arith.constant 0 : index
    %c0_148 = arith.constant 0 : index
    %c0_149 = arith.constant 0 : index
    %540 = vector.load %arg5[%c0_147, %c0_148, %c0_149] : memref<2x8x32xf32, #tpu.memory_space<vmem>>, vector<2x8x32xf32>
    %541 = tpu.concatenate %539, %540 in 2 : vector<2x8x32xf32>, vector<2x8x32xf32> -> vector<2x8x64xf32>
    %c224 = arith.constant 224 : index
    %c0_150 = arith.constant 0 : index
    %542 = vector.load %arg1[%c224, %c0_150] : memref<360x256xf32, #tpu.memory_space<vmem>>, vector<64x256xf32>
    %c288 = arith.constant 288 : index
    %c0_151 = arith.constant 0 : index
    %543 = vector.load %arg1[%c288, %c0_151] : memref<360x256xf32, #tpu.memory_space<vmem>>, vector<64x256xf32>
    %c352 = arith.constant 352 : index
    %c0_152 = arith.constant 0 : index
    %544 = vector.load %arg1[%c352, %c0_152] : memref<360x256xf32, #tpu.memory_space<vmem>>, vector<1x256xf32>
    %545 = vector.shape_cast %541 : vector<2x8x64xf32> to vector<16x64xf32>
    %cst_153 = arith.constant dense<0.000000e+00> : vector<16x256xf32>
    %546 = tpu.matmul %545, %542, %cst_153 {dimension_numbers = #tpu.dot_dimension_numbers<[1], [0], [0], [1], [0, 0, 1, 1], [], []>} : vector<16x64xf32>, vector<64x256xf32>, vector<16x256xf32> -> vector<16x256xf32>
    %547 = vector.broadcast %544 : vector<1x256xf32> to vector<16x256xf32>
    %548 = arith.addf %546, %547 : vector<16x256xf32>
    %549 = vector.shape_cast %548 : vector<16x256xf32> to vector<2x8x256xf32>
    %550 = vector.extract_strided_slice %549 {offsets = [0, 0, 0], sizes = [2, 1, 256], strides = [1, 1, 1]} : vector<2x8x256xf32> to vector<2x1x256xf32>
    %551 = vector.shape_cast %550 : vector<2x1x256xf32> to vector<2x256xf32>
    %552 = vector.extract_strided_slice %549 {offsets = [0, 7, 0], sizes = [2, 1, 256], strides = [1, 1, 1]} : vector<2x8x256xf32> to vector<2x1x256xf32>
    %553 = vector.shape_cast %552 : vector<2x1x256xf32> to vector<2x256xf32>
    %554 = arith.select %18, %551, %553 : vector<2x256xi1>, vector<2x256xf32>
    %555 = vector.extract_strided_slice %549 {offsets = [0, 1, 0], sizes = [2, 1, 256], strides = [1, 1, 1]} : vector<2x8x256xf32> to vector<2x1x256xf32>
    %556 = vector.shape_cast %555 : vector<2x1x256xf32> to vector<2x256xf32>
    %557 = vector.extract_strided_slice %549 {offsets = [0, 6, 0], sizes = [2, 1, 256], strides = [1, 1, 1]} : vector<2x8x256xf32> to vector<2x1x256xf32>
    %558 = vector.shape_cast %557 : vector<2x1x256xf32> to vector<2x256xf32>
    %559 = arith.select %18, %556, %558 : vector<2x256xi1>, vector<2x256xf32>
    %560 = vector.extract_strided_slice %549 {offsets = [0, 2, 0], sizes = [2, 1, 256], strides = [1, 1, 1]} : vector<2x8x256xf32> to vector<2x1x256xf32>
    %561 = vector.shape_cast %560 : vector<2x1x256xf32> to vector<2x256xf32>
    %562 = vector.extract_strided_slice %549 {offsets = [0, 5, 0], sizes = [2, 1, 256], strides = [1, 1, 1]} : vector<2x8x256xf32> to vector<2x1x256xf32>
    %563 = vector.shape_cast %562 : vector<2x1x256xf32> to vector<2x256xf32>
    %564 = arith.select %18, %561, %563 : vector<2x256xi1>, vector<2x256xf32>
    %565 = vector.extract_strided_slice %549 {offsets = [0, 3, 0], sizes = [2, 1, 256], strides = [1, 1, 1]} : vector<2x8x256xf32> to vector<2x1x256xf32>
    %566 = vector.shape_cast %565 : vector<2x1x256xf32> to vector<2x256xf32>
    %567 = vector.extract_strided_slice %549 {offsets = [0, 4, 0], sizes = [2, 1, 256], strides = [1, 1, 1]} : vector<2x8x256xf32> to vector<2x1x256xf32>
    %568 = vector.shape_cast %567 : vector<2x1x256xf32> to vector<2x256xf32>
    %569 = arith.select %18, %566, %568 : vector<2x256xi1>, vector<2x256xf32>
    %570 = vector.extract_strided_slice %549 {offsets = [0, 4, 0], sizes = [2, 1, 256], strides = [1, 1, 1]} : vector<2x8x256xf32> to vector<2x1x256xf32>
    %571 = vector.shape_cast %570 : vector<2x1x256xf32> to vector<2x256xf32>
    %572 = vector.extract_strided_slice %549 {offsets = [0, 3, 0], sizes = [2, 1, 256], strides = [1, 1, 1]} : vector<2x8x256xf32> to vector<2x1x256xf32>
    %573 = vector.shape_cast %572 : vector<2x1x256xf32> to vector<2x256xf32>
    %574 = arith.select %18, %571, %573 : vector<2x256xi1>, vector<2x256xf32>
    %575 = vector.extract_strided_slice %549 {offsets = [0, 5, 0], sizes = [2, 1, 256], strides = [1, 1, 1]} : vector<2x8x256xf32> to vector<2x1x256xf32>
    %576 = vector.shape_cast %575 : vector<2x1x256xf32> to vector<2x256xf32>
    %577 = vector.extract_strided_slice %549 {offsets = [0, 2, 0], sizes = [2, 1, 256], strides = [1, 1, 1]} : vector<2x8x256xf32> to vector<2x1x256xf32>
    %578 = vector.shape_cast %577 : vector<2x1x256xf32> to vector<2x256xf32>
    %579 = arith.select %18, %576, %578 : vector<2x256xi1>, vector<2x256xf32>
    %580 = vector.extract_strided_slice %549 {offsets = [0, 6, 0], sizes = [2, 1, 256], strides = [1, 1, 1]} : vector<2x8x256xf32> to vector<2x1x256xf32>
    %581 = vector.shape_cast %580 : vector<2x1x256xf32> to vector<2x256xf32>
    %582 = vector.extract_strided_slice %549 {offsets = [0, 1, 0], sizes = [2, 1, 256], strides = [1, 1, 1]} : vector<2x8x256xf32> to vector<2x1x256xf32>
    %583 = vector.shape_cast %582 : vector<2x1x256xf32> to vector<2x256xf32>
    %584 = arith.select %18, %581, %583 : vector<2x256xi1>, vector<2x256xf32>
    %585 = vector.extract_strided_slice %549 {offsets = [0, 7, 0], sizes = [2, 1, 256], strides = [1, 1, 1]} : vector<2x8x256xf32> to vector<2x1x256xf32>
    %586 = vector.shape_cast %585 : vector<2x1x256xf32> to vector<2x256xf32>
    %587 = vector.extract_strided_slice %549 {offsets = [0, 0, 0], sizes = [2, 1, 256], strides = [1, 1, 1]} : vector<2x8x256xf32> to vector<2x1x256xf32>
    %588 = vector.shape_cast %587 : vector<2x1x256xf32> to vector<2x256xf32>
    %589 = arith.select %18, %586, %588 : vector<2x256xi1>, vector<2x256xf32>
    %cst_154 = arith.constant 0.000000e+00 : f32
    %590 = vector.broadcast %cst_154 : f32 to vector<2x64xf32>
    %cst_155 = arith.constant 0.000000e+00 : f32
    %591 = vector.broadcast %cst_155 : f32 to vector<2x64xf32>
    %cst_156 = arith.constant dense<0.000000e+00> : vector<2x256xf32>
    %592 = tpu.matmul %590, %543, %cst_156 {dimension_numbers = #tpu.dot_dimension_numbers<[1], [0], [0], [1], [0, 0, 1, 1], [], []>} : vector<2x64xf32>, vector<64x256xf32>, vector<2x256xf32> -> vector<2x256xf32>
    %593 = arith.addf %592, %554 : vector<2x256xf32>
    %594 = vector.extract_strided_slice %593 {offsets = [0, 0], sizes = [2, 192], strides = [1, 1]} : vector<2x256xf32> to vector<2x192xf32>
    %595 = arith.negf %594 : vector<2x192xf32>
    %596 = math.exp %595 : vector<2x192xf32>
    %cst_157 = arith.constant 1.000000e+00 : f32
    %597 = vector.broadcast %cst_157 : f32 to vector<2x192xf32>
    %598 = arith.addf %597, %596 : vector<2x192xf32>
    %599 = arith.divf %597, %598 : vector<2x192xf32>
    %600 = vector.extract_strided_slice %599 {offsets = [0, 0], sizes = [2, 64], strides = [1, 1]} : vector<2x192xf32> to vector<2x64xf32>
    %601 = vector.extract_strided_slice %599 {offsets = [0, 64], sizes = [2, 64], strides = [1, 1]} : vector<2x192xf32> to vector<2x64xf32>
    %602 = vector.extract_strided_slice %599 {offsets = [0, 128], sizes = [2, 64], strides = [1, 1]} : vector<2x192xf32> to vector<2x64xf32>
    %603 = vector.extract_strided_slice %593 {offsets = [0, 192], sizes = [2, 64], strides = [1, 1]} : vector<2x256xf32> to vector<2x64xf32>
    %604 = math.tanh %603 : vector<2x64xf32>
    %605 = arith.mulf %601, %591 : vector<2x64xf32>
    %606 = arith.mulf %600, %604 : vector<2x64xf32>
    %607 = arith.addf %605, %606 : vector<2x64xf32>
    %608 = math.tanh %607 : vector<2x64xf32>
    %609 = arith.mulf %602, %608 : vector<2x64xf32>
    %610 = vector.extract_strided_slice %609 {offsets = [0, 0], sizes = [2, 32], strides = [1, 1]} : vector<2x64xf32> to vector<2x32xf32>
    %c0_158 = arith.constant 0 : index
    %c0_159 = arith.constant 0 : index
    %c0_160 = arith.constant 0 : index
    %611 = vector.load %arg4[%c0_158, %c0_159, %c0_160] : memref<2x8x32xf32, #tpu.memory_space<vmem>>, vector<2x1x32xf32>
    %612 = vector.shape_cast %611 : vector<2x1x32xf32> to vector<2x32xf32>
    %613 = vector.shape_cast %610 : vector<2x32xf32> to vector<2x1x32xf32>
    tpu.vector_store %arg4[%c0_158, %c0_159, %c0_160], %613 {strides = array<i32>} : memref<2x8x32xf32, #tpu.memory_space<vmem>>, vector<2x1x32xf32>,
    %614 = vector.extract_strided_slice %609 {offsets = [0, 32], sizes = [2, 32], strides = [1, 1]} : vector<2x64xf32> to vector<2x32xf32>
    %c0_161 = arith.constant 0 : index
    %c7_162 = arith.constant 7 : index
    %c0_163 = arith.constant 0 : index
    %615 = vector.load %arg5[%c0_161, %c7_162, %c0_163] : memref<2x8x32xf32, #tpu.memory_space<vmem>>, vector<2x1x32xf32>
    %616 = vector.shape_cast %615 : vector<2x1x32xf32> to vector<2x32xf32>
    %617 = vector.shape_cast %614 : vector<2x32xf32> to vector<2x1x32xf32>
    tpu.vector_store %arg5[%c0_161, %c7_162, %c0_163], %617 {strides = array<i32>} : memref<2x8x32xf32, #tpu.memory_space<vmem>>, vector<2x1x32xf32>,
    %cst_164 = arith.constant dense<0.000000e+00> : vector<2x256xf32>
    %618 = tpu.matmul %609, %543, %cst_164 {dimension_numbers = #tpu.dot_dimension_numbers<[1], [0], [0], [1], [0, 0, 1, 1], [], []>} : vector<2x64xf32>, vector<64x256xf32>, vector<2x256xf32> -> vector<2x256xf32>
    %619 = arith.addf %618, %559 : vector<2x256xf32>
    %620 = vector.extract_strided_slice %619 {offsets = [0, 0], sizes = [2, 192], strides = [1, 1]} : vector<2x256xf32> to vector<2x192xf32>
    %621 = arith.negf %620 : vector<2x192xf32>
    %622 = math.exp %621 : vector<2x192xf32>
    %cst_165 = arith.constant 1.000000e+00 : f32
    %623 = vector.broadcast %cst_165 : f32 to vector<2x192xf32>
    %624 = arith.addf %623, %622 : vector<2x192xf32>
    %625 = arith.divf %623, %624 : vector<2x192xf32>
    %626 = vector.extract_strided_slice %625 {offsets = [0, 0], sizes = [2, 64], strides = [1, 1]} : vector<2x192xf32> to vector<2x64xf32>
    %627 = vector.extract_strided_slice %625 {offsets = [0, 64], sizes = [2, 64], strides = [1, 1]} : vector<2x192xf32> to vector<2x64xf32>
    %628 = vector.extract_strided_slice %625 {offsets = [0, 128], sizes = [2, 64], strides = [1, 1]} : vector<2x192xf32> to vector<2x64xf32>
    %629 = vector.extract_strided_slice %619 {offsets = [0, 192], sizes = [2, 64], strides = [1, 1]} : vector<2x256xf32> to vector<2x64xf32>
    %630 = math.tanh %629 : vector<2x64xf32>
    %631 = arith.mulf %627, %607 : vector<2x64xf32>
    %632 = arith.mulf %626, %630 : vector<2x64xf32>
    %633 = arith.addf %631, %632 : vector<2x64xf32>
    %634 = math.tanh %633 : vector<2x64xf32>
    %635 = arith.mulf %628, %634 : vector<2x64xf32>
    %636 = vector.extract_strided_slice %635 {offsets = [0, 0], sizes = [2, 32], strides = [1, 1]} : vector<2x64xf32> to vector<2x32xf32>
    %c0_166 = arith.constant 0 : index
    %c1_167 = arith.constant 1 : index
    %c0_168 = arith.constant 0 : index
    %637 = vector.load %arg4[%c0_166, %c1_167, %c0_168] : memref<2x8x32xf32, #tpu.memory_space<vmem>>, vector<2x1x32xf32>
    %638 = vector.shape_cast %637 : vector<2x1x32xf32> to vector<2x32xf32>
    %639 = vector.shape_cast %636 : vector<2x32xf32> to vector<2x1x32xf32>
    tpu.vector_store %arg4[%c0_166, %c1_167, %c0_168], %639 {strides = array<i32>} : memref<2x8x32xf32, #tpu.memory_space<vmem>>, vector<2x1x32xf32>,
    %640 = vector.extract_strided_slice %635 {offsets = [0, 32], sizes = [2, 32], strides = [1, 1]} : vector<2x64xf32> to vector<2x32xf32>
    %c0_169 = arith.constant 0 : index
    %c6_170 = arith.constant 6 : index
    %c0_171 = arith.constant 0 : index
    %641 = vector.load %arg5[%c0_169, %c6_170, %c0_171] : memref<2x8x32xf32, #tpu.memory_space<vmem>>, vector<2x1x32xf32>
    %642 = vector.shape_cast %641 : vector<2x1x32xf32> to vector<2x32xf32>
    %643 = vector.shape_cast %640 : vector<2x32xf32> to vector<2x1x32xf32>
    tpu.vector_store %arg5[%c0_169, %c6_170, %c0_171], %643 {strides = array<i32>} : memref<2x8x32xf32, #tpu.memory_space<vmem>>, vector<2x1x32xf32>,
    %cst_172 = arith.constant dense<0.000000e+00> : vector<2x256xf32>
    %644 = tpu.matmul %635, %543, %cst_172 {dimension_numbers = #tpu.dot_dimension_numbers<[1], [0], [0], [1], [0, 0, 1, 1], [], []>} : vector<2x64xf32>, vector<64x256xf32>, vector<2x256xf32> -> vector<2x256xf32>
    %645 = arith.addf %644, %564 : vector<2x256xf32>
    %646 = vector.extract_strided_slice %645 {offsets = [0, 0], sizes = [2, 192], strides = [1, 1]} : vector<2x256xf32> to vector<2x192xf32>
    %647 = arith.negf %646 : vector<2x192xf32>
    %648 = math.exp %647 : vector<2x192xf32>
    %cst_173 = arith.constant 1.000000e+00 : f32
    %649 = vector.broadcast %cst_173 : f32 to vector<2x192xf32>
    %650 = arith.addf %649, %648 : vector<2x192xf32>
    %651 = arith.divf %649, %650 : vector<2x192xf32>
    %652 = vector.extract_strided_slice %651 {offsets = [0, 0], sizes = [2, 64], strides = [1, 1]} : vector<2x192xf32> to vector<2x64xf32>
    %653 = vector.extract_strided_slice %651 {offsets = [0, 64], sizes = [2, 64], strides = [1, 1]} : vector<2x192xf32> to vector<2x64xf32>
    %654 = vector.extract_strided_slice %651 {offsets = [0, 128], sizes = [2, 64], strides = [1, 1]} : vector<2x192xf32> to vector<2x64xf32>
    %655 = vector.extract_strided_slice %645 {offsets = [0, 192], sizes = [2, 64], strides = [1, 1]} : vector<2x256xf32> to vector<2x64xf32>
    %656 = math.tanh %655 : vector<2x64xf32>
    %657 = arith.mulf %653, %633 : vector<2x64xf32>
    %658 = arith.mulf %652, %656 : vector<2x64xf32>
    %659 = arith.addf %657, %658 : vector<2x64xf32>
    %660 = math.tanh %659 : vector<2x64xf32>
    %661 = arith.mulf %654, %660 : vector<2x64xf32>
    %662 = vector.extract_strided_slice %661 {offsets = [0, 0], sizes = [2, 32], strides = [1, 1]} : vector<2x64xf32> to vector<2x32xf32>
    %c0_174 = arith.constant 0 : index
    %c2_175 = arith.constant 2 : index
    %c0_176 = arith.constant 0 : index
    %663 = vector.load %arg4[%c0_174, %c2_175, %c0_176] : memref<2x8x32xf32, #tpu.memory_space<vmem>>, vector<2x1x32xf32>
    %664 = vector.shape_cast %663 : vector<2x1x32xf32> to vector<2x32xf32>
    %665 = vector.shape_cast %662 : vector<2x32xf32> to vector<2x1x32xf32>
    tpu.vector_store %arg4[%c0_174, %c2_175, %c0_176], %665 {strides = array<i32>} : memref<2x8x32xf32, #tpu.memory_space<vmem>>, vector<2x1x32xf32>,
    %666 = vector.extract_strided_slice %661 {offsets = [0, 32], sizes = [2, 32], strides = [1, 1]} : vector<2x64xf32> to vector<2x32xf32>
    %c0_177 = arith.constant 0 : index
    %c5_178 = arith.constant 5 : index
    %c0_179 = arith.constant 0 : index
    %667 = vector.load %arg5[%c0_177, %c5_178, %c0_179] : memref<2x8x32xf32, #tpu.memory_space<vmem>>, vector<2x1x32xf32>
    %668 = vector.shape_cast %667 : vector<2x1x32xf32> to vector<2x32xf32>
    %669 = vector.shape_cast %666 : vector<2x32xf32> to vector<2x1x32xf32>
    tpu.vector_store %arg5[%c0_177, %c5_178, %c0_179], %669 {strides = array<i32>} : memref<2x8x32xf32, #tpu.memory_space<vmem>>, vector<2x1x32xf32>,
    %cst_180 = arith.constant dense<0.000000e+00> : vector<2x256xf32>
    %670 = tpu.matmul %661, %543, %cst_180 {dimension_numbers = #tpu.dot_dimension_numbers<[1], [0], [0], [1], [0, 0, 1, 1], [], []>} : vector<2x64xf32>, vector<64x256xf32>, vector<2x256xf32> -> vector<2x256xf32>
    %671 = arith.addf %670, %569 : vector<2x256xf32>
    %672 = vector.extract_strided_slice %671 {offsets = [0, 0], sizes = [2, 192], strides = [1, 1]} : vector<2x256xf32> to vector<2x192xf32>
    %673 = arith.negf %672 : vector<2x192xf32>
    %674 = math.exp %673 : vector<2x192xf32>
    %cst_181 = arith.constant 1.000000e+00 : f32
    %675 = vector.broadcast %cst_181 : f32 to vector<2x192xf32>
    %676 = arith.addf %675, %674 : vector<2x192xf32>
    %677 = arith.divf %675, %676 : vector<2x192xf32>
    %678 = vector.extract_strided_slice %677 {offsets = [0, 0], sizes = [2, 64], strides = [1, 1]} : vector<2x192xf32> to vector<2x64xf32>
    %679 = vector.extract_strided_slice %677 {offsets = [0, 64], sizes = [2, 64], strides = [1, 1]} : vector<2x192xf32> to vector<2x64xf32>
    %680 = vector.extract_strided_slice %677 {offsets = [0, 128], sizes = [2, 64], strides = [1, 1]} : vector<2x192xf32> to vector<2x64xf32>
    %681 = vector.extract_strided_slice %671 {offsets = [0, 192], sizes = [2, 64], strides = [1, 1]} : vector<2x256xf32> to vector<2x64xf32>
    %682 = math.tanh %681 : vector<2x64xf32>
    %683 = arith.mulf %679, %659 : vector<2x64xf32>
    %684 = arith.mulf %678, %682 : vector<2x64xf32>
    %685 = arith.addf %683, %684 : vector<2x64xf32>
    %686 = math.tanh %685 : vector<2x64xf32>
    %687 = arith.mulf %680, %686 : vector<2x64xf32>
    %688 = vector.extract_strided_slice %687 {offsets = [0, 0], sizes = [2, 32], strides = [1, 1]} : vector<2x64xf32> to vector<2x32xf32>
    %c0_182 = arith.constant 0 : index
    %c3_183 = arith.constant 3 : index
    %c0_184 = arith.constant 0 : index
    %689 = vector.load %arg4[%c0_182, %c3_183, %c0_184] : memref<2x8x32xf32, #tpu.memory_space<vmem>>, vector<2x1x32xf32>
    %690 = vector.shape_cast %689 : vector<2x1x32xf32> to vector<2x32xf32>
    %691 = vector.shape_cast %688 : vector<2x32xf32> to vector<2x1x32xf32>
    tpu.vector_store %arg4[%c0_182, %c3_183, %c0_184], %691 {strides = array<i32>} : memref<2x8x32xf32, #tpu.memory_space<vmem>>, vector<2x1x32xf32>,
    %692 = vector.extract_strided_slice %687 {offsets = [0, 32], sizes = [2, 32], strides = [1, 1]} : vector<2x64xf32> to vector<2x32xf32>
    %c0_185 = arith.constant 0 : index
    %c4_186 = arith.constant 4 : index
    %c0_187 = arith.constant 0 : index
    %693 = vector.load %arg5[%c0_185, %c4_186, %c0_187] : memref<2x8x32xf32, #tpu.memory_space<vmem>>, vector<2x1x32xf32>
    %694 = vector.shape_cast %693 : vector<2x1x32xf32> to vector<2x32xf32>
    %695 = vector.shape_cast %692 : vector<2x32xf32> to vector<2x1x32xf32>
    tpu.vector_store %arg5[%c0_185, %c4_186, %c0_187], %695 {strides = array<i32>} : memref<2x8x32xf32, #tpu.memory_space<vmem>>, vector<2x1x32xf32>,
    %cst_188 = arith.constant dense<0.000000e+00> : vector<2x256xf32>
    %696 = tpu.matmul %687, %543, %cst_188 {dimension_numbers = #tpu.dot_dimension_numbers<[1], [0], [0], [1], [0, 0, 1, 1], [], []>} : vector<2x64xf32>, vector<64x256xf32>, vector<2x256xf32> -> vector<2x256xf32>
    %697 = arith.addf %696, %574 : vector<2x256xf32>
    %698 = vector.extract_strided_slice %697 {offsets = [0, 0], sizes = [2, 192], strides = [1, 1]} : vector<2x256xf32> to vector<2x192xf32>
    %699 = arith.negf %698 : vector<2x192xf32>
    %700 = math.exp %699 : vector<2x192xf32>
    %cst_189 = arith.constant 1.000000e+00 : f32
    %701 = vector.broadcast %cst_189 : f32 to vector<2x192xf32>
    %702 = arith.addf %701, %700 : vector<2x192xf32>
    %703 = arith.divf %701, %702 : vector<2x192xf32>
    %704 = vector.extract_strided_slice %703 {offsets = [0, 0], sizes = [2, 64], strides = [1, 1]} : vector<2x192xf32> to vector<2x64xf32>
    %705 = vector.extract_strided_slice %703 {offsets = [0, 64], sizes = [2, 64], strides = [1, 1]} : vector<2x192xf32> to vector<2x64xf32>
    %706 = vector.extract_strided_slice %703 {offsets = [0, 128], sizes = [2, 64], strides = [1, 1]} : vector<2x192xf32> to vector<2x64xf32>
    %707 = vector.extract_strided_slice %697 {offsets = [0, 192], sizes = [2, 64], strides = [1, 1]} : vector<2x256xf32> to vector<2x64xf32>
    %708 = math.tanh %707 : vector<2x64xf32>
    %709 = arith.mulf %705, %685 : vector<2x64xf32>
    %710 = arith.mulf %704, %708 : vector<2x64xf32>
    %711 = arith.addf %709, %710 : vector<2x64xf32>
    %712 = math.tanh %711 : vector<2x64xf32>
    %713 = arith.mulf %706, %712 : vector<2x64xf32>
    %714 = vector.extract_strided_slice %713 {offsets = [0, 0], sizes = [2, 32], strides = [1, 1]} : vector<2x64xf32> to vector<2x32xf32>
    %c0_190 = arith.constant 0 : index
    %c4_191 = arith.constant 4 : index
    %c0_192 = arith.constant 0 : index
    %715 = vector.load %arg4[%c0_190, %c4_191, %c0_192] : memref<2x8x32xf32, #tpu.memory_space<vmem>>, vector<2x1x32xf32>
    %716 = vector.shape_cast %715 : vector<2x1x32xf32> to vector<2x32xf32>
    %717 = vector.shape_cast %714 : vector<2x32xf32> to vector<2x1x32xf32>
    tpu.vector_store %arg4[%c0_190, %c4_191, %c0_192], %717 {strides = array<i32>} : memref<2x8x32xf32, #tpu.memory_space<vmem>>, vector<2x1x32xf32>,
    %718 = vector.extract_strided_slice %713 {offsets = [0, 32], sizes = [2, 32], strides = [1, 1]} : vector<2x64xf32> to vector<2x32xf32>
    %c0_193 = arith.constant 0 : index
    %c3_194 = arith.constant 3 : index
    %c0_195 = arith.constant 0 : index
    %719 = vector.load %arg5[%c0_193, %c3_194, %c0_195] : memref<2x8x32xf32, #tpu.memory_space<vmem>>, vector<2x1x32xf32>
    %720 = vector.shape_cast %719 : vector<2x1x32xf32> to vector<2x32xf32>
    %721 = vector.shape_cast %718 : vector<2x32xf32> to vector<2x1x32xf32>
    tpu.vector_store %arg5[%c0_193, %c3_194, %c0_195], %721 {strides = array<i32>} : memref<2x8x32xf32, #tpu.memory_space<vmem>>, vector<2x1x32xf32>,
    %cst_196 = arith.constant dense<0.000000e+00> : vector<2x256xf32>
    %722 = tpu.matmul %713, %543, %cst_196 {dimension_numbers = #tpu.dot_dimension_numbers<[1], [0], [0], [1], [0, 0, 1, 1], [], []>} : vector<2x64xf32>, vector<64x256xf32>, vector<2x256xf32> -> vector<2x256xf32>
    %723 = arith.addf %722, %579 : vector<2x256xf32>
    %724 = vector.extract_strided_slice %723 {offsets = [0, 0], sizes = [2, 192], strides = [1, 1]} : vector<2x256xf32> to vector<2x192xf32>
    %725 = arith.negf %724 : vector<2x192xf32>
    %726 = math.exp %725 : vector<2x192xf32>
    %cst_197 = arith.constant 1.000000e+00 : f32
    %727 = vector.broadcast %cst_197 : f32 to vector<2x192xf32>
    %728 = arith.addf %727, %726 : vector<2x192xf32>
    %729 = arith.divf %727, %728 : vector<2x192xf32>
    %730 = vector.extract_strided_slice %729 {offsets = [0, 0], sizes = [2, 64], strides = [1, 1]} : vector<2x192xf32> to vector<2x64xf32>
    %731 = vector.extract_strided_slice %729 {offsets = [0, 64], sizes = [2, 64], strides = [1, 1]} : vector<2x192xf32> to vector<2x64xf32>
    %732 = vector.extract_strided_slice %729 {offsets = [0, 128], sizes = [2, 64], strides = [1, 1]} : vector<2x192xf32> to vector<2x64xf32>
    %733 = vector.extract_strided_slice %723 {offsets = [0, 192], sizes = [2, 64], strides = [1, 1]} : vector<2x256xf32> to vector<2x64xf32>
    %734 = math.tanh %733 : vector<2x64xf32>
    %735 = arith.mulf %731, %711 : vector<2x64xf32>
    %736 = arith.mulf %730, %734 : vector<2x64xf32>
    %737 = arith.addf %735, %736 : vector<2x64xf32>
    %738 = math.tanh %737 : vector<2x64xf32>
    %739 = arith.mulf %732, %738 : vector<2x64xf32>
    %740 = vector.extract_strided_slice %739 {offsets = [0, 0], sizes = [2, 32], strides = [1, 1]} : vector<2x64xf32> to vector<2x32xf32>
    %c0_198 = arith.constant 0 : index
    %c5_199 = arith.constant 5 : index
    %c0_200 = arith.constant 0 : index
    %741 = vector.load %arg4[%c0_198, %c5_199, %c0_200] : memref<2x8x32xf32, #tpu.memory_space<vmem>>, vector<2x1x32xf32>
    %742 = vector.shape_cast %741 : vector<2x1x32xf32> to vector<2x32xf32>
    %743 = vector.shape_cast %740 : vector<2x32xf32> to vector<2x1x32xf32>
    tpu.vector_store %arg4[%c0_198, %c5_199, %c0_200], %743 {strides = array<i32>} : memref<2x8x32xf32, #tpu.memory_space<vmem>>, vector<2x1x32xf32>,
    %744 = vector.extract_strided_slice %739 {offsets = [0, 32], sizes = [2, 32], strides = [1, 1]} : vector<2x64xf32> to vector<2x32xf32>
    %c0_201 = arith.constant 0 : index
    %c2_202 = arith.constant 2 : index
    %c0_203 = arith.constant 0 : index
    %745 = vector.load %arg5[%c0_201, %c2_202, %c0_203] : memref<2x8x32xf32, #tpu.memory_space<vmem>>, vector<2x1x32xf32>
    %746 = vector.shape_cast %745 : vector<2x1x32xf32> to vector<2x32xf32>
    %747 = vector.shape_cast %744 : vector<2x32xf32> to vector<2x1x32xf32>
    tpu.vector_store %arg5[%c0_201, %c2_202, %c0_203], %747 {strides = array<i32>} : memref<2x8x32xf32, #tpu.memory_space<vmem>>, vector<2x1x32xf32>,
    %cst_204 = arith.constant dense<0.000000e+00> : vector<2x256xf32>
    %748 = tpu.matmul %739, %543, %cst_204 {dimension_numbers = #tpu.dot_dimension_numbers<[1], [0], [0], [1], [0, 0, 1, 1], [], []>} : vector<2x64xf32>, vector<64x256xf32>, vector<2x256xf32> -> vector<2x256xf32>
    %749 = arith.addf %748, %584 : vector<2x256xf32>
    %750 = vector.extract_strided_slice %749 {offsets = [0, 0], sizes = [2, 192], strides = [1, 1]} : vector<2x256xf32> to vector<2x192xf32>
    %751 = arith.negf %750 : vector<2x192xf32>
    %752 = math.exp %751 : vector<2x192xf32>
    %cst_205 = arith.constant 1.000000e+00 : f32
    %753 = vector.broadcast %cst_205 : f32 to vector<2x192xf32>
    %754 = arith.addf %753, %752 : vector<2x192xf32>
    %755 = arith.divf %753, %754 : vector<2x192xf32>
    %756 = vector.extract_strided_slice %755 {offsets = [0, 0], sizes = [2, 64], strides = [1, 1]} : vector<2x192xf32> to vector<2x64xf32>
    %757 = vector.extract_strided_slice %755 {offsets = [0, 64], sizes = [2, 64], strides = [1, 1]} : vector<2x192xf32> to vector<2x64xf32>
    %758 = vector.extract_strided_slice %755 {offsets = [0, 128], sizes = [2, 64], strides = [1, 1]} : vector<2x192xf32> to vector<2x64xf32>
    %759 = vector.extract_strided_slice %749 {offsets = [0, 192], sizes = [2, 64], strides = [1, 1]} : vector<2x256xf32> to vector<2x64xf32>
    %760 = math.tanh %759 : vector<2x64xf32>
    %761 = arith.mulf %757, %737 : vector<2x64xf32>
    %762 = arith.mulf %756, %760 : vector<2x64xf32>
    %763 = arith.addf %761, %762 : vector<2x64xf32>
    %764 = math.tanh %763 : vector<2x64xf32>
    %765 = arith.mulf %758, %764 : vector<2x64xf32>
    %766 = vector.extract_strided_slice %765 {offsets = [0, 0], sizes = [2, 32], strides = [1, 1]} : vector<2x64xf32> to vector<2x32xf32>
    %c0_206 = arith.constant 0 : index
    %c6_207 = arith.constant 6 : index
    %c0_208 = arith.constant 0 : index
    %767 = vector.load %arg4[%c0_206, %c6_207, %c0_208] : memref<2x8x32xf32, #tpu.memory_space<vmem>>, vector<2x1x32xf32>
    %768 = vector.shape_cast %767 : vector<2x1x32xf32> to vector<2x32xf32>
    %769 = vector.shape_cast %766 : vector<2x32xf32> to vector<2x1x32xf32>
    tpu.vector_store %arg4[%c0_206, %c6_207, %c0_208], %769 {strides = array<i32>} : memref<2x8x32xf32, #tpu.memory_space<vmem>>, vector<2x1x32xf32>,
    %770 = vector.extract_strided_slice %765 {offsets = [0, 32], sizes = [2, 32], strides = [1, 1]} : vector<2x64xf32> to vector<2x32xf32>
    %c0_209 = arith.constant 0 : index
    %c1_210 = arith.constant 1 : index
    %c0_211 = arith.constant 0 : index
    %771 = vector.load %arg5[%c0_209, %c1_210, %c0_211] : memref<2x8x32xf32, #tpu.memory_space<vmem>>, vector<2x1x32xf32>
    %772 = vector.shape_cast %771 : vector<2x1x32xf32> to vector<2x32xf32>
    %773 = vector.shape_cast %770 : vector<2x32xf32> to vector<2x1x32xf32>
    tpu.vector_store %arg5[%c0_209, %c1_210, %c0_211], %773 {strides = array<i32>} : memref<2x8x32xf32, #tpu.memory_space<vmem>>, vector<2x1x32xf32>,
    %cst_212 = arith.constant dense<0.000000e+00> : vector<2x256xf32>
    %774 = tpu.matmul %765, %543, %cst_212 {dimension_numbers = #tpu.dot_dimension_numbers<[1], [0], [0], [1], [0, 0, 1, 1], [], []>} : vector<2x64xf32>, vector<64x256xf32>, vector<2x256xf32> -> vector<2x256xf32>
    %775 = arith.addf %774, %589 : vector<2x256xf32>
    %776 = vector.extract_strided_slice %775 {offsets = [0, 0], sizes = [2, 192], strides = [1, 1]} : vector<2x256xf32> to vector<2x192xf32>
    %777 = arith.negf %776 : vector<2x192xf32>
    %778 = math.exp %777 : vector<2x192xf32>
    %cst_213 = arith.constant 1.000000e+00 : f32
    %779 = vector.broadcast %cst_213 : f32 to vector<2x192xf32>
    %780 = arith.addf %779, %778 : vector<2x192xf32>
    %781 = arith.divf %779, %780 : vector<2x192xf32>
    %782 = vector.extract_strided_slice %781 {offsets = [0, 0], sizes = [2, 64], strides = [1, 1]} : vector<2x192xf32> to vector<2x64xf32>
    %783 = vector.extract_strided_slice %781 {offsets = [0, 64], sizes = [2, 64], strides = [1, 1]} : vector<2x192xf32> to vector<2x64xf32>
    %784 = vector.extract_strided_slice %781 {offsets = [0, 128], sizes = [2, 64], strides = [1, 1]} : vector<2x192xf32> to vector<2x64xf32>
    %785 = vector.extract_strided_slice %775 {offsets = [0, 192], sizes = [2, 64], strides = [1, 1]} : vector<2x256xf32> to vector<2x64xf32>
    %786 = math.tanh %785 : vector<2x64xf32>
    %787 = arith.mulf %783, %763 : vector<2x64xf32>
    %788 = arith.mulf %782, %786 : vector<2x64xf32>
    %789 = arith.addf %787, %788 : vector<2x64xf32>
    %790 = math.tanh %789 : vector<2x64xf32>
    %791 = arith.mulf %784, %790 : vector<2x64xf32>
    %792 = vector.extract_strided_slice %791 {offsets = [0, 0], sizes = [2, 32], strides = [1, 1]} : vector<2x64xf32> to vector<2x32xf32>
    %c0_214 = arith.constant 0 : index
    %c7_215 = arith.constant 7 : index
    %c0_216 = arith.constant 0 : index
    %793 = vector.load %arg4[%c0_214, %c7_215, %c0_216] : memref<2x8x32xf32, #tpu.memory_space<vmem>>, vector<2x1x32xf32>
    %794 = vector.shape_cast %793 : vector<2x1x32xf32> to vector<2x32xf32>
    %795 = vector.shape_cast %792 : vector<2x32xf32> to vector<2x1x32xf32>
    tpu.vector_store %arg4[%c0_214, %c7_215, %c0_216], %795 {strides = array<i32>} : memref<2x8x32xf32, #tpu.memory_space<vmem>>, vector<2x1x32xf32>,
    %796 = vector.extract_strided_slice %791 {offsets = [0, 32], sizes = [2, 32], strides = [1, 1]} : vector<2x64xf32> to vector<2x32xf32>
    %c0_217 = arith.constant 0 : index
    %c0_218 = arith.constant 0 : index
    %c0_219 = arith.constant 0 : index
    %797 = vector.load %arg5[%c0_217, %c0_218, %c0_219] : memref<2x8x32xf32, #tpu.memory_space<vmem>>, vector<2x1x32xf32>
    %798 = vector.shape_cast %797 : vector<2x1x32xf32> to vector<2x32xf32>
    %799 = vector.shape_cast %796 : vector<2x32xf32> to vector<2x1x32xf32>
    tpu.vector_store %arg5[%c0_217, %c0_218, %c0_219], %799 {strides = array<i32>} : memref<2x8x32xf32, #tpu.memory_space<vmem>>, vector<2x1x32xf32>,
    %c0_220 = arith.constant 0 : index
    %c0_221 = arith.constant 0 : index
    %c0_222 = arith.constant 0 : index
    %800 = vector.load %arg4[%c0_220, %c0_221, %c0_222] : memref<2x8x32xf32, #tpu.memory_space<vmem>>, vector<2x8x32xf32>
    %c0_223 = arith.constant 0 : index
    %c0_224 = arith.constant 0 : index
    %c0_225 = arith.constant 0 : index
    %801 = vector.load %arg5[%c0_223, %c0_224, %c0_225] : memref<2x8x32xf32, #tpu.memory_space<vmem>>, vector<2x8x32xf32>
    %802 = tpu.concatenate %800, %801 in 2 : vector<2x8x32xf32>, vector<2x8x32xf32> -> vector<2x8x64xf32>
    %803 = vector.shape_cast %802 : vector<2x8x64xf32> to vector<16x64xf32>
    %c0_226 = arith.constant 0 : index
    %c0_227 = arith.constant 0 : index
    %804 = vector.load %arg2[%c0_226, %c0_227] : memref<72x64xf32, #tpu.memory_space<vmem>>, vector<64x64xf32>
    %c64 = arith.constant 64 : index
    %c0_228 = arith.constant 0 : index
    %805 = vector.load %arg2[%c64, %c0_228] : memref<72x64xf32, #tpu.memory_space<vmem>>, vector<1x64xf32>
    %c65 = arith.constant 65 : index
    %c0_229 = arith.constant 0 : index
    %806 = vector.load %arg2[%c65, %c0_229] : memref<72x64xf32, #tpu.memory_space<vmem>>, vector<1x64xf32>
    %c66 = arith.constant 66 : index
    %c0_230 = arith.constant 0 : index
    %807 = vector.load %arg2[%c66, %c0_230] : memref<72x64xf32, #tpu.memory_space<vmem>>, vector<1x64xf32>
    %c67 = arith.constant 67 : index
    %c0_231 = arith.constant 0 : index
    %808 = vector.load %arg2[%c67, %c0_231] : memref<72x64xf32, #tpu.memory_space<vmem>>, vector<1x1xf32>
    %cst_232 = arith.constant dense<0.000000e+00> : vector<16x64xf32>
    %809 = tpu.matmul %803, %804, %cst_232 {dimension_numbers = #tpu.dot_dimension_numbers<[1], [0], [0], [1], [0, 0, 1, 1], [], []>} : vector<16x64xf32>, vector<64x64xf32>, vector<16x64xf32> -> vector<16x64xf32>
    %810 = vector.broadcast %805 : vector<1x64xf32> to vector<16x64xf32>
    %811 = arith.addf %809, %810 : vector<16x64xf32>
    %812 = math.tanh %811 : vector<16x64xf32>
    %813 = vector.broadcast %806 : vector<1x64xf32> to vector<16x64xf32>
    %814 = arith.mulf %812, %813 : vector<16x64xf32>
    %cst_233 = arith.constant dense<0.000000e+00> : vector<16xf32>
    %815 = vector.multi_reduction <add>, %814, %cst_233 [1] : vector<16x64xf32> to vector<16xf32>
    %816 = vector.shape_cast %815 : vector<16xf32> to vector<16x1xf32>
    %817 = vector.shape_cast %816 : vector<16x1xf32> to vector<2x8x1xf32>
    %cst_234 = arith.constant dense<0xFF800000> : vector<2x1xf32>
    %818 = vector.multi_reduction <maximumf>, %817, %cst_234 [1] : vector<2x8x1xf32> to vector<2x1xf32>
    %819 = vector.shape_cast %818 : vector<2x1xf32> to vector<2x1x1xf32>
    %820 = vector.broadcast %819 : vector<2x1x1xf32> to vector<2x8x1xf32>
    %821 = arith.subf %817, %820 : vector<2x8x1xf32>
    %822 = math.exp %821 : vector<2x8x1xf32>
    %cst_235 = arith.constant dense<0.000000e+00> : vector<2x1xf32>
    %823 = vector.multi_reduction <add>, %822, %cst_235 [1] : vector<2x8x1xf32> to vector<2x1xf32>
    %824 = vector.shape_cast %823 : vector<2x1xf32> to vector<2x1x1xf32>
    %825 = vector.broadcast %824 : vector<2x1x1xf32> to vector<2x8x1xf32>
    %826 = arith.divf %822, %825 : vector<2x8x1xf32>
    %827 = vector.broadcast %826 : vector<2x8x1xf32> to vector<2x8x64xf32>
    %828 = arith.mulf %827, %802 : vector<2x8x64xf32>
    %cst_236 = arith.constant dense<0.000000e+00> : vector<2x64xf32>
    %829 = vector.multi_reduction <add>, %828, %cst_236 [1] : vector<2x8x64xf32> to vector<2x64xf32>
    %830 = vector.broadcast %807 : vector<1x64xf32> to vector<2x64xf32>
    %831 = arith.mulf %829, %830 : vector<2x64xf32>
    %cst_237 = arith.constant dense<0.000000e+00> : vector<2xf32>
    %832 = vector.multi_reduction <add>, %831, %cst_237 [1] : vector<2x64xf32> to vector<2xf32>
    %833 = vector.shape_cast %832 : vector<2xf32> to vector<2x1xf32>
    %834 = vector.broadcast %808 : vector<1x1xf32> to vector<2x1xf32>
    %835 = arith.addf %833, %834 : vector<2x1xf32>
    %c0_238 = arith.constant 0 : index
    %c0_239 = arith.constant 0 : index
    %836 = vector.load %arg3[%c0_238, %c0_239] : memref<2x1xf32, #tpu.memory_space<vmem>>, vector<2x1xf32>
    tpu.vector_store %arg3[%c0_238, %c0_239], %835 {strides = array<i32>} : memref<2x1xf32, #tpu.memory_space<vmem>>, vector<2x1xf32>,
    return
  }
}

</mosaic_0001>

<bundles_post_ra>
// kernel: lstm_model_forward.1
= control target key start
LH: loop header
LB: loop body
LE: loop exit
PB: predicated region body
PF: predicated region fallthrough
CT: control target
= control target key end

     0   :  { %8 = vsyncpa [#allocation5], 0  ;;  %s4847_s12 = smov [#allocation4]   ;;  %s6551_s0 = inlined_call_operand.vmem [shape: f32[2,8,16], index: 0, kind: input, shape index: {}]   ;;  %s6552_s1 = inlined_call_operand.hbm [shape: f32[360,256], index: 1, kind: input, shape index: {}]   ;;  %s6553_s2 = inlined_call_operand.vmem [shape: f32[72,64], index: 2, kind: input, shape index: {}]   ;;  %s6554_s3 = inlined_call_operand.vmem [shape: f32[2,1], index: 3, kind: output, shape index: {}]  }
   0x1   :  { %s16_s13 = sshll.u32 %s4847_s12, 4  ;;  %s17_s13 = int_to_ptr.vmem [resolvable:$true] %s16_s13 }
   0x2   :  { %s4833_s14 = scalar_lea.vmem %s17_s13, 11520  ;;  %p4838_p1 = scmp.lt.s32.totalorder %s17_s13, %s17_s13 }
   0x3   :  { %p4834_p0 = scmp.ne.s32.totalorder %s17_s13, %s4833_s14  ;;  %p4839_p2 = scmp.lt.s32.totalorder %s4833_s14, %s4833_s14 }
   0x5   :  { %p4840_p3 = por %p4839_p2, %p4838_p1 }
   0x7   :  { %p4841_p4 = pnand %p4840_p3, %p4834_p0 }
   0x9   :  { %4844 = shalt.err (!%p4841_p4)
}
   0xa   :  { %s4848_s15 = smov 256   ;;  %s4849_s16 = smov 16  }
   0xb   :  { %22 = dma.hbm_to_vmem [thread:$0]  %s6552_s1, 11520, %s17_s13, [#allocation5], %s4848_s15, %s4848_s15, %s4849_s16  }
   0xc   :  { %4845 = dma.done.wait [#allocation5], 11520  }
   0xd   :  { %4846 = vsyncadd [#allocation5], 4294955776  ;;  %v4850_v0 = vmov 0.0   ;;  %v62_v1 = vld [vmem:[#allocation4 + $0x18] sm:$0xff]  ;;  %v61_v3 = vld [vmem:[#allocation4 + $0x10] sm:$0xff]  ;;  %vm92_vm0 = vcmask 130048   ;;  %v28_v23 = vlaneseq }
   0xe   :  { %163 = vmatprep.mubr.f32.mxu0 %v4850_v0  ;;  %325 = vmatprep.mubr.f32.mxu1 %v4850_v0  ;;  %v4880_v2 = vld [vmem:[#allocation4 + $0x98] sm:$0xff]  ;;  %v4883_v4 = vld [vmem:[#allocation4 + $0x90] sm:$0xff]  ;;  %v60_v5 = vld [vmem:[#allocation4 + $0x8] sm:$0xff]  ;;  %vm181_vm2 = vcmask 1041409   ;;  %vm257_vm4 = vcmask 523264   ;;  %vm387_vm5 = vcmask 253952  }
   0xf   :  { %127 = vmatprep.subr.mxu0 %v62_v1  ;;  %277 = vmatprep.subr.mxu1 %v4880_v2  ;;  %v4885_v6 = vld [vmem:[#allocation4 + $0x88] sm:$0xff]  ;;  %v59_v7 = vld [vmem:[#allocation4] sm:$0xff]  ;;  %v4894_v10 = vld [vmem:[#allocation4 + $0x78] sm:$0xff]  ;;  %v4974_v24 = vshrl.u32 %v28_v23, 7  ;;  %v29_v25 = vand.u32 127, %v28_v23  ;;  %s4853_s22 = smov 96  }
  0x10   :  { %128 = vmatpush1.msra.mxu0 %v61_v3  ;;  %278 = vmatpush1.msra.mxu1 %v4883_v4  ;;  %v4888_v8 = vld [vmem:[#allocation4 + $0x80] sm:$0xff]  ;;  %v4896_v11 = vld [vmem:[#allocation4 + $0x70] sm:$0xff]  ;;  %v4899_v12 = vld [vmem:[#allocation4 + $0x68] sm:$0xff]  ;;  %s4854_s23 = smov 32   ;;  %vm1440_vm6 = vcmask 261120   ;;  %vm4391_vm7 = vcmask 517120  }
  0x11   :  { %v57_v9 = vld [vmem:[%s6551_s0] sm:$0xff]  ;;  %129 = vmatprep.subr.mxu0 %v60_v5  ;;  %279 = vmatprep.subr.mxu1 %v4885_v6  ;;  %v58_v14 = vld [vmem:[%s6551_s0 + $0x8] sm:$0xff]  ;;  %v4910_v15 = vld [vmem:[#allocation4 + $0x58] sm:$0xff]  ;;  %v4977_v26 = vsub.s32 0, %v4974_v24  ;;  %v30_v28 = vadd.s32 128, %v29_v25  ;;  %v4980_v29 = vsub.s32 1, %v4974_v24 }
  0x12   :  { %130 = vmatpush1.msra.mxu0 %v59_v7  ;;  %280 = vmatpush1.msra.mxu1 %v4888_v8  ;;  %v4903_v13 = vld [vmem:[#allocation4 + $0x60] sm:$0xff]  ;;  %v4913_v16 = vld [vmem:[#allocation4 + $0x50] sm:$0xff]  ;;  %v4917_v17 = vld [vmem:[#allocation4 + $0x48] sm:$0xff]  ;;  %v35_v31 = vand.u32 63, %v29_v25  ;;  %s4851_s0 = smov 64   ;;  %vm4400_vm8 = vcmask 1024  }
  0x13   :  { %4407 = vmatmul.mubr.msk.f32.vlgmr.msra.gmra.mxu0 %vm92_vm0, %v57_v9  ;;  %281 = vmatprep.subr.mxu1 %v4894_v10  ;;  %v4922_v18 = vld [vmem:[#allocation4 + $0x40] sm:$0xff]  ;;  %v4925_v19 = vld [vmem:[#allocation4 + $0x38] sm:$0xff]  ;;  %v4929_v20 = vld [vmem:[#allocation4 + $0x30] sm:$0xff]  ;;  %v42_v32 = vand.u32 63, %v30_v28 }
  0x14   :  { %282 = vmatpush1.msra.mxu1 %v4896_v11  ;;  %169 = vmatprep.mubr.f32.mxu0 %v4850_v0  ;;  %v4933_v21 = vld [vmem:[#allocation4 + $0x28] sm:$0xff]  ;;  %v4937_v22 = vld [vmem:[#allocation4 + $0x20] sm:$0xff]  ;;  %vm4986_vm1 = vcmp.lt.s32.totalorder %v35_v31, 32 }
  0x15   :  { %283 = vmatprep.subr.mxu1 %v4899_v12  ;;  %424 = vmatprep.subr.mxu0 %v4880_v2  ;;  %v80_v27 = vld [vmem:[#allocation4 + $0xa0] ss:$8 sm:$0x3]  ;;  %vm4990_vm3 = vcmp.lt.s32.totalorder %v42_v32, 32 }
  0x16   :  { %284 = vmatpush1.msra.mxu1 %v4903_v13  ;;  %425 = vmatpush1.msra.mxu0 %v4883_v4  ;;  %v85_v30 = vrot.slane %v80_v27, %v4977_v26  ;;  %v89_v33 = vrot.slane %v80_v27, %v4980_v29 }
  0x17   :  { %4408 = vmatmul.mubr.msk.f32.gmra.mxu0 %vm92_vm0, %v58_v14  ;;  %285 = vmatprep.subr.mxu1 %v4910_v15 }
  0x18   :  { %286 = vmatpush1.msra.mxu1 %v4913_v16  ;;  %426 = vmatprep.subr.mxu0 %v4885_v6 }
  0x19   :  { %287 = vmatprep.subr.mxu1 %v4917_v17  ;;  %427 = vmatpush1.msra.mxu0 %v4888_v8 }
  0x1a   :  { %288 = vmatpush1.msra.mxu1 %v4922_v18  ;;  %428 = vmatprep.subr.mxu0 %v4894_v10 }
  0x1b   :  { %289 = vmatprep.subr.mxu1 %v4925_v19  ;;  %429 = vmatpush1.msra.mxu0 %v4896_v11 }
  0x1c   :  { %290 = vmatpush1.msra.mxu1 %v4929_v20  ;;  %430 = vmatprep.subr.mxu0 %v4899_v12 }
  0x1d   :  { %291 = vmatprep.subr.mxu1 %v4933_v21  ;;  %431 = vmatpush1.msra.mxu0 %v4903_v13 }
  0x1e   :  { %292 = vmatpush1.msra.mxu1 %v4937_v22  ;;  %432 = vmatprep.subr.mxu0 %v4910_v15 }
  0x1f   :  { %326 = vmatmul.mubr.f32.vlgmr.msra.gmra.mxu1 %v4850_v0  ;;  %433 = vmatpush1.msra.mxu0 %v4913_v16 }
  0x20   :  { %434 = vmatprep.subr.mxu0 %v4917_v17  ;;  %472 = vmatprep.mubr.f32.mxu0 %v4850_v0 }
  0x21   :  { %435 = vmatpush1.msra.mxu0 %v4922_v18  ;;  %570 = vmatprep.subr.mxu1 %v4880_v2 }
  0x22   :  { %436 = vmatprep.subr.mxu0 %v4925_v19  ;;  %571 = vmatpush1.msra.mxu1 %v4883_v4 }
  0x23   :  { %437 = vmatpush1.msra.mxu0 %v4929_v20  ;;  %572 = vmatprep.subr.mxu1 %v4885_v6 }
  0x24   :  { %438 = vmatprep.subr.mxu0 %v4933_v21  ;;  %573 = vmatpush1.msra.mxu1 %v4888_v8 }
  0x25   :  { %439 = vmatpush1.msra.mxu0 %v4937_v22  ;;  %574 = vmatprep.subr.mxu1 %v4894_v10 }
  0x26   :  { %575 = vmatpush1.msra.mxu1 %v4896_v11  ;;  %618 = vmatprep.mubr.f32.mxu1 %v4850_v0 }
  0x27   :  { %576 = vmatprep.subr.mxu1 %v4899_v12  ;;  %716 = vmatprep.subr.mxu0 %v4880_v2 }
  0x28   :  { %577 = vmatpush1.msra.mxu1 %v4903_v13 }
  0x29   :  { %578 = vmatprep.subr.mxu1 %v4910_v15 }
  0x2a   :  { %579 = vmatpush1.msra.mxu1 %v4913_v16 }
  0x2b   :  { %580 = vmatprep.subr.mxu1 %v4917_v17 }
  0x2c   :  { %581 = vmatpush1.msra.mxu1 %v4922_v18 }
  0x2d   :  { %582 = vmatprep.subr.mxu1 %v4925_v19 }
  0x2e   :  { %583 = vmatpush1.msra.mxu1 %v4929_v20 }
  0x2f   :  { %584 = vmatprep.subr.mxu1 %v4933_v21 }
  0x30   :  { %585 = vmatpush1.msra.mxu1 %v4937_v22 }
  0x31   :  { %862 = vmatprep.subr.mxu1 %v4880_v2 }
  0xd3   :  { %v165_v34 = vpop.f32.mrf.mxu0 }
  0xd4   :  { %v4984_v35 = vadd.f32 %v165_v34, %v85_v30 }
  0xd5   :  { %v167_v37 = vpop.f32.mrf.mxu0 }
  0xd6   :  { %v168_v39 = vadd.f32 %v167_v37, %v89_v33  ;;  %v187_v40 = vrot.slane %v4984_v35, 7  ;;  %v197_v41 = vrot.slane %v4984_v35, 1  ;;  %v203_v43 = vrot.slane %v4984_v35, 6 }
  0xd7   :  { %v171_v42 = vpop.f32.mrf.mxu0  ;;  %v213_v44 = vrot.slane %v4984_v35, 2  ;;  %v221_v45 = vrot.slane %v4984_v35, 5  ;;  %v231_v46 = vrot.slane %v4984_v35, 3  ;;  %v239_v50 = vrot.slane %v4984_v35, 4 }
  0xd8   :  { %v172_v47 = vadd.f32 %v171_v42, %v85_v30  ;;  %v190_v48 = vrot.slane %v168_v39, 7  ;;  %v199_v49 = vrot.slane %v168_v39, 1  ;;  %v206_v52 = vrot.slane %v168_v39, 6 }
  0xd9   :  { %v173_v51 = vpop.f32.mrf.mxu0  ;;  %v216_v53 = vrot.slane %v168_v39, 2  ;;  %v224_v54 = vrot.slane %v168_v39, 5  ;;  %v234_v55 = vrot.slane %v168_v39, 3 }
  0xda   :  { %v174_v56 = vadd.f32 %v173_v51, %v89_v33  ;;  %v180_v57 = vrot.slane %v172_v47, 7  ;;  %v188_v58 = vrot.slane %v172_v47, 6  ;;  %v5002_v59 = vsel %vm181_vm2, %v172_v47, %v197_v41 }
  0xdb   :  { %v204_v60 = vrot.slane %v172_v47, 5  ;;  %v214_v61 = vrot.slane %v172_v47, 1  ;;  %v222_v62 = vrot.slane %v172_v47, 4  ;;  %v232_v63 = vrot.slane %v172_v47, 2 }
  0xdc   :  { %v5006_v1 = vsel %vm181_vm2, %v180_v57, %v4984_v35  ;;  %v5009_v3 = vsel %vm181_vm2, %v188_v58, %v187_v40  ;;  %v183_v5 = vrot.slane %v174_v56, 7  ;;  %v191_v7 = vrot.slane %v174_v56, 6 }
  0xdd   :  { %v195_v9 = vsel %vm4986_vm1, %v5006_v1, %v5009_v3  ;;  %v5016_v14 = vsel %vm181_vm2, %v204_v60, %v203_v43  ;;  %v5019_v23 = vsel %vm181_vm2, %v174_v56, %v199_v49  ;;  %v207_v25 = vrot.slane %v174_v56, 5 }
  0xde   :  { %v5022_v27 = vsel %vm181_vm2, %v183_v5, %v168_v39  ;;  %v5025_v28 = vsel %vm181_vm2, %v191_v7, %v190_v48  ;;  %v211_v30 = vsel %vm4986_vm1, %v5002_v59, %v5016_v14  ;;  %v5032_v31 = vsel %vm181_vm2, %v214_v61, %v213_v44 }
  0xdf   :  { %v327_v32 = vpop.f32.mrf.mxu1  ;;  %v196_v33 = vsel %vm4990_vm3, %v5022_v27, %v5025_v28  ;;  %v5039_v34 = vsel %vm181_vm2, %v207_v25, %v206_v52  ;;  %v5042_v35 = vsel %vm181_vm2, %v222_v62, %v221_v45  ;;  %v217_v37 = vrot.slane %v174_v56, 1 }
  0xe0   :  { %v328_v40 = vadd.f32 %v327_v32, %v195_v9  ;;  %v212_v41 = vsel %vm4990_vm3, %v5019_v23, %v5039_v34  ;;  %v229_v42 = vsel %vm4986_vm1, %v5032_v31, %v5042_v35  ;;  %v225_v43 = vrot.slane %v174_v56, 4 }
  0xe1   :  { %v329_v44 = vpop.f32.mrf.mxu1  ;;  %v5053_v48 = vsel %vm181_vm2, %v217_v37, %v216_v53  ;;  %v5056_v45 = vsel %vm181_vm2, %v232_v63, %v231_v46  ;;  %v240_v49 = vrot.slane %v172_v47, 3  ;;  %v235_v51 = vrot.slane %v174_v56, 2 }
  0xe2   :  { %v330_v52 = vadd.f32 %v329_v44, %v196_v33  ;;  %v5059_v57 = vsel %vm181_vm2, %v225_v43, %v224_v54  ;;  %v242_v58 = vrot.slane %v168_v39, 4  ;;  %v243_v60 = vrot.slane %v174_v56, 3 }
  0xe3   :  { %v230_v61 = vsel %vm4990_vm3, %v5053_v48, %v5059_v57  ;;  %v5066_v62 = vsel %vm181_vm2, %v240_v49, %v239_v50  ;;  %v5069_v53 = vsel %vm181_vm2, %v235_v51, %v234_v55  ;;  %v251_v46 = vsel %vm4986_vm1, %v5042_v35, %v5032_v31 }
  0xe4   :  { %v247_v39 = vsel %vm4986_vm1, %v5056_v45, %v5066_v62  ;;  %v5080_v47 = vsel %vm181_vm2, %v243_v60, %v242_v58  ;;  %4525 = vtanh.f32 %v330_v52  ;;  %v249_v54 = vsel %vm4986_vm1, %v5066_v62, %v5056_v45 }
  0xe5   :  { %v248_v50 = vsel %vm4990_vm3, %v5069_v53, %v5080_v47  ;;  %v250_v55 = vsel %vm4990_vm3, %v5080_v47, %v5069_v53  ;;  %v252_v56 = vsel %vm4990_vm3, %v5059_v57, %v5053_v48  ;;  %v4409_v32 = vmul.f32 -1.442695, %v328_v40 }
  0xe6   :  { %v4410_v9 = vmul.f32 -1.442695, %v330_v52 }
  0xe7   :  { %4527 = vpow2.f32 %v4409_v32  ;;  %v4852_v32 = vmov 1966171168  }
  0xf1   :  { %v4526_v25 = vpop.eup %4525 }
  0xf2   :  { %347 = vrot.lane.b32.xlu0 %v4526_v25, %s4851_s0 }
  0xf4   :  { %v4528_v33 = vpop.eup %4527 }
  0xf5   :  { %v338_v37 = vadd.f32 1.0, %v4528_v33  ;;  %v364_v33 = vunpack.c.l.s4 %v4852_v32 }
  0xf7   :  { %4529 = vrcp.f32 %v338_v37  ;;  %v365_v37 = vunpack.c.0.s8 %v364_v33 }
  0xf9   :  { %v5118_v5 = vsub.s32 %v365_v37, %v4974_v24 }
 0x104   :  { %v4530_v43 = vpop.eup %4529 }
 0x105   :  { %v345_v51 = vmul.f32 0.0, %v4530_v43 }
 0x164   :  { %v348_v44 = vpop.permute.xlu0 %347 }
 0x165   :  { %v350_v49 = vmul.f32 %v4530_v43, %v348_v44 }
 0x167   :  { %352 = vrot.lane.b32.xlu0 %v350_v49, %s4851_s0 }
 0x1d9   :  { %v353_v58 = vpop.permute.xlu0 %352 }
 0x1da   :  { %v355_v60 = vadd.f32 %v353_v58, %v345_v51 }
 0x1dc   :  { %4531 = vtanh.f32 %v355_v60 }
 0x1dd   :  { %4533 = vpow2.f32 %v4410_v9 }
 0x1e9   :  { %v4532_v7 = vpop.eup %4531 }
 0x1ea   :  { %358 = vrot.lane.b32.xlu1 %v4532_v7, %s4851_s0  ;;  %v4534_v25 = vpop.eup %4533 }
 0x1eb   :  { %v339_v40 = vadd.f32 1.0, %v4534_v25 }
 0x1ed   :  { %4535 = vrcp.f32 %v339_v40 }
 0x1fa   :  { %v4536_v44 = vpop.eup %4535 }
 0x25c   :  { %v359_v49 = vpop.permute.xlu1 %358 }
 0x25d   :  { %v361_v43 = vmul.f32 %v4536_v44, %v359_v49 }
 0x25f   :  { %v369_v51 = vrot.slane %v361_v43, %v5118_v5  ;;  %4411 = vmatmul.mubr.msk.f32.vlgmr.msra.gmra.mxu0 %vm257_vm4, %v361_v43 }
 0x260   :  { %717 = vmatpush1.msra.mxu0 %v4883_v4  ;;  %764 = vmatprep.mubr.f32.mxu0 %v4850_v0 }
 0x261   :  { %v370_v52 = vcombine.high %v369_v51, %v369_v51  ;;  %v5125_v7 = vrot.slane %v369_v51, %v5118_v5  ;;  %718 = vmatprep.subr.mxu0 %v4885_v6 }
 0x262   :  { %719 = vmatpush1.msra.mxu0 %v4888_v8 }
 0x263   :  { %388 = vst.msk [vmem:[#allocation2] sm:$0x1] %vm387_vm5, %v5125_v7  ;;  %720 = vmatprep.subr.mxu0 %v4894_v10  ;;  %v5133_v24 = vrot.slane %v370_v52, %v5118_v5 }
 0x264   :  { %721 = vmatpush1.msra.mxu0 %v4896_v11 }
 0x265   :  { %722 = vmatprep.subr.mxu0 %v4899_v12  ;;  %389 = vst.msk [vmem:[#allocation2 + $0x8] sm:$0x1] %vm387_vm5, %v5133_v24 }
 0x266   :  { %723 = vmatpush1.msra.mxu0 %v4903_v13 }
 0x267   :  { %724 = vmatprep.subr.mxu0 %v4910_v15 }
 0x268   :  { %725 = vmatpush1.msra.mxu0 %v4913_v16 }
 0x269   :  { %726 = vmatprep.subr.mxu0 %v4917_v17 }
 0x26a   :  { %727 = vmatpush1.msra.mxu0 %v4922_v18 }
 0x26b   :  { %728 = vmatprep.subr.mxu0 %v4925_v19 }
 0x26c   :  { %729 = vmatpush1.msra.mxu0 %v4929_v20 }
 0x26d   :  { %730 = vmatprep.subr.mxu0 %v4933_v21 }
 0x26e   :  { %731 = vmatpush1.msra.mxu0 %v4937_v22 }
 0x26f   :  { %1008 = vmatprep.subr.mxu0 %v4880_v2 }
 0x31f   :  { %v474_v9 = vpop.f32.mrf.mxu0 }
 0x320   :  { %v475_v58 = vadd.f32 %v474_v9, %v211_v30 }
 0x321   :  { %v476_v25 = vpop.f32.mrf.mxu0 }
 0x322   :  { %v477_v40 = vadd.f32 %v476_v25, %v212_v41  ;;  %v4412_v33 = vmul.f32 -1.442695, %v475_v58 }
 0x324   :  { %4537 = vtanh.f32 %v477_v40  ;;  %v4413_v41 = vmul.f32 -1.442695, %v477_v40 }
 0x325   :  { %4539 = vpow2.f32 %v4412_v33 }
 0x331   :  { %v4538_v32 = vpop.eup %4537 }
 0x332   :  { %494 = vrot.lane.b32.xlu1 %v4538_v32, %s4851_s0  ;;  %v4540_v37 = vpop.eup %4539 }
 0x333   :  { %v485_v44 = vadd.f32 1.0, %v4540_v37 }
 0x335   :  { %4541 = vrcp.f32 %v485_v44 }
 0x342   :  { %v4542_v49 = vpop.eup %4541 }
 0x343   :  { %v492_v30 = vmul.f32 %v4542_v49, %v355_v60 }
 0x3a4   :  { %v495_v43 = vpop.permute.xlu1 %494 }
 0x3a5   :  { %v497_v51 = vmul.f32 %v4542_v49, %v495_v43 }
 0x3a7   :  { %499 = vrot.lane.b32.xlu0 %v497_v51, %s4851_s0 }
 0x419   :  { %v500_v52 = vpop.permute.xlu0 %499 }
 0x41a   :  { %v502_v9 = vadd.f32 %v500_v52, %v492_v30 }
 0x41c   :  { %4543 = vtanh.f32 %v502_v9 }
 0x41d   :  { %4545 = vpow2.f32 %v4413_v41 }
 0x429   :  { %v4544_v63 = vpop.eup %4543 }
 0x42a   :  { %505 = vrot.lane.b32.xlu1 %v4544_v63, %s4851_s0  ;;  %v4546_v25 = vpop.eup %4545 }
 0x42b   :  { %v486_v58 = vadd.f32 1.0, %v4546_v25 }
 0x42d   :  { %4547 = vrcp.f32 %v486_v58 }
 0x43a   :  { %v4548_v32 = vpop.eup %4547 }
 0x49c   :  { %v506_v33 = vpop.permute.xlu1 %505 }
 0x49d   :  { %v508_v37 = vmul.f32 %v4548_v32, %v506_v33 }
 0x49f   :  { %v516_v44 = vrot.slane %v508_v37, %v5118_v5  ;;  %4414 = vmatmul.mubr.msk.f32.vlgmr.msra.gmra.mxu1 %vm257_vm4, %v508_v37 }
 0x4a0   :  { %863 = vmatpush1.msra.mxu1 %v4883_v4  ;;  %910 = vmatprep.mubr.f32.mxu1 %v4850_v0 }
 0x4a1   :  { %v517_v60 = vcombine.high %v516_v44, %v516_v44  ;;  %v5167_v49 = vrot.slane %v516_v44, %v5118_v5  ;;  %864 = vmatprep.subr.mxu1 %v4885_v6 }
 0x4a2   :  { %865 = vmatpush1.msra.mxu1 %v4888_v8 }
 0x4a3   :  { %534 = vst.msk [vmem:[#allocation2 + $0x1] sm:$0x1] %vm387_vm5, %v5167_v49  ;;  %866 = vmatprep.subr.mxu1 %v4894_v10  ;;  %v5175_v63 = vrot.slane %v517_v60, %v5118_v5 }
 0x4a4   :  { %867 = vmatpush1.msra.mxu1 %v4896_v11 }
 0x4a5   :  { %868 = vmatprep.subr.mxu1 %v4899_v12  ;;  %535 = vst.msk [vmem:[#allocation2 + $0x9] sm:$0x1] %vm387_vm5, %v5175_v63 }
 0x4a6   :  { %869 = vmatpush1.msra.mxu1 %v4903_v13 }
 0x4a7   :  { %870 = vmatprep.subr.mxu1 %v4910_v15 }
 0x4a8   :  { %871 = vmatpush1.msra.mxu1 %v4913_v16 }
 0x4a9   :  { %872 = vmatprep.subr.mxu1 %v4917_v17 }
 0x4aa   :  { %873 = vmatpush1.msra.mxu1 %v4922_v18 }
 0x4ab   :  { %874 = vmatprep.subr.mxu1 %v4925_v19 }
 0x4ac   :  { %875 = vmatpush1.msra.mxu1 %v4929_v20 }
 0x4ad   :  { %876 = vmatprep.subr.mxu1 %v4933_v21 }
 0x4ae   :  { %877 = vmatpush1.msra.mxu1 %v4937_v22 }
 0x4af   :  { %1154 = vmatprep.subr.mxu1 %v4880_v2 }
 0x55f   :  { %v620_v40 = vpop.f32.mrf.mxu1 }
 0x560   :  { %v621_v43 = vadd.f32 %v620_v40, %v229_v42 }
 0x561   :  { %v622_v51 = vpop.f32.mrf.mxu1 }
 0x562   :  { %v623_v30 = vadd.f32 %v622_v51, %v230_v61  ;;  %v4415_v41 = vmul.f32 -1.442695, %v621_v43 }
 0x564   :  { %4549 = vtanh.f32 %v623_v30  ;;  %v4416_v61 = vmul.f32 -1.442695, %v623_v30 }
 0x565   :  { %4551 = vpow2.f32 %v4415_v41 }
 0x571   :  { %v4550_v52 = vpop.eup %4549 }
 0x572   :  { %640 = vrot.lane.b32.xlu0 %v4550_v52, %s4851_s0  ;;  %v4552_v25 = vpop.eup %4551 }
 0x573   :  { %v631_v58 = vadd.f32 1.0, %v4552_v25 }
 0x575   :  { %4553 = vrcp.f32 %v631_v58 }
 0x582   :  { %v4554_v32 = vpop.eup %4553 }
 0x583   :  { %v638_v42 = vmul.f32 %v4554_v32, %v502_v9 }
 0x5e4   :  { %v641_v33 = vpop.permute.xlu0 %640 }
 0x5e5   :  { %v643_v37 = vmul.f32 %v4554_v32, %v641_v33 }
 0x5e7   :  { %645 = vrot.lane.b32.xlu1 %v643_v37, %s4851_s0 }
 0x659   :  { %v646_v44 = vpop.permute.xlu1 %645 }
 0x65a   :  { %v648_v60 = vadd.f32 %v646_v44, %v638_v42 }
 0x65c   :  { %4555 = vtanh.f32 %v648_v60 }
 0x65d   :  { %4557 = vpow2.f32 %v4416_v61 }
 0x669   :  { %v4556_v40 = vpop.eup %4555 }
 0x66a   :  { %651 = vrot.lane.b32.xlu0 %v4556_v40, %s4851_s0  ;;  %v4558_v51 = vpop.eup %4557 }
 0x66b   :  { %v632_v43 = vadd.f32 1.0, %v4558_v51 }
 0x66d   :  { %4559 = vrcp.f32 %v632_v43 }
 0x67a   :  { %v4560_v52 = vpop.eup %4559 }
 0x6dc   :  { %v652_v41 = vpop.permute.xlu0 %651 }
 0x6dd   :  { %v654_v25 = vmul.f32 %v4560_v52, %v652_v41 }
 0x6df   :  { %v662_v58 = vrot.slane %v654_v25, %v5118_v5  ;;  %4417 = vmatmul.mubr.msk.f32.vlgmr.msra.gmra.mxu0 %vm257_vm4, %v654_v25 }
 0x6e0   :  { %1009 = vmatpush1.msra.mxu0 %v4883_v4  ;;  %1056 = vmatprep.mubr.f32.mxu0 %v4850_v0 }
 0x6e1   :  { %v663_v9 = vcombine.high %v662_v58, %v662_v58  ;;  %v5209_v32 = vrot.slane %v662_v58, %v5118_v5  ;;  %1010 = vmatprep.subr.mxu0 %v4885_v6 }
 0x6e2   :  { %1011 = vmatpush1.msra.mxu0 %v4888_v8 }
 0x6e3   :  { %680 = vst.msk [vmem:[#allocation2 + $0x2] sm:$0x1] %vm387_vm5, %v5209_v32  ;;  %1012 = vmatprep.subr.mxu0 %v4894_v10  ;;  %v5217_v30 = vrot.slane %v663_v9, %v5118_v5 }
 0x6e4   :  { %1013 = vmatpush1.msra.mxu0 %v4896_v11 }
 0x6e5   :  { %1014 = vmatprep.subr.mxu0 %v4899_v12  ;;  %681 = vst.msk [vmem:[#allocation2 + $0xa] sm:$0x1] %vm387_vm5, %v5217_v30 }
 0x6e6   :  { %1015 = vmatpush1.msra.mxu0 %v4903_v13 }
 0x6e7   :  { %1016 = vmatprep.subr.mxu0 %v4910_v15 }
 0x6e8   :  { %1017 = vmatpush1.msra.mxu0 %v4913_v16 }
 0x6e9   :  { %1018 = vmatprep.subr.mxu0 %v4917_v17 }
 0x6ea   :  { %1019 = vmatpush1.msra.mxu0 %v4922_v18 }
 0x6eb   :  { %1020 = vmatprep.subr.mxu0 %v4925_v19 }
 0x6ec   :  { %1021 = vmatpush1.msra.mxu0 %v4929_v20 }
 0x6ed   :  { %1022 = vmatprep.subr.mxu0 %v4933_v21 }
 0x6ee   :  { %1023 = vmatpush1.msra.mxu0 %v4937_v22 }
 0x6ef   :  { %1300 = vmatprep.subr.mxu0 %v4880_v2 }
 0x79f   :  { %v766_v33 = vpop.f32.mrf.mxu0 }
 0x7a0   :  { %v767_v37 = vadd.f32 %v766_v33, %v247_v39 }
 0x7a1   :  { %v768_v42 = vpop.f32.mrf.mxu0 }
 0x7a2   :  { %v769_v44 = vadd.f32 %v768_v42, %v248_v50  ;;  %v4418_v61 = vmul.f32 -1.442695, %v767_v37 }
 0x7a4   :  { %4561 = vtanh.f32 %v769_v44  ;;  %v4419_v50 = vmul.f32 -1.442695, %v769_v44 }
 0x7a5   :  { %4563 = vpow2.f32 %v4418_v61 }
 0x7b1   :  { %v4562_v40 = vpop.eup %4561 }
 0x7b2   :  { %786 = vrot.lane.b32.xlu1 %v4562_v40, %s4851_s0  ;;  %v4564_v2 = vpop.eup %4563 }
 0x7b3   :  { %v777_v51 = vadd.f32 1.0, %v4564_v2 }
 0x7b5   :  { %4565 = vrcp.f32 %v777_v51 }
 0x7c2   :  { %v4566_v43 = vpop.eup %4565 }
 0x7c3   :  { %v784_v39 = vmul.f32 %v4566_v43, %v648_v60 }
 0x824   :  { %v787_v52 = vpop.permute.xlu1 %786 }
 0x825   :  { %v789_v41 = vmul.f32 %v4566_v43, %v787_v52 }
 0x827   :  { %791 = vrot.lane.b32.xlu0 %v789_v41, %s4851_s0 }
 0x899   :  { %v792_v25 = vpop.permute.xlu0 %791 }
 0x89a   :  { %v794_v58 = vadd.f32 %v792_v25, %v784_v39 }
 0x89c   :  { %4567 = vtanh.f32 %v794_v58 }
 0x89d   :  { %4569 = vpow2.f32 %v4419_v50 }
 0x8a9   :  { %v4568_v9 = vpop.eup %4567 }
 0x8aa   :  { %797 = vrot.lane.b32.xlu1 %v4568_v9, %s4851_s0  ;;  %v4570_v33 = vpop.eup %4569 }
 0x8ab   :  { %v778_v37 = vadd.f32 1.0, %v4570_v33 }
 0x8ad   :  { %4571 = vrcp.f32 %v778_v37 }
 0x8ba   :  { %v4572_v42 = vpop.eup %4571 }
 0x91c   :  { %v798_v40 = vpop.permute.xlu1 %797 }
 0x91d   :  { %v800_v61 = vmul.f32 %v4572_v42, %v798_v40 }
 0x91f   :  { %v808_v2 = vrot.slane %v800_v61, %v5118_v5  ;;  %4420 = vmatmul.mubr.msk.f32.vlgmr.msra.gmra.mxu1 %vm257_vm4, %v800_v61 }
 0x920   :  { %1155 = vmatpush1.msra.mxu1 %v4883_v4  ;;  %1202 = vmatprep.mubr.f32.mxu1 %v4850_v0 }
 0x921   :  { %v809_v60 = vcombine.high %v808_v2, %v808_v2  ;;  %v5251_v51 = vrot.slane %v808_v2, %v5118_v5  ;;  %1156 = vmatprep.subr.mxu1 %v4885_v6 }
 0x922   :  { %1157 = vmatpush1.msra.mxu1 %v4888_v8 }
 0x923   :  { %826 = vst.msk [vmem:[#allocation2 + $0x3] sm:$0x1] %vm387_vm5, %v5251_v51  ;;  %1158 = vmatprep.subr.mxu1 %v4894_v10  ;;  %v5259_v44 = vrot.slane %v809_v60, %v5118_v5 }
 0x924   :  { %1159 = vmatpush1.msra.mxu1 %v4896_v11 }
 0x925   :  { %1160 = vmatprep.subr.mxu1 %v4899_v12  ;;  %827 = vst.msk [vmem:[#allocation2 + $0xb] sm:$0x1] %vm387_vm5, %v5259_v44 }
 0x926   :  { %1161 = vmatpush1.msra.mxu1 %v4903_v13 }
 0x927   :  { %1162 = vmatprep.subr.mxu1 %v4910_v15 }
 0x928   :  { %1163 = vmatpush1.msra.mxu1 %v4913_v16 }
 0x929   :  { %1164 = vmatprep.subr.mxu1 %v4917_v17 }
 0x92a   :  { %1165 = vmatpush1.msra.mxu1 %v4922_v18 }
 0x92b   :  { %1166 = vmatprep.subr.mxu1 %v4925_v19 }
 0x92c   :  { %1167 = vmatpush1.msra.mxu1 %v4929_v20 }
 0x92d   :  { %1168 = vmatprep.subr.mxu1 %v4933_v21 }
 0x92e   :  { %1169 = vmatpush1.msra.mxu1 %v4937_v22 }
 0x9df   :  { %v912_v43 = vpop.f32.mrf.mxu1 }
 0x9e0   :  { %v913_v52 = vadd.f32 %v912_v43, %v249_v54 }
 0x9e1   :  { %v914_v41 = vpop.f32.mrf.mxu1 }
 0x9e2   :  { %v915_v39 = vadd.f32 %v914_v41, %v250_v55  ;;  %v4421_v9 = vmul.f32 -1.442695, %v913_v52 }
 0x9e4   :  { %4573 = vtanh.f32 %v915_v39  ;;  %v4422_v47 = vmul.f32 -1.442695, %v915_v39 }
 0x9e5   :  { %4575 = vpow2.f32 %v4421_v9 }
 0x9f1   :  { %v4574_v25 = vpop.eup %4573 }
 0x9f2   :  { %932 = vrot.lane.b32.xlu0 %v4574_v25, %s4851_s0  ;;  %v4576_v50 = vpop.eup %4575 }
 0x9f3   :  { %v923_v33 = vadd.f32 1.0, %v4576_v50 }
 0x9f5   :  { %4577 = vrcp.f32 %v923_v33 }
 0xa02   :  { %v4578_v37 = vpop.eup %4577 }
 0xa03   :  { %v930_v62 = vmul.f32 %v4578_v37, %v794_v58 }
 0xa64   :  { %v933_v42 = vpop.permute.xlu0 %932 }
 0xa65   :  { %v935_v45 = vmul.f32 %v4578_v37, %v933_v42  ;;  %v6559_v42 = vsel %vm4986_vm1, %v5016_v14, %v5002_v59 }
 0xa67   :  { %937 = vrot.lane.b32.xlu1 %v935_v45, %s4851_s0 }
 0xad9   :  { %v938_v54 = vpop.permute.xlu1 %937 }
 0xada   :  { %v940_v40 = vadd.f32 %v938_v54, %v930_v62  ;;  %v6560_v54 = vsel %vm4990_vm3, %v5039_v34, %v5019_v23 }
 0xadc   :  { %4579 = vtanh.f32 %v940_v40 }
 0xadd   :  { %4581 = vpow2.f32 %v4422_v47 }
 0xae9   :  { %v4580_v53 = vpop.eup %4579 }
 0xaea   :  { %943 = vrot.lane.b32.xlu0 %v4580_v53, %s4851_s0  ;;  %v4582_v55 = vpop.eup %4581 }
 0xaeb   :  { %v924_v61 = vadd.f32 1.0, %v4582_v55 }
 0xaed   :  { %4583 = vrcp.f32 %v924_v61 }
 0xafa   :  { %v4584_v2 = vpop.eup %4583 }
 0xb5c   :  { %v944_v60 = vpop.permute.xlu0 %943 }
 0xb5d   :  { %v946_v43 = vmul.f32 %v4584_v2, %v944_v60 }
 0xb5f   :  { %v954_v52 = vrot.slane %v946_v43, %v5118_v5  ;;  %4423 = vmatmul.mubr.msk.f32.vlgmr.msra.gmra.mxu0 %vm257_vm4, %v946_v43 }
 0xb60   :  { %1301 = vmatpush1.msra.mxu0 %v4883_v4  ;;  %1348 = vmatprep.mubr.f32.mxu0 %v4850_v0 }
 0xb61   :  { %v955_v58 = vcombine.high %v954_v52, %v954_v52  ;;  %v5292_v41 = vrot.slane %v954_v52, %v5118_v5  ;;  %1302 = vmatprep.subr.mxu0 %v4885_v6 }
 0xb62   :  { %1303 = vmatpush1.msra.mxu0 %v4888_v8 }
 0xb63   :  { %972 = vst.msk [vmem:[#allocation2 + $0x4] sm:$0x1] %vm387_vm5, %v5292_v41  ;;  %1304 = vmatprep.subr.mxu0 %v4894_v10  ;;  %v5300_v39 = vrot.slane %v955_v58, %v5118_v5 }
 0xb64   :  { %1305 = vmatpush1.msra.mxu0 %v4896_v11 }
 0xb65   :  { %1306 = vmatprep.subr.mxu0 %v4899_v12  ;;  %973 = vst.msk [vmem:[#allocation2 + $0xc] sm:$0x1] %vm387_vm5, %v5300_v39 }
 0xb66   :  { %1307 = vmatpush1.msra.mxu0 %v4903_v13 }
 0xb67   :  { %1308 = vmatprep.subr.mxu0 %v4910_v15 }
 0xb68   :  { %1309 = vmatpush1.msra.mxu0 %v4913_v16 }
 0xb69   :  { %1310 = vmatprep.subr.mxu0 %v4917_v17 }
 0xb6a   :  { %1311 = vmatpush1.msra.mxu0 %v4922_v18 }
 0xb6b   :  { %1312 = vmatprep.subr.mxu0 %v4925_v19 }
 0xb6c   :  { %1313 = vmatpush1.msra.mxu0 %v4929_v20 }
 0xb6d   :  { %1314 = vmatprep.subr.mxu0 %v4933_v21 }
 0xb6e   :  { %1315 = vmatpush1.msra.mxu0 %v4937_v22 }
 0xc1f   :  { %v1058_v4 = vpop.f32.mrf.mxu0 }
 0xc20   :  { %v1059_v6 = vadd.f32 %v1058_v4, %v251_v46 }
 0xc21   :  { %v1060_v8 = vpop.f32.mrf.mxu0 }
 0xc22   :  { %v1061_v10 = vadd.f32 %v1060_v8, %v252_v56  ;;  %v4424_v12 = vmul.f32 -1.442695, %v1059_v6 }
 0xc24   :  { %4585 = vtanh.f32 %v1061_v10  ;;  %v4425_v31 = vmul.f32 -1.442695, %v1061_v10 }
 0xc25   :  { %4587 = vpow2.f32 %v4424_v12 }
 0xc31   :  { %v4586_v11 = vpop.eup %4585 }
 0xc32   :  { %1078 = vrot.lane.b32.xlu1 %v4586_v11, %s4851_s0  ;;  %v4588_v13 = vpop.eup %4587 }
 0xc33   :  { %v1069_v15 = vadd.f32 1.0, %v4588_v13 }
 0xc35   :  { %4589 = vrcp.f32 %v1069_v15 }
 0xc42   :  { %v4590_v16 = vpop.eup %4589 }
 0xc43   :  { %v1076_v19 = vmul.f32 %v4590_v16, %v940_v40 }
 0xca4   :  { %v1079_v17 = vpop.permute.xlu1 %1078 }
 0xca5   :  { %v1081_v18 = vmul.f32 %v4590_v16, %v1079_v17  ;;  %v6561_v17 = vsel %vm4986_vm1, %v5009_v3, %v5006_v1 }
 0xca7   :  { %1083 = vrot.lane.b32.xlu0 %v1081_v18, %s4851_s0 }
 0xd19   :  { %v1084_v20 = vpop.permute.xlu0 %1083 }
 0xd1a   :  { %v1086_v21 = vadd.f32 %v1084_v20, %v1076_v19  ;;  %v6562_v20 = vsel %vm4990_vm3, %v5025_v28, %v5022_v27  ;;  %v393_v27 = vrot.slane %v5125_v7, %v4977_v26  ;;  %v685_v28 = vrot.slane %v5209_v32, %v4977_v26 }
 0xd1b   :  { %v397_v7 = vrot.slane %v5133_v24, %v4977_v26  ;;  %v981_v32 = vrot.slane %v5300_v39, %v4977_v26 }
 0xd1c   :  { %4591 = vtanh.f32 %v1086_v21 }
 0xd1d   :  { %4593 = vpow2.f32 %v4425_v31 }
 0xd29   :  { %v4592_v22 = vpop.eup %4591 }
 0xd2a   :  { %1089 = vrot.lane.b32.xlu1 %v4592_v22, %s4851_s0  ;;  %v4594_v35 = vpop.eup %4593 }
 0xd2b   :  { %v1070_v48 = vadd.f32 1.0, %v4594_v35 }
 0xd2d   :  { %4595 = vrcp.f32 %v1070_v48 }
 0xd3a   :  { %v4596_v57 = vpop.eup %4595 }
 0xd9c   :  { %v1090_v46 = vpop.permute.xlu1 %1089 }
 0xd9d   :  { %v1092_v56 = vmul.f32 %v4596_v57, %v1090_v46  ;;  %v977_v46 = vrot.slane %v5292_v41, %v4977_v26 }
 0xd9f   :  { %v1100_v25 = vrot.slane %v1092_v56, %v5118_v5  ;;  %4426 = vmatmul.mubr.msk.f32.vlgmr.msra.gmra.mxu1 %vm257_vm4, %v1092_v56 }
 0xda0   :  { %1558 = vmatprep.mubr.f32.mxu1 %v4850_v0 }
 0xda1   :  { %v1101_v9 = vcombine.high %v1100_v25, %v1100_v25  ;;  %v5332_v50 = vrot.slane %v1100_v25, %v5118_v5  ;;  %v689_v25 = vrot.slane %v5217_v30, %v4977_v26 }
 0xda3   :  { %1118 = vst.msk [vmem:[#allocation2 + $0x5] sm:$0x1] %vm387_vm5, %v5332_v50  ;;  %v5337_v33 = vrot.slane %v1101_v9, %v5118_v5 }
 0xda5   :  { %1119 = vst.msk [vmem:[#allocation2 + $0xd] sm:$0x1] %vm387_vm5, %v5337_v33 }
 0xe5f   :  { %v1204_v37 = vpop.f32.mrf.mxu1 }
 0xe60   :  { %v1205_v45 = vadd.f32 %v1204_v37, %v6559_v42 }
 0xe61   :  { %v1206_v62 = vpop.f32.mrf.mxu1 }
 0xe62   :  { %v1207_v40 = vadd.f32 %v1206_v62, %v6560_v54  ;;  %v4427_v47 = vmul.f32 -1.442695, %v1205_v45  ;;  %v539_v54 = vrot.slane %v5167_v49, %v4977_v26  ;;  %v543_v49 = vrot.slane %v5175_v63, %v4977_v26 }
 0xe64   :  { %4597 = vtanh.f32 %v1207_v40  ;;  %v4428_v34 = vmul.f32 -1.442695, %v1207_v40 }
 0xe65   :  { %4599 = vpow2.f32 %v4427_v47 }
 0xe71   :  { %v4598_v53 = vpop.eup %4597 }
 0xe72   :  { %1224 = vrot.lane.b32.xlu0 %v4598_v53, %s4851_s0  ;;  %v4600_v55 = vpop.eup %4599  ;;  %v831_v53 = vrot.slane %v5251_v51, %v4977_v26  ;;  %v835_v51 = vrot.slane %v5259_v44, %v4977_v26 }
 0xe73   :  { %v1215_v61 = vadd.f32 1.0, %v4600_v55  ;;  %v1123_v55 = vrot.slane %v5332_v50, %v4977_v26  ;;  %v1127_v50 = vrot.slane %v5337_v33, %v4977_v26 }
 0xe75   :  { %4601 = vrcp.f32 %v1215_v61 }
 0xe82   :  { %v4602_v2 = vpop.eup %4601 }
 0xe83   :  { %v1222_v14 = vmul.f32 %v4602_v2, %v1086_v21 }
 0xee4   :  { %v1225_v60 = vpop.permute.xlu0 %1224 }
 0xee5   :  { %v1227_v59 = vmul.f32 %v4602_v2, %v1225_v60 }
 0xee7   :  { %1229 = vrot.lane.b32.xlu1 %v1227_v59, %s4851_s0 }
 0xf59   :  { %v1230_v43 = vpop.permute.xlu1 %1229 }
 0xf5a   :  { %v1232_v52 = vadd.f32 %v1230_v43, %v1222_v14 }
 0xf5c   :  { %4603 = vtanh.f32 %v1232_v52 }
 0xf5d   :  { %4605 = vpow2.f32 %v4428_v34 }
 0xf69   :  { %v4604_v23 = vpop.eup %4603 }
 0xf6a   :  { %1235 = vrot.lane.b32.xlu0 %v4604_v23, %s4851_s0  ;;  %v4606_v58 = vpop.eup %4605 }
 0xf6b   :  { %v1216_v4 = vadd.f32 1.0, %v4606_v58 }
 0xf6d   :  { %4607 = vrcp.f32 %v1216_v4 }
 0xf7a   :  { %v4608_v6 = vpop.eup %4607 }
 0xfdc   :  { %v1236_v8 = vpop.permute.xlu0 %1235 }
 0xfdd   :  { %v1238_v10 = vmul.f32 %v4608_v6, %v1236_v8  ;;  %v1458_v8 = vld [vmem:[#allocation4 + $0x128] sm:$0xff] }
 0xfde   :  { %1510 = vmatprep.subr.mxu1 %v1458_v8 }
 0xfdf   :  { %v1246_v11 = vrot.slane %v1238_v10, %v5118_v5  ;;  %4429 = vmatmul.mubr.msk.f32.vlgmr.msra.gmra.mxu0 %vm257_vm4, %v1238_v10  ;;  %v1457_v10 = vld [vmem:[#allocation4 + $0x120] sm:$0xff] }
 0xfe0   :  { %1715 = vmatprep.mubr.f32.mxu0 %v4850_v0  ;;  %1511 = vmatpush1.msra.mxu1 %v1457_v10 }
 0xfe1   :  { %v1247_v12 = vcombine.high %v1246_v11, %v1246_v11  ;;  %v1254_v13 = vrot.slane %v1246_v11, %v5118_v5  ;;  %v1456_v11 = vld [vmem:[#allocation4 + $0x118] sm:$0xff] }
 0xfe2   :  { %1512 = vmatprep.subr.mxu1 %v1456_v11 }
 0xfe3   :  { %1264 = vst.msk [vmem:[#allocation2 + $0x6] sm:$0x1] %vm387_vm5, %v1254_v13  ;;  %v1261_v15 = vrot.slane %v1247_v12, %v5118_v5  ;;  %v1269_v56 = vrot.slane %v1254_v13, %v4977_v26  ;;  %v1455_v12 = vld [vmem:[#allocation4 + $0x110] sm:$0xff]  ;;  %v1454_v13 = vld [vmem:[#allocation4 + $0x108] sm:$0xff] }
 0xfe4   :  { %1513 = vmatpush1.msra.mxu1 %v1455_v12 }
 0xfe5   :  { %1265 = vst.msk [vmem:[#allocation2 + $0xe] sm:$0x1] %vm387_vm5, %v1261_v15  ;;  %v1273_v41 = vrot.slane %v1261_v15, %v4977_v26  ;;  %1514 = vmatprep.subr.mxu1 %v1454_v13 }
0x109f   :  { %v1350_v16 = vpop.f32.mrf.mxu0 }
0x10a0   :  { %v1351_v18 = vadd.f32 %v1350_v16, %v6561_v17  ;;  %v1453_v16 = vld [vmem:[#allocation4 + $0x100] sm:$0xff]  ;;  %v5436_v17 = vld [vmem:[#allocation4 + $0x1a8] sm:$0xff] }
0x10a1   :  { %v1352_v19 = vpop.f32.mrf.mxu0  ;;  %1667 = vmatprep.subr.mxu0 %v5436_v17  ;;  %1515 = vmatpush1.msra.mxu1 %v1453_v16 }
0x10a2   :  { %v5371_v21 = vadd.f32 %v1352_v19, %v6562_v20  ;;  %v4430_v31 = vmul.f32 -1.442695, %v1351_v18  ;;  %v5438_v18 = vld [vmem:[#allocation4 + $0x1a0] sm:$0xff]  ;;  %v1452_v20 = vld [vmem:[#allocation4 + $0xf8] sm:$0xff] }
0x10a3   :  { %1668 = vmatpush1.msra.mxu0 %v5438_v18  ;;  %1516 = vmatprep.subr.mxu1 %v1452_v20 }
0x10a4   :  { %4609 = vtanh.f32 %v5371_v21  ;;  %v4431_v60 = vmul.f32 -1.442695, %v5371_v21  ;;  %v5441_v21 = vld [vmem:[#allocation4 + $0x198] sm:$0xff] }
0x10a5   :  { %4611 = vpow2.f32 %v4430_v31  ;;  %v5445_v31 = vld [vmem:[#allocation4 + $0x190] sm:$0xff]  ;;  %1669 = vmatprep.subr.mxu0 %v5441_v21 }
0x10a6   :  { %1670 = vmatpush1.msra.mxu0 %v5445_v31 }
0x10b1   :  { %v4610_v22 = vpop.eup %4609 }
0x10b2   :  { %1370 = vrot.lane.b32.xlu1 %v4610_v22, %s4851_s0  ;;  %v4612_v35 = vpop.eup %4611  ;;  %v1451_v22 = vld [vmem:[#allocation4 + $0xf0] sm:$0xff] }
0x10b3   :  { %v1361_v48 = vadd.f32 1.0, %v4612_v35  ;;  %v1450_v35 = vld [vmem:[#allocation4 + $0xe8] sm:$0xff]  ;;  %1517 = vmatpush1.msra.mxu1 %v1451_v22 }
0x10b4   :  { %1518 = vmatprep.subr.mxu1 %v1450_v35 }
0x10b5   :  { %4613 = vrcp.f32 %v1361_v48  ;;  %v5448_v48 = vld [vmem:[#allocation4 + $0x188] sm:$0xff] }
0x10b6   :  { %1671 = vmatprep.subr.mxu0 %v5448_v48 }
0x10c2   :  { %v4614_v1 = vpop.eup %4613 }
0x10c3   :  { %v1368_v9 = vmul.f32 %v4614_v1, %v1232_v52 }
0x1124   :  { %v1371_v3 = vpop.permute.xlu1 %1370 }
0x1125   :  { %v1373_v57 = vmul.f32 %v4614_v1, %v1371_v3  ;;  %v1449_v1 = vld [vmem:[#allocation4 + $0xe0] sm:$0xff] }
0x1126   :  { %v5451_v3 = vld [vmem:[#allocation4 + $0x180] sm:$0xff]  ;;  %1519 = vmatpush1.msra.mxu1 %v1449_v1 }
0x1127   :  { %1375 = vrot.lane.b32.xlu0 %v1373_v57, %s4851_s0  ;;  %1672 = vmatpush1.msra.mxu0 %v5451_v3 }
0x112b   :  { %398 = vrot.lane.b32.xlu0 %v393_v27, %s4853_s22  ;;  %v1448_v27 = vld [vmem:[#allocation4 + $0xd8] sm:$0xff] }
0x112c   :  { %1520 = vmatprep.subr.mxu1 %v1448_v27 }
0x112f   :  { %690 = vrot.lane.b32.xlu0 %v685_v28, %s4853_s22  ;;  %v5454_v28 = vld [vmem:[#allocation4 + $0x178] sm:$0xff] }
0x1130   :  { %1673 = vmatprep.subr.mxu0 %v5454_v28 }
0x1133   :  { %982 = vrot.lane.b32.xlu0 %v977_v46, %s4853_s22  ;;  %v1447_v46 = vld [vmem:[#allocation4 + $0xd0] sm:$0xff] }
0x1134   :  { %1521 = vmatpush1.msra.mxu1 %v1447_v46 }
0x1137   :  { %1274 = vrot.lane.b32.xlu0 %v1269_v56, %s4853_s22  ;;  %v1446_v56 = vld [vmem:[#allocation4 + $0xc8] sm:$0xff] }
0x1138   :  { %1522 = vmatprep.subr.mxu1 %v1446_v56 }
0x113b   :  { %400 = vrot.lane.b32.xlu0 %v397_v7, %s4853_s22  ;;  %v1445_v7 = vld [vmem:[#allocation4 + $0xc0] sm:$0xff] }
0x113c   :  { %1523 = vmatpush1.msra.mxu1 %v1445_v7 }
0x113f   :  { %692 = vrot.lane.b32.xlu0 %v689_v25, %s4853_s22 }
0x1143   :  { %984 = vrot.lane.b32.xlu0 %v981_v32, %s4853_s22  ;;  %v1444_v32 = vld [vmem:[#allocation4 + $0xb8] sm:$0xff] }
0x1144   :  { %1524 = vmatprep.subr.mxu1 %v1444_v32 }
0x1147   :  { %1276 = vrot.lane.b32.xlu0 %v1273_v41, %s4853_s22 }
0x1199   :  { %v1376_v37 = vpop.permute.xlu0 %1375 }
0x119a   :  { %v1378_v42 = vadd.f32 %v1376_v37, %v1368_v9  ;;  %v1443_v9 = vld [vmem:[#allocation4 + $0xb0] sm:$0xff] }
0x119b   :  { %v5462_v37 = vld [vmem:[#allocation4 + $0x170] sm:$0xff]  ;;  %1525 = vmatpush1.msra.mxu1 %v1443_v9 }
0x119c   :  { %4615 = vtanh.f32 %v1378_v42  ;;  %1674 = vmatpush1.msra.mxu0 %v5462_v37  ;;  %v5465_v42 = vld [vmem:[#allocation4 + $0x168] sm:$0xff]  ;;  %1813 = vmatprep.subr.mxu1 %v5436_v17 }
0x119d   :  { %v399_v24 = vpop.permute.xlu0 %398  ;;  %4617 = vpow2.f32 %v4431_v60  ;;  %1675 = vmatprep.subr.mxu0 %v5465_v42 }
0x119e   :  { %404 = vst.msk [vmem:[#allocation3 + $0x7] sm:$0x1] %vm387_vm5, %v399_v24  ;;  %v5467_v24 = vld [vmem:[#allocation4 + $0x160] sm:$0xff] }
0x119f   :  { %1676 = vmatpush1.msra.mxu0 %v5467_v24 }
0x11a1   :  { %v691_v45 = vpop.permute.xlu0 %690 }
0x11a2   :  { %696 = vst.msk [vmem:[#allocation3 + $0x5] sm:$0x1] %vm387_vm5, %v691_v45  ;;  %v5469_v45 = vld [vmem:[#allocation4 + $0x158] sm:$0xff] }
0x11a3   :  { %1677 = vmatprep.subr.mxu0 %v5469_v45 }
0x11a5   :  { %v983_v30 = vpop.permute.xlu0 %982 }
0x11a6   :  { %988 = vst.msk [vmem:[#allocation3 + $0x3] sm:$0x1] %vm387_vm5, %v983_v30 }
0x11a9   :  { %v4616_v39 = vpop.eup %4615  ;;  %v1275_v62 = vpop.permute.xlu0 %1274 }
0x11aa   :  { %1280 = vst.msk [vmem:[#allocation3 + $0x1] sm:$0x1] %vm387_vm5, %v1275_v62  ;;  %1381 = vrot.lane.b32.xlu1 %v4616_v39, %s4851_s0  ;;  %v4618_v59 = vpop.eup %4617  ;;  %v5475_v39 = vld [vmem:[#allocation4 + $0x150] sm:$0xff]  ;;  %v5479_v62 = vld [vmem:[#allocation4 + $0x148] sm:$0xff] }
0x11ab   :  { %v1362_v63 = vadd.f32 1.0, %v4618_v59  ;;  %1678 = vmatpush1.msra.mxu0 %v5475_v39 }
0x11ac   :  { %1679 = vmatprep.subr.mxu0 %v5479_v62 }
0x11ad   :  { %v401_v40 = vpop.permute.xlu0 %400  ;;  %4619 = vrcp.f32 %v1362_v63  ;;  %v1476_v63 = vld [vmem:[#allocation4 + $0x1b0] ss:$8 sm:$0x3] }
0x11ae   :  { %405 = vst.msk [vmem:[#allocation3 + $0xf] sm:$0x1] %vm387_vm5, %v401_v40  ;;  %544 = vrot.lane.b32.xlu1 %v539_v54, %s4853_s22  ;;  %v5481_v54 = vld [vmem:[#allocation4 + $0x140] sm:$0xff]  ;;  %v5483_v40 = vld [vmem:[#allocation4 + $0x138] sm:$0xff] }
0x11af   :  { %1680 = vmatpush1.msra.mxu0 %v5481_v54 }
0x11b0   :  { %1681 = vmatprep.subr.mxu0 %v5483_v40 }
0x11b1   :  { %v693_v47 = vpop.permute.xlu0 %692 }
0x11b2   :  { %697 = vst.msk [vmem:[#allocation3 + $0xd] sm:$0x1] %vm387_vm5, %v693_v47  ;;  %836 = vrot.lane.b32.xlu1 %v831_v53, %s4853_s22  ;;  %v5486_v53 = vld [vmem:[#allocation4 + $0x130] sm:$0xff] }
0x11b3   :  { %1682 = vmatpush1.msra.mxu0 %v5486_v53 }
0x11b4   :  { %1716 = vmatmul.mubr.f32.vlgmr.msra.gmra.mxu0 %v4850_v0  ;;  %1959 = vmatprep.subr.mxu0 %v5436_v17 }
0x11b5   :  { %v985_v61 = vpop.permute.xlu0 %984  ;;  %1960 = vmatpush1.msra.mxu0 %v5438_v18  ;;  %2007 = vmatprep.mubr.f32.mxu0 %v4850_v0 }
0x11b6   :  { %989 = vst.msk [vmem:[#allocation3 + $0xb] sm:$0x1] %vm387_vm5, %v985_v61  ;;  %1128 = vrot.lane.b32.xlu1 %v1123_v55, %s4853_s22  ;;  %1961 = vmatprep.subr.mxu0 %v5441_v21 }
0x11b7   :  { %1962 = vmatpush1.msra.mxu0 %v5445_v31 }
0x11b8   :  { %1963 = vmatprep.subr.mxu0 %v5448_v48 }
0x11b9   :  { %v1277_v2 = vpop.permute.xlu0 %1276  ;;  %1964 = vmatpush1.msra.mxu0 %v5451_v3 }
0x11ba   :  { %1281 = vst.msk [vmem:[#allocation3 + $0x9] sm:$0x1] %vm387_vm5, %v1277_v2  ;;  %546 = vrot.lane.b32.xlu1 %v543_v49, %s4853_s22  ;;  %v4620_v14 = vpop.eup %4619  ;;  %1965 = vmatprep.subr.mxu0 %v5454_v28 }
0x11bb   :  { %1966 = vmatpush1.msra.mxu0 %v5462_v37 }
0x11bc   :  { %1967 = vmatprep.subr.mxu0 %v5465_v42 }
0x11bd   :  { %1968 = vmatpush1.msra.mxu0 %v5467_v24 }
0x11be   :  { %838 = vrot.lane.b32.xlu1 %v835_v51, %s4853_s22  ;;  %1969 = vmatprep.subr.mxu0 %v5469_v45 }
0x11bf   :  { %1970 = vmatpush1.msra.mxu0 %v5475_v39 }
0x11c0   :  { %1971 = vmatprep.subr.mxu0 %v5479_v62 }
0x11c1   :  { %1972 = vmatpush1.msra.mxu0 %v5481_v54 }
0x11c2   :  { %1130 = vrot.lane.b32.xlu1 %v1127_v50, %s4853_s22  ;;  %1973 = vmatprep.subr.mxu0 %v5483_v40 }
0x11c3   :  { %1974 = vmatpush1.msra.mxu0 %v5486_v53 }
0x11c4   :  { %2251 = vmatprep.subr.mxu0 %v5436_v17 }
0x121c   :  { %v1382_v43 = vpop.permute.xlu1 %1381 }
0x121d   :  { %v1384_v52 = vmul.f32 %v4620_v14, %v1382_v43  ;;  %v1481_v14 = vrot.slane %v1476_v63, %v4977_v26  ;;  %v1485_v43 = vrot.slane %v1476_v63, %v4980_v29 }
0x121f   :  { %v1392_v23 = vrot.slane %v1384_v52, %v5118_v5 }
0x1220   :  { %v545_v34 = vpop.permute.xlu1 %544 }
0x1221   :  { %v1393_v44 = vcombine.high %v1392_v23, %v1392_v23  ;;  %v1400_v58 = vrot.slane %v1392_v23, %v5118_v5  ;;  %550 = vst.msk [vmem:[#allocation3 + $0x6] sm:$0x1] %vm387_vm5, %v545_v34 }
0x1223   :  { %1410 = vst.msk [vmem:[#allocation2 + $0x7] sm:$0x1] %vm387_vm5, %v1400_v58  ;;  %v1415_v33 = vrot.slane %v1400_v58, %v4977_v26  ;;  %v1407_v4 = vrot.slane %v1393_v44, %v5118_v5 }
0x1224   :  { %v837_v6 = vpop.permute.xlu1 %836 }
0x1225   :  { %842 = vst.msk [vmem:[#allocation3 + $0x4] sm:$0x1] %vm387_vm5, %v837_v6  ;;  %1420 = vrot.lane.b32.xlu1 %v1415_v33, %s4853_s22  ;;  %1411 = vst.msk [vmem:[#allocation2 + $0xf] sm:$0x1] %vm387_vm5, %v1407_v4  ;;  %v1419_v15 = vrot.slane %v1407_v4, %v4977_v26 }
0x1228   :  { %v1129_v19 = vpop.permute.xlu1 %1128 }
0x1229   :  { %1134 = vst.msk [vmem:[#allocation3 + $0x2] sm:$0x1] %vm387_vm5, %v1129_v19  ;;  %1422 = vrot.lane.b32.xlu1 %v1419_v15, %s4853_s22 }
0x122a   :  { %v1428_v49 = vld [vmem:[#allocation2] sm:$0xff] }
0x122c   :  { %v547_v57 = vpop.permute.xlu1 %546  ;;  %v1429_v50 = vld [vmem:[#allocation2 + $0x8] sm:$0xff] }
0x122d   :  { %551 = vst.msk [vmem:[#allocation3 + $0xe] sm:$0x1] %vm387_vm5, %v547_v57 }
0x1230   :  { %v839_v25 = vpop.permute.xlu1 %838 }
0x1231   :  { %843 = vst.msk [vmem:[#allocation3 + $0xc] sm:$0x1] %vm387_vm5, %v839_v25 }
0x1234   :  { %v1131_v41 = vpop.permute.xlu1 %1130 }
0x1235   :  { %1135 = vst.msk [vmem:[#allocation3 + $0xa] sm:$0x1] %vm387_vm5, %v1131_v41 }
0x1274   :  { %v1717_v27 = vpop.f32.mrf.mxu0 }
0x1276   :  { %v1719_v63 = vpop.f32.mrf.mxu0 }
0x1297   :  { %v1421_v30 = vpop.permute.xlu1 %1420 }
0x1298   :  { %1426 = vst.msk [vmem:[#allocation3] sm:$0x1] %vm387_vm5, %v1421_v30 }
0x129b   :  { %v1423_v47 = vpop.permute.xlu1 %1422 }
0x129c   :  { %1427 = vst.msk [vmem:[#allocation3 + $0x8] sm:$0x1] %vm387_vm5, %v1423_v47 }
0x129f   :  { %v1430_v55 = vld [vmem:[#allocation3] sm:$0xff] }
0x12a0   :  { %1434 = vrot.lane.b32.xlu0 %v1430_v55, %s4854_s23 }
0x12a3   :  { %v1431_v61 = vld [vmem:[#allocation3 + $0x8] sm:$0xff] }
0x12a4   :  { %1436 = vrot.lane.b32.xlu1 %v1431_v61, %s4854_s23 }
0x1312   :  { %v1435_v2 = vpop.permute.xlu0 %1434 }
0x1313   :  { %v1441_v51 = vsel %vm1440_vm6, %v1428_v49, %v1435_v2 }
0x1314   :  { %4432 = vmatmul.mubr.msk.f32.vlgmr.msra.gmra.mxu1 %vm257_vm4, %v1441_v51 }
0x1315   :  { %1564 = vmatprep.mubr.f32.mxu1 %v4850_v0  ;;  %1814 = vmatpush1.msra.mxu1 %v5438_v18 }
0x1316   :  { %v1437_v60 = vpop.permute.xlu1 %1436  ;;  %1815 = vmatprep.subr.mxu1 %v5441_v21 }
0x1317   :  { %v1442_v59 = vsel %vm1440_vm6, %v1429_v50, %v1437_v60  ;;  %1816 = vmatpush1.msra.mxu1 %v5445_v31 }
0x1318   :  { %4433 = vmatmul.mubr.msk.f32.gmra.mxu1 %vm257_vm4, %v1442_v59  ;;  %1817 = vmatprep.subr.mxu1 %v5448_v48 }
0x1319   :  { %1818 = vmatpush1.msra.mxu1 %v5451_v3  ;;  %1861 = vmatprep.mubr.f32.mxu1 %v4850_v0 }
0x131a   :  { %1819 = vmatprep.subr.mxu1 %v5454_v28 }
0x131b   :  { %1820 = vmatpush1.msra.mxu1 %v5462_v37 }
0x131c   :  { %1821 = vmatprep.subr.mxu1 %v5465_v42 }
0x131d   :  { %1822 = vmatpush1.msra.mxu1 %v5467_v24 }
0x131e   :  { %1823 = vmatprep.subr.mxu1 %v5469_v45 }
0x131f   :  { %1824 = vmatpush1.msra.mxu1 %v5475_v39 }
0x1320   :  { %1825 = vmatprep.subr.mxu1 %v5479_v62 }
0x1321   :  { %1826 = vmatpush1.msra.mxu1 %v5481_v54 }
0x1322   :  { %1827 = vmatprep.subr.mxu1 %v5483_v40 }
0x1323   :  { %1828 = vmatpush1.msra.mxu1 %v5486_v53 }
0x1324   :  { %2105 = vmatprep.subr.mxu1 %v5436_v17 }
0x13d4   :  { %v1560_v52 = vpop.f32.mrf.mxu1 }
0x13d5   :  { %v1561_v23 = vadd.f32 %v1560_v52, %v1481_v14 }
0x13d6   :  { %v1562_v34 = vpop.f32.mrf.mxu1 }
0x13d7   :  { %v1563_v44 = vadd.f32 %v1562_v34, %v1485_v43  ;;  %v1581_v33 = vrot.slane %v1561_v23, 7  ;;  %v1591_v4 = vrot.slane %v1561_v23, 1  ;;  %v1597_v6 = vrot.slane %v1561_v23, 6 }
0x13d8   :  { %v1566_v58 = vpop.f32.mrf.mxu1  ;;  %v1607_v10 = vrot.slane %v1561_v23, 2  ;;  %v1615_v11 = vrot.slane %v1561_v23, 5  ;;  %v1625_v12 = vrot.slane %v1561_v23, 3  ;;  %v1633_v20 = vrot.slane %v1561_v23, 4 }
0x13d9   :  { %v1567_v8 = vadd.f32 %v1566_v58, %v1481_v14  ;;  %v1584_v15 = vrot.slane %v1563_v44, 7  ;;  %v1593_v16 = vrot.slane %v1563_v44, 1  ;;  %v1600_v19 = vrot.slane %v1563_v44, 6 }
0x13da   :  { %v1568_v13 = vpop.f32.mrf.mxu1  ;;  %v1610_v60 = vrot.slane %v1563_v44, 2 }
0x13db   :  { %v1569_v22 = vadd.f32 %v1568_v13, %v1485_v43  ;;  %v1575_v35 = vrot.slane %v1567_v8, 7  ;;  %v1582_v1 = vrot.slane %v1567_v8, 6  ;;  %v5538_v57 = vsel %vm181_vm2, %v1567_v8, %v1591_v4 }
0x13dc   :  { %v1598_v46 = vrot.slane %v1567_v8, 5  ;;  %v1608_v56 = vrot.slane %v1567_v8, 1  ;;  %v1616_v7 = vrot.slane %v1567_v8, 4  ;;  %v1626_v25 = vrot.slane %v1567_v8, 2 }
0x13dd   :  { %v5541_v32 = vsel %vm181_vm2, %v1575_v35, %v1561_v23  ;;  %v5544_v41 = vsel %vm181_vm2, %v1582_v1, %v1581_v33  ;;  %v1577_v9 = vrot.slane %v1569_v22, 7  ;;  %v1585_v30 = vrot.slane %v1569_v22, 6 }
0x13de   :  { %v1589_v47 = vsel %vm4986_vm1, %v5541_v32, %v5544_v41  ;;  %v5551_v55 = vsel %vm181_vm2, %v1598_v46, %v1597_v6  ;;  %v5554_v61 = vsel %vm181_vm2, %v1569_v22, %v1593_v16  ;;  %v1601_v49 = vrot.slane %v1569_v22, 5 }
0x13df   :  { %v5557_v2 = vsel %vm181_vm2, %v1577_v9, %v1563_v44  ;;  %v5560_v51 = vsel %vm181_vm2, %v1585_v30, %v1584_v15  ;;  %v1605_v50 = vsel %vm4986_vm1, %v5538_v57, %v5551_v55  ;;  %v5574_v43 = vsel %vm181_vm2, %v1608_v56, %v1607_v10 }
0x13e0   :  { %v1590_v59 = vsel %vm4990_vm3, %v5557_v2, %v5560_v51  ;;  %v5571_v14 = vsel %vm181_vm2, %v1601_v49, %v1600_v19  ;;  %v5577_v52 = vsel %vm181_vm2, %v1616_v7, %v1615_v11  ;;  %v1618_v33 = vrot.slane %v1563_v44, 5 }
0x13e1   :  { %v1720_v23 = vadd.f32 %v1719_v63, %v1590_v59  ;;  %v1606_v34 = vsel %vm4990_vm3, %v5554_v61, %v5571_v14  ;;  %v1623_v58 = vsel %vm4986_vm1, %v5574_v43, %v5577_v52  ;;  %v1611_v4 = vrot.slane %v1569_v22, 1 }
0x13e2   :  { %v1619_v6 = vrot.slane %v1569_v22, 4  ;;  %v5588_v10 = vsel %vm181_vm2, %v1626_v25, %v1625_v12  ;;  %v1634_v13 = vrot.slane %v1567_v8, 3  ;;  %v1628_v11 = vrot.slane %v1563_v44, 3 }
0x13e3   :  { %v1629_v15 = vrot.slane %v1569_v22, 2  ;;  %v1636_v16 = vrot.slane %v1563_v44, 4  ;;  %v1637_v19 = vrot.slane %v1569_v22, 3  ;;  %4621 = vtanh.f32 %v1720_v23 }
0x13e4   :  { %v5591_v35 = vsel %vm181_vm2, %v1611_v4, %v1610_v60  ;;  %v5594_v1 = vsel %vm181_vm2, %v1619_v6, %v1618_v33  ;;  %v5597_v46 = vsel %vm181_vm2, %v1634_v13, %v1633_v20  ;;  %v1645_v56 = vsel %vm4986_vm1, %v5577_v52, %v5574_v43 }
0x13e5   :  { %v1624_v12 = vsel %vm4990_vm3, %v5591_v35, %v5594_v1  ;;  %v1641_v44 = vsel %vm4986_vm1, %v5588_v10, %v5597_v46  ;;  %v5608_v8 = vsel %vm181_vm2, %v1629_v15, %v1628_v11  ;;  %v5611_v22 = vsel %vm181_vm2, %v1637_v19, %v1636_v16 }
0x13e6   :  { %v1643_v20 = vsel %vm4986_vm1, %v5597_v46, %v5588_v10  ;;  %v1646_v7 = vsel %vm4990_vm3, %v5594_v1, %v5591_v35  ;;  %v1642_v25 = vsel %vm4990_vm3, %v5608_v8, %v5611_v22  ;;  %v1644_v9 = vsel %vm4990_vm3, %v5611_v22, %v5608_v8 }
0x13e7   :  { %v1718_v33 = vadd.f32 %v1717_v27, %v1589_v47  ;;  %v4435_v59 = vmul.f32 -1.442695, %v1720_v23 }
0x13e9   :  { %v4434_v4 = vmul.f32 -1.442695, %v1718_v33 }
0x13eb   :  { %4623 = vpow2.f32 %v4434_v4 }
0x13f0   :  { %v4622_v63 = vpop.eup %4621 }
0x13f1   :  { %1737 = vrot.lane.b32.xlu0 %v4622_v63, %s4851_s0 }
0x13f8   :  { %v4624_v6 = vpop.eup %4623 }
0x13f9   :  { %v1728_v13 = vadd.f32 1.0, %v4624_v6 }
0x13fb   :  { %4625 = vrcp.f32 %v1728_v13 }
0x1408   :  { %v4626_v11 = vpop.eup %4625 }
0x1409   :  { %v1735_v19 = vmul.f32 0.0, %v4626_v11 }
0x1463   :  { %v1738_v15 = vpop.permute.xlu0 %1737 }
0x1464   :  { %v1740_v16 = vmul.f32 %v4626_v11, %v1738_v15 }
0x1466   :  { %1742 = vrot.lane.b32.xlu1 %v1740_v16, %s4851_s0 }
0x14d8   :  { %v1743_v60 = vpop.permute.xlu1 %1742 }
0x14d9   :  { %v1745_v49 = vadd.f32 %v1743_v60, %v1735_v19 }
0x14db   :  { %4627 = vtanh.f32 %v1745_v49 }
0x14dc   :  { %4629 = vpow2.f32 %v4435_v59 }
0x14e8   :  { %v4628_v30 = vpop.eup %4627 }
0x14e9   :  { %1748 = vrot.lane.b32.xlu0 %v4628_v30, %s4851_s0  ;;  %v4630_v27 = vpop.eup %4629 }
0x14ea   :  { %v1729_v47 = vadd.f32 1.0, %v4630_v27 }
0x14ec   :  { %4631 = vrcp.f32 %v1729_v47 }
0x14f9   :  { %v4632_v63 = vpop.eup %4631 }
0x155b   :  { %v1749_v33 = vpop.permute.xlu0 %1748 }
0x155c   :  { %v1751_v4 = vmul.f32 %v4632_v63, %v1749_v33 }
0x155e   :  { %v1759_v6 = vrot.slane %v1751_v4, %v5118_v5  ;;  %4436 = vmatmul.mubr.msk.f32.vlgmr.msra.gmra.mxu1 %vm257_vm4, %v1751_v4 }
0x155f   :  { %2106 = vmatpush1.msra.mxu1 %v5438_v18  ;;  %2153 = vmatprep.mubr.f32.mxu1 %v4850_v0 }
0x1560   :  { %v1760_v60 = vcombine.high %v1759_v6, %v1759_v6  ;;  %v5657_v13 = vrot.slane %v1759_v6, %v5118_v5  ;;  %2107 = vmatprep.subr.mxu1 %v5441_v21 }
0x1561   :  { %2108 = vmatpush1.msra.mxu1 %v5445_v31 }
0x1562   :  { %1777 = vst.msk [vmem:[#allocation2] sm:$0x1] %vm387_vm5, %v5657_v13  ;;  %2109 = vmatprep.subr.mxu1 %v5448_v48  ;;  %v5665_v23 = vrot.slane %v1760_v60, %v5118_v5 }
0x1563   :  { %2110 = vmatpush1.msra.mxu1 %v5451_v3 }
0x1564   :  { %2111 = vmatprep.subr.mxu1 %v5454_v28  ;;  %1778 = vst.msk [vmem:[#allocation2 + $0x8] sm:$0x1] %vm387_vm5, %v5665_v23 }
0x1565   :  { %2112 = vmatpush1.msra.mxu1 %v5462_v37 }
0x1566   :  { %2113 = vmatprep.subr.mxu1 %v5465_v42 }
0x1567   :  { %2114 = vmatpush1.msra.mxu1 %v5467_v24 }
0x1568   :  { %2115 = vmatprep.subr.mxu1 %v5469_v45 }
0x1569   :  { %2116 = vmatpush1.msra.mxu1 %v5475_v39 }
0x156a   :  { %2117 = vmatprep.subr.mxu1 %v5479_v62 }
0x156b   :  { %2118 = vmatpush1.msra.mxu1 %v5481_v54 }
0x156c   :  { %2119 = vmatprep.subr.mxu1 %v5483_v40 }
0x156d   :  { %2120 = vmatpush1.msra.mxu1 %v5486_v53 }
0x156e   :  { %2397 = vmatprep.subr.mxu1 %v5436_v17 }
0x161e   :  { %v1863_v30 = vpop.f32.mrf.mxu1 }
0x161f   :  { %v1864_v59 = vadd.f32 %v1863_v30, %v1605_v50 }
0x1620   :  { %v1865_v11 = vpop.f32.mrf.mxu1 }
0x1621   :  { %v1866_v15 = vadd.f32 %v1865_v11, %v1606_v34  ;;  %v4437_v19 = vmul.f32 -1.442695, %v1864_v59 }
0x1623   :  { %4633 = vtanh.f32 %v1866_v15  ;;  %v4438_v34 = vmul.f32 -1.442695, %v1866_v15 }
0x1624   :  { %4635 = vpow2.f32 %v4437_v19 }
0x1630   :  { %v4634_v16 = vpop.eup %4633 }
0x1631   :  { %1883 = vrot.lane.b32.xlu1 %v4634_v16, %s4851_s0  ;;  %v4636_v27 = vpop.eup %4635 }
0x1632   :  { %v1874_v47 = vadd.f32 1.0, %v4636_v27 }
0x1634   :  { %4637 = vrcp.f32 %v1874_v47 }
0x1641   :  { %v4638_v63 = vpop.eup %4637 }
0x1642   :  { %v1881_v50 = vmul.f32 %v4638_v63, %v1745_v49 }
0x16a3   :  { %v1884_v33 = vpop.permute.xlu1 %1883 }
0x16a4   :  { %v1886_v4 = vmul.f32 %v4638_v63, %v1884_v33 }
0x16a6   :  { %1888 = vrot.lane.b32.xlu0 %v1886_v4, %s4851_s0 }
0x1718   :  { %v1889_v6 = vpop.permute.xlu0 %1888 }
0x1719   :  { %v1891_v60 = vadd.f32 %v1889_v6, %v1881_v50 }
0x171b   :  { %4639 = vtanh.f32 %v1891_v60 }
0x171c   :  { %4641 = vpow2.f32 %v4438_v34 }
0x1728   :  { %v4640_v30 = vpop.eup %4639 }
0x1729   :  { %1894 = vrot.lane.b32.xlu1 %v4640_v30, %s4851_s0  ;;  %v4642_v11 = vpop.eup %4641 }
0x172a   :  { %v1875_v59 = vadd.f32 1.0, %v4642_v11 }
0x172c   :  { %4643 = vrcp.f32 %v1875_v59 }
0x1739   :  { %v4644_v16 = vpop.eup %4643 }
0x179b   :  { %v1895_v19 = vpop.permute.xlu1 %1894 }
0x179c   :  { %v1897_v27 = vmul.f32 %v4644_v16, %v1895_v19 }
0x179e   :  { %v1905_v47 = vrot.slane %v1897_v27, %v5118_v5  ;;  %4439 = vmatmul.mubr.msk.f32.vlgmr.msra.gmra.mxu0 %vm257_vm4, %v1897_v27 }
0x179f   :  { %2252 = vmatpush1.msra.mxu0 %v5438_v18  ;;  %2299 = vmatprep.mubr.f32.mxu0 %v4850_v0 }
0x17a0   :  { %v1906_v49 = vcombine.high %v1905_v47, %v1905_v47  ;;  %v5699_v63 = vrot.slane %v1905_v47, %v5118_v5  ;;  %2253 = vmatprep.subr.mxu0 %v5441_v21 }
0x17a1   :  { %2254 = vmatpush1.msra.mxu0 %v5445_v31 }
0x17a2   :  { %1923 = vst.msk [vmem:[#allocation2 + $0x1] sm:$0x1] %vm387_vm5, %v5699_v63  ;;  %2255 = vmatprep.subr.mxu0 %v5448_v48  ;;  %v5707_v15 = vrot.slane %v1906_v49, %v5118_v5 }
0x17a3   :  { %2256 = vmatpush1.msra.mxu0 %v5451_v3 }
0x17a4   :  { %2257 = vmatprep.subr.mxu0 %v5454_v28  ;;  %1924 = vst.msk [vmem:[#allocation2 + $0x9] sm:$0x1] %vm387_vm5, %v5707_v15 }
0x17a5   :  { %2258 = vmatpush1.msra.mxu0 %v5462_v37 }
0x17a6   :  { %2259 = vmatprep.subr.mxu0 %v5465_v42 }
0x17a7   :  { %2260 = vmatpush1.msra.mxu0 %v5467_v24 }
0x17a8   :  { %2261 = vmatprep.subr.mxu0 %v5469_v45 }
0x17a9   :  { %2262 = vmatpush1.msra.mxu0 %v5475_v39 }
0x17aa   :  { %2263 = vmatprep.subr.mxu0 %v5479_v62 }
0x17ab   :  { %2264 = vmatpush1.msra.mxu0 %v5481_v54 }
0x17ac   :  { %2265 = vmatprep.subr.mxu0 %v5483_v40 }
0x17ad   :  { %2266 = vmatpush1.msra.mxu0 %v5486_v53 }
0x17ae   :  { %2543 = vmatprep.subr.mxu0 %v5436_v17 }
0x185e   :  { %v2009_v33 = vpop.f32.mrf.mxu0 }
0x185f   :  { %v2010_v4 = vadd.f32 %v2009_v33, %v1623_v58 }
0x1860   :  { %v2011_v50 = vpop.f32.mrf.mxu0 }
0x1861   :  { %v2012_v6 = vadd.f32 %v2011_v50, %v1624_v12  ;;  %v4440_v34 = vmul.f32 -1.442695, %v2010_v4 }
0x1863   :  { %4645 = vtanh.f32 %v2012_v6  ;;  %v4441_v12 = vmul.f32 -1.442695, %v2012_v6 }
0x1864   :  { %4647 = vpow2.f32 %v4440_v34 }
0x1870   :  { %v4646_v30 = vpop.eup %4645 }
0x1871   :  { %2029 = vrot.lane.b32.xlu0 %v4646_v30, %s4851_s0  ;;  %v4648_v11 = vpop.eup %4647 }
0x1872   :  { %v2020_v59 = vadd.f32 1.0, %v4648_v11 }
0x1874   :  { %4649 = vrcp.f32 %v2020_v59 }
0x1881   :  { %v4650_v16 = vpop.eup %4649 }
0x1882   :  { %v2027_v58 = vmul.f32 %v4650_v16, %v1891_v60 }
0x18e3   :  { %v2030_v19 = vpop.permute.xlu0 %2029 }
0x18e4   :  { %v2032_v27 = vmul.f32 %v4650_v16, %v2030_v19 }
0x18e6   :  { %2034 = vrot.lane.b32.xlu1 %v2032_v27, %s4851_s0 }
0x1958   :  { %v2035_v47 = vpop.permute.xlu1 %2034 }
0x1959   :  { %v2037_v49 = vadd.f32 %v2035_v47, %v2027_v58 }
0x195b   :  { %4651 = vtanh.f32 %v2037_v49 }
0x195c   :  { %4653 = vpow2.f32 %v4441_v12 }
0x1968   :  { %v4652_v33 = vpop.eup %4651 }
0x1969   :  { %2040 = vrot.lane.b32.xlu0 %v4652_v33, %s4851_s0  ;;  %v4654_v50 = vpop.eup %4653 }
0x196a   :  { %v2021_v4 = vadd.f32 1.0, %v4654_v50 }
0x196c   :  { %4655 = vrcp.f32 %v2021_v4 }
0x1979   :  { %v4656_v30 = vpop.eup %4655 }
0x19db   :  { %v2041_v34 = vpop.permute.xlu0 %2040 }
0x19dc   :  { %v2043_v11 = vmul.f32 %v4656_v30, %v2041_v34 }
0x19de   :  { %v2051_v59 = vrot.slane %v2043_v11, %v5118_v5  ;;  %4442 = vmatmul.mubr.msk.f32.vlgmr.msra.gmra.mxu1 %vm257_vm4, %v2043_v11 }
0x19df   :  { %2398 = vmatpush1.msra.mxu1 %v5438_v18  ;;  %2445 = vmatprep.mubr.f32.mxu1 %v4850_v0 }
0x19e0   :  { %v2052_v60 = vcombine.high %v2051_v59, %v2051_v59  ;;  %v5741_v16 = vrot.slane %v2051_v59, %v5118_v5  ;;  %2399 = vmatprep.subr.mxu1 %v5441_v21 }
0x19e1   :  { %2400 = vmatpush1.msra.mxu1 %v5445_v31 }
0x19e2   :  { %2069 = vst.msk [vmem:[#allocation2 + $0x2] sm:$0x1] %vm387_vm5, %v5741_v16  ;;  %2401 = vmatprep.subr.mxu1 %v5448_v48  ;;  %v5749_v6 = vrot.slane %v2052_v60, %v5118_v5 }
0x19e3   :  { %2402 = vmatpush1.msra.mxu1 %v5451_v3 }
0x19e4   :  { %2403 = vmatprep.subr.mxu1 %v5454_v28  ;;  %2070 = vst.msk [vmem:[#allocation2 + $0xa] sm:$0x1] %vm387_vm5, %v5749_v6 }
0x19e5   :  { %2404 = vmatpush1.msra.mxu1 %v5462_v37 }
0x19e6   :  { %2405 = vmatprep.subr.mxu1 %v5465_v42 }
0x19e7   :  { %2406 = vmatpush1.msra.mxu1 %v5467_v24 }
0x19e8   :  { %2407 = vmatprep.subr.mxu1 %v5469_v45 }
0x19e9   :  { %2408 = vmatpush1.msra.mxu1 %v5475_v39 }
0x19ea   :  { %2409 = vmatprep.subr.mxu1 %v5479_v62 }
0x19eb   :  { %2410 = vmatpush1.msra.mxu1 %v5481_v54 }
0x19ec   :  { %2411 = vmatprep.subr.mxu1 %v5483_v40 }
0x19ed   :  { %2412 = vmatpush1.msra.mxu1 %v5486_v53 }
0x19ee   :  { %2689 = vmatprep.subr.mxu1 %v5436_v17 }
0x1a9e   :  { %v2155_v19 = vpop.f32.mrf.mxu1 }
0x1a9f   :  { %v2156_v27 = vadd.f32 %v2155_v19, %v1641_v44 }
0x1aa0   :  { %v2157_v58 = vpop.f32.mrf.mxu1 }
0x1aa1   :  { %v2158_v47 = vadd.f32 %v2157_v58, %v1642_v25  ;;  %v4443_v12 = vmul.f32 -1.442695, %v2156_v27 }
0x1aa3   :  { %4657 = vtanh.f32 %v2158_v47  ;;  %v4444_v25 = vmul.f32 -1.442695, %v2158_v47 }
0x1aa4   :  { %4659 = vpow2.f32 %v4443_v12 }
0x1ab0   :  { %v4658_v33 = vpop.eup %4657 }
0x1ab1   :  { %2175 = vrot.lane.b32.xlu1 %v4658_v33, %s4851_s0  ;;  %v4660_v17 = vpop.eup %4659 }
0x1ab2   :  { %v2166_v50 = vadd.f32 1.0, %v4660_v17 }
0x1ab4   :  { %4661 = vrcp.f32 %v2166_v50 }
0x1ac1   :  { %v4662_v4 = vpop.eup %4661 }
0x1ac2   :  { %v2173_v44 = vmul.f32 %v4662_v4, %v2037_v49 }
0x1b23   :  { %v2176_v30 = vpop.permute.xlu1 %2175 }
0x1b24   :  { %v2178_v34 = vmul.f32 %v4662_v4, %v2176_v30 }
0x1b26   :  { %2180 = vrot.lane.b32.xlu0 %v2178_v34, %s4851_s0 }
0x1b98   :  { %v2181_v11 = vpop.permute.xlu0 %2180 }
0x1b99   :  { %v2183_v59 = vadd.f32 %v2181_v11, %v2173_v44 }
0x1b9b   :  { %4663 = vtanh.f32 %v2183_v59 }
0x1b9c   :  { %4665 = vpow2.f32 %v4444_v25 }
0x1ba8   :  { %v4664_v60 = vpop.eup %4663 }
0x1ba9   :  { %2186 = vrot.lane.b32.xlu1 %v4664_v60, %s4851_s0  ;;  %v4666_v19 = vpop.eup %4665 }
0x1baa   :  { %v2167_v27 = vadd.f32 1.0, %v4666_v19 }
0x1bac   :  { %4667 = vrcp.f32 %v2167_v27 }
0x1bb9   :  { %v4668_v58 = vpop.eup %4667 }
0x1c1b   :  { %v2187_v33 = vpop.permute.xlu1 %2186 }
0x1c1c   :  { %v2189_v12 = vmul.f32 %v4668_v58, %v2187_v33 }
0x1c1e   :  { %v2197_v17 = vrot.slane %v2189_v12, %v5118_v5  ;;  %4445 = vmatmul.mubr.msk.f32.vlgmr.msra.gmra.mxu0 %vm257_vm4, %v2189_v12 }
0x1c1f   :  { %2544 = vmatpush1.msra.mxu0 %v5438_v18  ;;  %2591 = vmatprep.mubr.f32.mxu0 %v4850_v0 }
0x1c20   :  { %v2198_v49 = vcombine.high %v2197_v17, %v2197_v17  ;;  %v5783_v50 = vrot.slane %v2197_v17, %v5118_v5  ;;  %2545 = vmatprep.subr.mxu0 %v5441_v21 }
0x1c21   :  { %2546 = vmatpush1.msra.mxu0 %v5445_v31 }
0x1c22   :  { %2215 = vst.msk [vmem:[#allocation2 + $0x3] sm:$0x1] %vm387_vm5, %v5783_v50  ;;  %2547 = vmatprep.subr.mxu0 %v5448_v48  ;;  %v5791_v47 = vrot.slane %v2198_v49, %v5118_v5 }
0x1c23   :  { %2548 = vmatpush1.msra.mxu0 %v5451_v3 }
0x1c24   :  { %2549 = vmatprep.subr.mxu0 %v5454_v28  ;;  %2216 = vst.msk [vmem:[#allocation2 + $0xb] sm:$0x1] %vm387_vm5, %v5791_v47 }
0x1c25   :  { %2550 = vmatpush1.msra.mxu0 %v5462_v37 }
0x1c26   :  { %2551 = vmatprep.subr.mxu0 %v5465_v42 }
0x1c27   :  { %2552 = vmatpush1.msra.mxu0 %v5467_v24 }
0x1c28   :  { %2553 = vmatprep.subr.mxu0 %v5469_v45 }
0x1c29   :  { %2554 = vmatpush1.msra.mxu0 %v5475_v39 }
0x1c2a   :  { %2555 = vmatprep.subr.mxu0 %v5479_v62 }
0x1c2b   :  { %2556 = vmatpush1.msra.mxu0 %v5481_v54 }
0x1c2c   :  { %2557 = vmatprep.subr.mxu0 %v5483_v40 }
0x1c2d   :  { %2558 = vmatpush1.msra.mxu0 %v5486_v53 }
0x1cde   :  { %v2301_v4 = vpop.f32.mrf.mxu0 }
0x1cdf   :  { %v2302_v30 = vadd.f32 %v2301_v4, %v1643_v20 }
0x1ce0   :  { %v2303_v34 = vpop.f32.mrf.mxu0 }
0x1ce1   :  { %v2304_v44 = vadd.f32 %v2303_v34, %v1644_v9  ;;  %v4446_v60 = vmul.f32 -1.442695, %v2302_v30 }
0x1ce3   :  { %4669 = vtanh.f32 %v2304_v44  ;;  %v4447_v22 = vmul.f32 -1.442695, %v2304_v44 }
0x1ce4   :  { %4671 = vpow2.f32 %v4446_v60 }
0x1cf0   :  { %v4670_v11 = vpop.eup %4669 }
0x1cf1   :  { %2321 = vrot.lane.b32.xlu0 %v4670_v11, %s4851_s0  ;;  %v4672_v25 = vpop.eup %4671 }
0x1cf2   :  { %v2312_v19 = vadd.f32 1.0, %v4672_v25 }
0x1cf4   :  { %4673 = vrcp.f32 %v2312_v19 }
0x1d01   :  { %v4674_v27 = vpop.eup %4673 }
0x1d02   :  { %v2319_v46 = vmul.f32 %v4674_v27, %v2183_v59 }
0x1d63   :  { %v2322_v58 = vpop.permute.xlu0 %2321 }
0x1d64   :  { %v2324_v10 = vmul.f32 %v4674_v27, %v2322_v58  ;;  %v6563_v58 = vsel %vm4986_vm1, %v5551_v55, %v5538_v57 }
0x1d66   :  { %2326 = vrot.lane.b32.xlu1 %v2324_v10, %s4851_s0 }
0x1dd8   :  { %v2327_v20 = vpop.permute.xlu1 %2326 }
0x1dd9   :  { %v2329_v33 = vadd.f32 %v2327_v20, %v2319_v46  ;;  %v6564_v20 = vsel %vm4990_vm3, %v5571_v14, %v5554_v61 }
0x1ddb   :  { %4675 = vtanh.f32 %v2329_v33 }
0x1ddc   :  { %4677 = vpow2.f32 %v4447_v22 }
0x1de8   :  { %v4676_v8 = vpop.eup %4675 }
0x1de9   :  { %2332 = vrot.lane.b32.xlu0 %v4676_v8, %s4851_s0  ;;  %v4678_v9 = vpop.eup %4677 }
0x1dea   :  { %v2313_v12 = vadd.f32 1.0, %v4678_v9 }
0x1dec   :  { %4679 = vrcp.f32 %v2313_v12 }
0x1df9   :  { %v4680_v17 = vpop.eup %4679 }
0x1e5b   :  { %v2333_v49 = vpop.permute.xlu0 %2332 }
0x1e5c   :  { %v2335_v4 = vmul.f32 %v4680_v17, %v2333_v49 }
0x1e5e   :  { %v2343_v30 = vrot.slane %v2335_v4, %v5118_v5  ;;  %4448 = vmatmul.mubr.msk.f32.vlgmr.msra.gmra.mxu1 %vm257_vm4, %v2335_v4 }
0x1e5f   :  { %2690 = vmatpush1.msra.mxu1 %v5438_v18  ;;  %2737 = vmatprep.mubr.f32.mxu1 %v4850_v0 }
0x1e60   :  { %v2344_v59 = vcombine.high %v2343_v30, %v2343_v30  ;;  %v5824_v34 = vrot.slane %v2343_v30, %v5118_v5  ;;  %2691 = vmatprep.subr.mxu1 %v5441_v21 }
0x1e61   :  { %2692 = vmatpush1.msra.mxu1 %v5445_v31 }
0x1e62   :  { %2361 = vst.msk [vmem:[#allocation2 + $0x4] sm:$0x1] %vm387_vm5, %v5824_v34  ;;  %2693 = vmatprep.subr.mxu1 %v5448_v48  ;;  %v5832_v44 = vrot.slane %v2344_v59, %v5118_v5 }
0x1e63   :  { %2694 = vmatpush1.msra.mxu1 %v5451_v3 }
0x1e64   :  { %2695 = vmatprep.subr.mxu1 %v5454_v28  ;;  %2362 = vst.msk [vmem:[#allocation2 + $0xc] sm:$0x1] %vm387_vm5, %v5832_v44 }
0x1e65   :  { %2696 = vmatpush1.msra.mxu1 %v5462_v37 }
0x1e66   :  { %2697 = vmatprep.subr.mxu1 %v5465_v42 }
0x1e67   :  { %2698 = vmatpush1.msra.mxu1 %v5467_v24 }
0x1e68   :  { %2699 = vmatprep.subr.mxu1 %v5469_v45 }
0x1e69   :  { %2700 = vmatpush1.msra.mxu1 %v5475_v39 }
0x1e6a   :  { %2701 = vmatprep.subr.mxu1 %v5479_v62 }
0x1e6b   :  { %2702 = vmatpush1.msra.mxu1 %v5481_v54 }
0x1e6c   :  { %2703 = vmatprep.subr.mxu1 %v5483_v40 }
0x1e6d   :  { %2704 = vmatpush1.msra.mxu1 %v5486_v53 }
0x1f1e   :  { %v2447_v18 = vpop.f32.mrf.mxu1 }
0x1f1f   :  { %v2448_v21 = vadd.f32 %v2447_v18, %v1645_v56 }
0x1f20   :  { %v2449_v31 = vpop.f32.mrf.mxu1 }
0x1f21   :  { %v2450_v48 = vadd.f32 %v2449_v31, %v1646_v7  ;;  %v4449_v28 = vmul.f32 -1.442695, %v2448_v21 }
0x1f23   :  { %4681 = vtanh.f32 %v2450_v48  ;;  %v4450_v43 = vmul.f32 -1.442695, %v2450_v48 }
0x1f24   :  { %4683 = vpow2.f32 %v4449_v28 }
0x1f30   :  { %v4682_v3 = vpop.eup %4681 }
0x1f31   :  { %2467 = vrot.lane.b32.xlu1 %v4682_v3, %s4851_s0  ;;  %v4684_v37 = vpop.eup %4683 }
0x1f32   :  { %v2458_v42 = vadd.f32 1.0, %v4684_v37 }
0x1f34   :  { %4685 = vrcp.f32 %v2458_v42 }
0x1f41   :  { %v4686_v24 = vpop.eup %4685 }
0x1f42   :  { %v2465_v62 = vmul.f32 %v4686_v24, %v2329_v33 }
0x1fa3   :  { %v2468_v45 = vpop.permute.xlu1 %2467 }
0x1fa4   :  { %v2470_v39 = vmul.f32 %v4686_v24, %v2468_v45  ;;  %v6565_v45 = vsel %vm4986_vm1, %v5544_v41, %v5541_v32  ;;  %v1782_v41 = vrot.slane %v5657_v13, %v4977_v26  ;;  %v2078_v13 = vrot.slane %v5749_v6, %v4977_v26 }
0x1fa6   :  { %2472 = vrot.lane.b32.xlu0 %v2470_v39, %s4851_s0 }
0x2018   :  { %v2473_v54 = vpop.permute.xlu0 %2472 }
0x2019   :  { %v2475_v40 = vadd.f32 %v2473_v54, %v2465_v62  ;;  %v6566_v54 = vsel %vm4990_vm3, %v5560_v51, %v5557_v2  ;;  %v2074_v2 = vrot.slane %v5741_v16, %v4977_v26  ;;  %v2366_v51 = vrot.slane %v5824_v34, %v4977_v26 }
0x201a   :  { %v2370_v16 = vrot.slane %v5832_v44, %v4977_v26 }
0x201b   :  { %4687 = vtanh.f32 %v2475_v40 }
0x201c   :  { %4689 = vpow2.f32 %v4450_v43 }
0x2028   :  { %v4688_v53 = vpop.eup %4687 }
0x2029   :  { %2478 = vrot.lane.b32.xlu1 %v4688_v53, %s4851_s0  ;;  %v4690_v52 = vpop.eup %4689 }
0x202a   :  { %v2459_v35 = vadd.f32 1.0, %v4690_v52 }
0x202c   :  { %4691 = vrcp.f32 %v2459_v35 }
0x2039   :  { %v4692_v1 = vpop.eup %4691 }
0x209b   :  { %v2479_v56 = vpop.permute.xlu1 %2478 }
0x209c   :  { %v2481_v7 = vmul.f32 %v4692_v1, %v2479_v56 }
0x209e   :  { %v2489_v11 = vrot.slane %v2481_v7, %v5118_v5  ;;  %4451 = vmatmul.mubr.msk.f32.vlgmr.msra.gmra.mxu0 %vm257_vm4, %v2481_v7 }
0x209f   :  { %2946 = vmatprep.mubr.f32.mxu0 %v4850_v0 }
0x20a0   :  { %v2490_v60 = vcombine.high %v2489_v11, %v2489_v11  ;;  %v5864_v25 = vrot.slane %v2489_v11, %v5118_v5  ;;  %v1786_v11 = vrot.slane %v5665_v23, %v4977_v26 }
0x20a2   :  { %2507 = vst.msk [vmem:[#allocation2 + $0x5] sm:$0x1] %vm387_vm5, %v5864_v25  ;;  %v5869_v19 = vrot.slane %v2490_v60, %v5118_v5 }
0x20a4   :  { %2508 = vst.msk [vmem:[#allocation2 + $0xd] sm:$0x1] %vm387_vm5, %v5869_v19 }
0x215e   :  { %v2593_v27 = vpop.f32.mrf.mxu0 }
0x215f   :  { %v2594_v10 = vadd.f32 %v2593_v27, %v6563_v58 }
0x2160   :  { %v2595_v46 = vpop.f32.mrf.mxu0 }
0x2161   :  { %v2596_v33 = vadd.f32 %v2595_v46, %v6564_v20  ;;  %v4452_v22 = vmul.f32 -1.442695, %v2594_v10  ;;  %v1928_v20 = vrot.slane %v5699_v63, %v4977_v26  ;;  %v1932_v63 = vrot.slane %v5707_v15, %v4977_v26 }
0x2163   :  { %4693 = vtanh.f32 %v2596_v33  ;;  %v4453_v14 = vmul.f32 -1.442695, %v2596_v33 }
0x2164   :  { %4695 = vpow2.f32 %v4452_v22 }
0x2170   :  { %v4694_v8 = vpop.eup %4693 }
0x2171   :  { %2613 = vrot.lane.b32.xlu0 %v4694_v8, %s4851_s0  ;;  %v4696_v9 = vpop.eup %4695  ;;  %v2220_v8 = vrot.slane %v5783_v50, %v4977_v26  ;;  %v2224_v50 = vrot.slane %v5791_v47, %v4977_v26 }
0x2172   :  { %v2604_v12 = vadd.f32 1.0, %v4696_v9  ;;  %v2512_v9 = vrot.slane %v5864_v25, %v4977_v26  ;;  %v2516_v25 = vrot.slane %v5869_v19, %v4977_v26 }
0x2174   :  { %4697 = vrcp.f32 %v2604_v12 }
0x2181   :  { %v4698_v17 = vpop.eup %4697 }
0x2182   :  { %v2611_v55 = vmul.f32 %v4698_v17, %v2475_v40 }
0x21e3   :  { %v2614_v49 = vpop.permute.xlu0 %2613 }
0x21e4   :  { %v2616_v57 = vmul.f32 %v4698_v17, %v2614_v49 }
0x21e6   :  { %2618 = vrot.lane.b32.xlu1 %v2616_v57, %s4851_s0 }
0x2258   :  { %v2619_v4 = vpop.permute.xlu1 %2618 }
0x2259   :  { %v2621_v30 = vadd.f32 %v2619_v4, %v2611_v55 }
0x225b   :  { %4699 = vtanh.f32 %v2621_v30 }
0x225c   :  { %4701 = vpow2.f32 %v4453_v14 }
0x2268   :  { %v4700_v61 = vpop.eup %4699 }
0x2269   :  { %2624 = vrot.lane.b32.xlu0 %v4700_v61, %s4851_s0  ;;  %v4702_v59 = vpop.eup %4701 }
0x226a   :  { %v2605_v18 = vadd.f32 1.0, %v4702_v59 }
0x226c   :  { %4703 = vrcp.f32 %v2605_v18 }
0x2279   :  { %v4704_v21 = vpop.eup %4703 }
0x22db   :  { %v2625_v31 = vpop.permute.xlu0 %2624 }
0x22dc   :  { %v2627_v48 = vmul.f32 %v4704_v21, %v2625_v31  ;;  %v2846_v31 = vld [vmem:[#allocation4 + $0x238] sm:$0xff] }
0x22dd   :  { %2898 = vmatprep.subr.mxu0 %v2846_v31 }
0x22de   :  { %v2635_v3 = vrot.slane %v2627_v48, %v5118_v5  ;;  %4454 = vmatmul.mubr.msk.f32.vlgmr.msra.gmra.mxu1 %vm257_vm4, %v2627_v48  ;;  %v2845_v48 = vld [vmem:[#allocation4 + $0x230] sm:$0xff] }
0x22df   :  { %3103 = vmatprep.mubr.f32.mxu1 %v4850_v0  ;;  %2899 = vmatpush1.msra.mxu0 %v2845_v48 }
0x22e0   :  { %v2636_v28 = vcombine.high %v2635_v3, %v2635_v3  ;;  %v2643_v37 = vrot.slane %v2635_v3, %v5118_v5  ;;  %v2844_v3 = vld [vmem:[#allocation4 + $0x228] sm:$0xff] }
0x22e1   :  { %2900 = vmatprep.subr.mxu0 %v2844_v3 }
0x22e2   :  { %2653 = vst.msk [vmem:[#allocation2 + $0x6] sm:$0x1] %vm387_vm5, %v2643_v37  ;;  %v2650_v42 = vrot.slane %v2636_v28, %v5118_v5  ;;  %v2658_v7 = vrot.slane %v2643_v37, %v4977_v26  ;;  %v2843_v28 = vld [vmem:[#allocation4 + $0x220] sm:$0xff]  ;;  %v2842_v37 = vld [vmem:[#allocation4 + $0x218] sm:$0xff] }
0x22e3   :  { %2901 = vmatpush1.msra.mxu0 %v2843_v28 }
0x22e4   :  { %2654 = vst.msk [vmem:[#allocation2 + $0xe] sm:$0x1] %vm387_vm5, %v2650_v42  ;;  %v2662_v34 = vrot.slane %v2650_v42, %v4977_v26  ;;  %2902 = vmatprep.subr.mxu0 %v2842_v37 }
0x239e   :  { %v2739_v24 = vpop.f32.mrf.mxu1 }
0x239f   :  { %v2740_v39 = vadd.f32 %v2739_v24, %v6565_v45  ;;  %v2841_v24 = vld [vmem:[#allocation4 + $0x210] sm:$0xff]  ;;  %v5964_v45 = vld [vmem:[#allocation4 + $0x2b8] sm:$0xff] }
0x23a0   :  { %v2741_v62 = vpop.f32.mrf.mxu1  ;;  %3055 = vmatprep.subr.mxu1 %v5964_v45  ;;  %2903 = vmatpush1.msra.mxu0 %v2841_v24 }
0x23a1   :  { %v2742_v40 = vadd.f32 %v2741_v62, %v6566_v54  ;;  %v4455_v43 = vmul.f32 -1.442695, %v2740_v39  ;;  %v5966_v39 = vld [vmem:[#allocation4 + $0x2b0] sm:$0xff]  ;;  %v2840_v54 = vld [vmem:[#allocation4 + $0x208] sm:$0xff] }
0x23a2   :  { %3056 = vmatpush1.msra.mxu1 %v5966_v39  ;;  %2904 = vmatprep.subr.mxu0 %v2840_v54 }
0x23a3   :  { %4705 = vtanh.f32 %v2742_v40  ;;  %v4456_v49 = vmul.f32 -1.442695, %v2742_v40  ;;  %v5969_v40 = vld [vmem:[#allocation4 + $0x2a8] sm:$0xff] }
0x23a4   :  { %4707 = vpow2.f32 %v4455_v43  ;;  %v5973_v43 = vld [vmem:[#allocation4 + $0x2a0] sm:$0xff]  ;;  %3057 = vmatprep.subr.mxu1 %v5969_v40 }
0x23a5   :  { %3058 = vmatpush1.msra.mxu1 %v5973_v43 }
0x23b0   :  { %v4706_v53 = vpop.eup %4705 }
0x23b1   :  { %2759 = vrot.lane.b32.xlu1 %v4706_v53, %s4851_s0  ;;  %v4708_v52 = vpop.eup %4707  ;;  %v2839_v53 = vld [vmem:[#allocation4 + $0x200] sm:$0xff] }
0x23b2   :  { %v2750_v35 = vadd.f32 1.0, %v4708_v52  ;;  %v2838_v52 = vld [vmem:[#allocation4 + $0x1f8] sm:$0xff]  ;;  %2905 = vmatpush1.msra.mxu0 %v2839_v53 }
0x23b3   :  { %2906 = vmatprep.subr.mxu0 %v2838_v52 }
0x23b4   :  { %4709 = vrcp.f32 %v2750_v35  ;;  %v5976_v35 = vld [vmem:[#allocation4 + $0x298] sm:$0xff] }
0x23b5   :  { %3059 = vmatprep.subr.mxu1 %v5976_v35 }
0x23c1   :  { %v4710_v1 = vpop.eup %4709 }
0x23c2   :  { %v2757_v60 = vmul.f32 %v4710_v1, %v2621_v30 }
0x2423   :  { %v2760_v56 = vpop.permute.xlu1 %2759 }
0x2424   :  { %v2762_v32 = vmul.f32 %v4710_v1, %v2760_v56  ;;  %v2837_v1 = vld [vmem:[#allocation4 + $0x1f0] sm:$0xff] }
0x2425   :  { %v5979_v56 = vld [vmem:[#allocation4 + $0x290] sm:$0xff]  ;;  %2907 = vmatpush1.msra.mxu0 %v2837_v1 }
0x2426   :  { %2764 = vrot.lane.b32.xlu0 %v2762_v32, %s4851_s0  ;;  %3060 = vmatpush1.msra.mxu1 %v5979_v56 }
0x242a   :  { %1787 = vrot.lane.b32.xlu0 %v1782_v41, %s4853_s22  ;;  %v2836_v41 = vld [vmem:[#allocation4 + $0x1e8] sm:$0xff] }
0x242b   :  { %2908 = vmatprep.subr.mxu0 %v2836_v41 }
0x242e   :  { %2079 = vrot.lane.b32.xlu0 %v2074_v2, %s4853_s22  ;;  %v5982_v2 = vld [vmem:[#allocation4 + $0x288] sm:$0xff] }
0x242f   :  { %3061 = vmatprep.subr.mxu1 %v5982_v2 }
0x2432   :  { %2371 = vrot.lane.b32.xlu0 %v2366_v51, %s4853_s22  ;;  %v2835_v51 = vld [vmem:[#allocation4 + $0x1e0] sm:$0xff] }
0x2433   :  { %2909 = vmatpush1.msra.mxu0 %v2835_v51 }
0x2436   :  { %2663 = vrot.lane.b32.xlu0 %v2658_v7, %s4853_s22  ;;  %v2834_v7 = vld [vmem:[#allocation4 + $0x1d8] sm:$0xff] }
0x2437   :  { %2910 = vmatprep.subr.mxu0 %v2834_v7 }
0x243a   :  { %1789 = vrot.lane.b32.xlu0 %v1786_v11, %s4853_s22  ;;  %v2833_v11 = vld [vmem:[#allocation4 + $0x1d0] sm:$0xff] }
0x243b   :  { %2911 = vmatpush1.msra.mxu0 %v2833_v11 }
0x243e   :  { %2081 = vrot.lane.b32.xlu0 %v2078_v13, %s4853_s22 }
0x2442   :  { %2373 = vrot.lane.b32.xlu0 %v2370_v16, %s4853_s22  ;;  %v2832_v16 = vld [vmem:[#allocation4 + $0x1c8] sm:$0xff] }
0x2443   :  { %2912 = vmatprep.subr.mxu0 %v2832_v16 }
0x2446   :  { %2665 = vrot.lane.b32.xlu0 %v2662_v34, %s4853_s22 }
0x2498   :  { %v2765_v27 = vpop.permute.xlu0 %2764 }
0x2499   :  { %v2767_v58 = vadd.f32 %v2765_v27, %v2757_v60  ;;  %v2831_v60 = vld [vmem:[#allocation4 + $0x1c0] sm:$0xff] }
0x249a   :  { %v5990_v27 = vld [vmem:[#allocation4 + $0x280] sm:$0xff]  ;;  %2913 = vmatpush1.msra.mxu0 %v2831_v60 }
0x249b   :  { %4711 = vtanh.f32 %v2767_v58  ;;  %3062 = vmatpush1.msra.mxu1 %v5990_v27  ;;  %v5993_v58 = vld [vmem:[#allocation4 + $0x278] sm:$0xff]  ;;  %3201 = vmatprep.subr.mxu0 %v5964_v45 }
0x249c   :  { %v1788_v23 = vpop.permute.xlu0 %1787  ;;  %4713 = vpow2.f32 %v4456_v49  ;;  %3063 = vmatprep.subr.mxu1 %v5993_v58 }
0x249d   :  { %1793 = vst.msk [vmem:[#allocation3 + $0x7] sm:$0x1] %vm387_vm5, %v1788_v23  ;;  %v5995_v23 = vld [vmem:[#allocation4 + $0x270] sm:$0xff] }
0x249e   :  { %3064 = vmatpush1.msra.mxu1 %v5995_v23 }
0x24a0   :  { %v2080_v10 = vpop.permute.xlu0 %2079 }
0x24a1   :  { %2085 = vst.msk [vmem:[#allocation3 + $0x5] sm:$0x1] %vm387_vm5, %v2080_v10  ;;  %v5997_v10 = vld [vmem:[#allocation4 + $0x268] sm:$0xff] }
0x24a2   :  { %3065 = vmatprep.subr.mxu1 %v5997_v10 }
0x24a4   :  { %v2372_v6 = vpop.permute.xlu0 %2371 }
0x24a5   :  { %2377 = vst.msk [vmem:[#allocation3 + $0x3] sm:$0x1] %vm387_vm5, %v2372_v6 }
0x24a8   :  { %v4712_v44 = vpop.eup %4711  ;;  %v2664_v46 = vpop.permute.xlu0 %2663 }
0x24a9   :  { %2669 = vst.msk [vmem:[#allocation3 + $0x1] sm:$0x1] %vm387_vm5, %v2664_v46  ;;  %2770 = vrot.lane.b32.xlu1 %v4712_v44, %s4851_s0  ;;  %v4714_v57 = vpop.eup %4713  ;;  %v6003_v44 = vld [vmem:[#allocation4 + $0x260] sm:$0xff]  ;;  %v6007_v46 = vld [vmem:[#allocation4 + $0x258] sm:$0xff] }
0x24aa   :  { %v2751_v55 = vadd.f32 1.0, %v4714_v57  ;;  %3066 = vmatpush1.msra.mxu1 %v6003_v44 }
0x24ab   :  { %3067 = vmatprep.subr.mxu1 %v6007_v46 }
0x24ac   :  { %v1790_v33 = vpop.permute.xlu0 %1789  ;;  %4715 = vrcp.f32 %v2751_v55  ;;  %v2864_v55 = vld [vmem:[#allocation4 + $0x2c0] ss:$8 sm:$0x3] }
0x24ad   :  { %1794 = vst.msk [vmem:[#allocation3 + $0xf] sm:$0x1] %vm387_vm5, %v1790_v33  ;;  %1933 = vrot.lane.b32.xlu1 %v1928_v20, %s4853_s22  ;;  %v6009_v20 = vld [vmem:[#allocation4 + $0x250] sm:$0xff]  ;;  %v6011_v33 = vld [vmem:[#allocation4 + $0x248] sm:$0xff] }
0x24ae   :  { %3068 = vmatpush1.msra.mxu1 %v6009_v20 }
0x24af   :  { %3069 = vmatprep.subr.mxu1 %v6011_v33 }
0x24b0   :  { %v2082_v22 = vpop.permute.xlu0 %2081 }
0x24b1   :  { %2086 = vst.msk [vmem:[#allocation3 + $0xd] sm:$0x1] %vm387_vm5, %v2082_v22  ;;  %2225 = vrot.lane.b32.xlu1 %v2220_v8, %s4853_s22  ;;  %v6014_v8 = vld [vmem:[#allocation4 + $0x240] sm:$0xff] }
0x24b2   :  { %3070 = vmatpush1.msra.mxu1 %v6014_v8 }
0x24b3   :  { %3104 = vmatmul.mubr.f32.vlgmr.msra.gmra.mxu1 %v4850_v0  ;;  %3347 = vmatprep.subr.mxu1 %v5964_v45 }
0x24b4   :  { %v2374_v12 = vpop.permute.xlu0 %2373  ;;  %3348 = vmatpush1.msra.mxu1 %v5966_v39  ;;  %3395 = vmatprep.mubr.f32.mxu1 %v4850_v0 }
0x24b5   :  { %2378 = vst.msk [vmem:[#allocation3 + $0xb] sm:$0x1] %vm387_vm5, %v2374_v12  ;;  %2517 = vrot.lane.b32.xlu1 %v2512_v9, %s4853_s22  ;;  %3349 = vmatprep.subr.mxu1 %v5969_v40 }
0x24b6   :  { %3350 = vmatpush1.msra.mxu1 %v5973_v43 }
0x24b7   :  { %3351 = vmatprep.subr.mxu1 %v5976_v35 }
0x24b8   :  { %v2666_v17 = vpop.permute.xlu0 %2665  ;;  %3352 = vmatpush1.msra.mxu1 %v5979_v56 }
0x24b9   :  { %2670 = vst.msk [vmem:[#allocation3 + $0x9] sm:$0x1] %vm387_vm5, %v2666_v17  ;;  %1935 = vrot.lane.b32.xlu1 %v1932_v63, %s4853_s22  ;;  %v4716_v15 = vpop.eup %4715  ;;  %3353 = vmatprep.subr.mxu1 %v5982_v2 }
0x24ba   :  { %3354 = vmatpush1.msra.mxu1 %v5990_v27 }
0x24bb   :  { %3355 = vmatprep.subr.mxu1 %v5993_v58 }
0x24bc   :  { %3356 = vmatpush1.msra.mxu1 %v5995_v23 }
0x24bd   :  { %2227 = vrot.lane.b32.xlu1 %v2224_v50, %s4853_s22  ;;  %3357 = vmatprep.subr.mxu1 %v5997_v10 }
0x24be   :  { %3358 = vmatpush1.msra.mxu1 %v6003_v44 }
0x24bf   :  { %3359 = vmatprep.subr.mxu1 %v6007_v46 }
0x24c0   :  { %3360 = vmatpush1.msra.mxu1 %v6009_v20 }
0x24c1   :  { %2519 = vrot.lane.b32.xlu1 %v2516_v25, %s4853_s22  ;;  %3361 = vmatprep.subr.mxu1 %v6011_v33 }
0x24c2   :  { %3362 = vmatpush1.msra.mxu1 %v6014_v8 }
0x24c3   :  { %3639 = vmatprep.subr.mxu1 %v5964_v45 }
0x251b   :  { %v2771_v4 = vpop.permute.xlu1 %2770 }
0x251c   :  { %v2773_v30 = vmul.f32 %v4716_v15, %v2771_v4  ;;  %v2869_v15 = vrot.slane %v2864_v55, %v4977_v26  ;;  %v2873_v4 = vrot.slane %v2864_v55, %v4980_v29 }
0x251e   :  { %v2781_v61 = vrot.slane %v2773_v30, %v5118_v5 }
0x251f   :  { %v1934_v14 = vpop.permute.xlu1 %1933 }
0x2520   :  { %v2782_v59 = vcombine.high %v2781_v61, %v2781_v61  ;;  %v2789_v47 = vrot.slane %v2781_v61, %v5118_v5  ;;  %1939 = vst.msk [vmem:[#allocation3 + $0x6] sm:$0x1] %vm387_vm5, %v1934_v14 }
0x2522   :  { %2799 = vst.msk [vmem:[#allocation2 + $0x7] sm:$0x1] %vm387_vm5, %v2789_v47  ;;  %v2804_v19 = vrot.slane %v2789_v47, %v4977_v26  ;;  %v2796_v18 = vrot.slane %v2782_v59, %v5118_v5 }
0x2523   :  { %v2226_v21 = vpop.permute.xlu1 %2225 }
0x2524   :  { %2231 = vst.msk [vmem:[#allocation3 + $0x4] sm:$0x1] %vm387_vm5, %v2226_v21  ;;  %2809 = vrot.lane.b32.xlu1 %v2804_v19, %s4853_s22  ;;  %2800 = vst.msk [vmem:[#allocation2 + $0xf] sm:$0x1] %vm387_vm5, %v2796_v18  ;;  %v2808_v42 = vrot.slane %v2796_v18, %v4977_v26 }
0x2527   :  { %v2518_v62 = vpop.permute.xlu1 %2517 }
0x2528   :  { %2523 = vst.msk [vmem:[#allocation3 + $0x2] sm:$0x1] %vm387_vm5, %v2518_v62  ;;  %2811 = vrot.lane.b32.xlu1 %v2808_v42, %s4853_s22 }
0x2529   :  { %v2817_v63 = vld [vmem:[#allocation2] sm:$0xff] }
0x252b   :  { %v1936_v32 = vpop.permute.xlu1 %1935  ;;  %v2818_v49 = vld [vmem:[#allocation2 + $0x8] sm:$0xff] }
0x252c   :  { %1940 = vst.msk [vmem:[#allocation3 + $0xe] sm:$0x1] %vm387_vm5, %v1936_v32 }
0x252f   :  { %v2228_v13 = vpop.permute.xlu1 %2227 }
0x2530   :  { %2232 = vst.msk [vmem:[#allocation3 + $0xc] sm:$0x1] %vm387_vm5, %v2228_v13 }
0x2533   :  { %v2520_v34 = vpop.permute.xlu1 %2519 }
0x2534   :  { %2524 = vst.msk [vmem:[#allocation3 + $0xa] sm:$0x1] %vm387_vm5, %v2520_v34 }
0x2573   :  { %v3105_v32 = vpop.f32.mrf.mxu1 }
0x2596   :  { %v2810_v6 = vpop.permute.xlu1 %2809 }
0x2597   :  { %2815 = vst.msk [vmem:[#allocation3] sm:$0x1] %vm387_vm5, %v2810_v6 }
0x259a   :  { %v2812_v22 = vpop.permute.xlu1 %2811 }
0x259b   :  { %2816 = vst.msk [vmem:[#allocation3 + $0x8] sm:$0x1] %vm387_vm5, %v2812_v22 }
0x259e   :  { %v2819_v9 = vld [vmem:[#allocation3] sm:$0xff] }
0x259f   :  { %2823 = vrot.lane.b32.xlu0 %v2819_v9, %s4854_s23 }
0x25a2   :  { %v2820_v12 = vld [vmem:[#allocation3 + $0x8] sm:$0xff] }
0x25a3   :  { %2825 = vrot.lane.b32.xlu1 %v2820_v12, %s4854_s23 }
0x2611   :  { %v2824_v17 = vpop.permute.xlu0 %2823 }
0x2612   :  { %v2829_v50 = vsel %vm1440_vm6, %v2817_v63, %v2824_v17 }
0x2613   :  { %4457 = vmatmul.mubr.msk.f32.vlgmr.msra.gmra.mxu0 %vm257_vm4, %v2829_v50 }
0x2614   :  { %2952 = vmatprep.mubr.f32.mxu0 %v4850_v0  ;;  %3202 = vmatpush1.msra.mxu0 %v5966_v39 }
0x2615   :  { %v2826_v25 = vpop.permute.xlu1 %2825  ;;  %3203 = vmatprep.subr.mxu0 %v5969_v40 }
0x2616   :  { %v2830_v57 = vsel %vm1440_vm6, %v2818_v49, %v2826_v25  ;;  %3204 = vmatpush1.msra.mxu0 %v5973_v43 }
0x2617   :  { %4458 = vmatmul.mubr.msk.f32.gmra.mxu0 %vm257_vm4, %v2830_v57  ;;  %3205 = vmatprep.subr.mxu0 %v5976_v35  ;;  %v3107_v57 = vpop.f32.mrf.mxu1 }
0x2618   :  { %3206 = vmatpush1.msra.mxu0 %v5979_v56  ;;  %3249 = vmatprep.mubr.f32.mxu0 %v4850_v0 }
0x2619   :  { %3207 = vmatprep.subr.mxu0 %v5982_v2 }
0x261a   :  { %3208 = vmatpush1.msra.mxu0 %v5990_v27 }
0x261b   :  { %3209 = vmatprep.subr.mxu0 %v5993_v58 }
0x261c   :  { %3210 = vmatpush1.msra.mxu0 %v5995_v23 }
0x261d   :  { %3211 = vmatprep.subr.mxu0 %v5997_v10 }
0x261e   :  { %3212 = vmatpush1.msra.mxu0 %v6003_v44 }
0x261f   :  { %3213 = vmatprep.subr.mxu0 %v6007_v46 }
0x2620   :  { %3214 = vmatpush1.msra.mxu0 %v6009_v20 }
0x2621   :  { %3215 = vmatprep.subr.mxu0 %v6011_v33 }
0x2622   :  { %3216 = vmatpush1.msra.mxu0 %v6014_v8 }
0x2623   :  { %3493 = vmatprep.subr.mxu0 %v5964_v45 }
0x26d3   :  { %v2948_v30 = vpop.f32.mrf.mxu0 }
0x26d4   :  { %v2949_v61 = vadd.f32 %v2948_v30, %v2869_v15 }
0x26d5   :  { %v2950_v14 = vpop.f32.mrf.mxu0 }
0x26d6   :  { %v2951_v59 = vadd.f32 %v2950_v14, %v2873_v4  ;;  %v2969_v19 = vrot.slane %v2949_v61, 7  ;;  %v2979_v18 = vrot.slane %v2949_v61, 1  ;;  %v2985_v21 = vrot.slane %v2949_v61, 6 }
0x26d7   :  { %v2954_v47 = vpop.f32.mrf.mxu0  ;;  %v2995_v48 = vrot.slane %v2949_v61, 2  ;;  %v3003_v3 = vrot.slane %v2949_v61, 5  ;;  %v3013_v28 = vrot.slane %v2949_v61, 3  ;;  %v3021_v54 = vrot.slane %v2949_v61, 4 }
0x26d8   :  { %v2955_v31 = vadd.f32 %v2954_v47, %v2869_v15  ;;  %v2972_v42 = vrot.slane %v2951_v59, 7  ;;  %v2981_v24 = vrot.slane %v2951_v59, 1  ;;  %v2988_v62 = vrot.slane %v2951_v59, 6 }
0x26d9   :  { %v2956_v37 = vpop.f32.mrf.mxu0  ;;  %v2998_v25 = vrot.slane %v2951_v59, 2  ;;  %v3006_v47 = vrot.slane %v2951_v59, 5 }
0x26da   :  { %v2957_v53 = vadd.f32 %v2956_v37, %v2873_v4  ;;  %v2963_v52 = vrot.slane %v2955_v31, 7  ;;  %v2970_v29 = vrot.slane %v2955_v31, 6  ;;  %v6066_v1 = vsel %vm181_vm2, %v2955_v31, %v2979_v18 }
0x26db   :  { %v2986_v41 = vrot.slane %v2955_v31, 5  ;;  %v2996_v51 = vrot.slane %v2955_v31, 1  ;;  %v3004_v7 = vrot.slane %v2955_v31, 4  ;;  %v3014_v11 = vrot.slane %v2955_v31, 2 }
0x26dc   :  { %v6069_v13 = vsel %vm181_vm2, %v2963_v52, %v2949_v61  ;;  %v6072_v16 = vsel %vm181_vm2, %v2970_v29, %v2969_v19  ;;  %v2965_v34 = vrot.slane %v2957_v53, 7  ;;  %v2973_v60 = vrot.slane %v2957_v53, 6 }
0x26dd   :  { %v2977_v6 = vsel %vm4986_vm1, %v6069_v13, %v6072_v16  ;;  %v6079_v22 = vsel %vm181_vm2, %v2986_v41, %v2985_v21  ;;  %v6082_v9 = vsel %vm181_vm2, %v2957_v53, %v2981_v24  ;;  %v2989_v12 = vrot.slane %v2957_v53, 5 }
0x26de   :  { %v6085_v63 = vsel %vm181_vm2, %v2965_v34, %v2951_v59  ;;  %v6088_v17 = vsel %vm181_vm2, %v2973_v60, %v2972_v42  ;;  %v2993_v50 = vsel %vm4986_vm1, %v6066_v1, %v6079_v22  ;;  %v6102_v15 = vsel %vm181_vm2, %v2996_v51, %v2995_v48 }
0x26df   :  { %v2978_v49 = vsel %vm4990_vm3, %v6085_v63, %v6088_v17  ;;  %v6099_v55 = vsel %vm181_vm2, %v2989_v12, %v2988_v62  ;;  %v6105_v4 = vsel %vm181_vm2, %v3004_v7, %v3003_v3  ;;  %v2999_v19 = vrot.slane %v2957_v53, 1 }
0x26e0   :  { %v3108_v30 = vadd.f32 %v3107_v57, %v2978_v49  ;;  %v2994_v61 = vsel %vm4990_vm3, %v6082_v9, %v6099_v55  ;;  %v3011_v14 = vsel %vm4986_vm1, %v6102_v15, %v6105_v4  ;;  %v3007_v18 = vrot.slane %v2957_v53, 4 }
0x26e1   :  { %v6116_v21 = vsel %vm181_vm2, %v3014_v11, %v3013_v28  ;;  %v3022_v48 = vrot.slane %v2955_v31, 3  ;;  %v3016_v3 = vrot.slane %v2951_v59, 3  ;;  %v3017_v37 = vrot.slane %v2957_v53, 2 }
0x26e2   :  { %v3024_v42 = vrot.slane %v2951_v59, 4  ;;  %v3025_v24 = vrot.slane %v2957_v53, 3  ;;  %4717 = vtanh.f32 %v3108_v30  ;;  %v6119_v62 = vsel %vm181_vm2, %v2999_v19, %v2998_v25 }
0x26e3   :  { %v6122_v52 = vsel %vm181_vm2, %v3007_v18, %v3006_v47  ;;  %v6125_v29 = vsel %vm181_vm2, %v3022_v48, %v3021_v54  ;;  %v6136_v31 = vsel %vm181_vm2, %v3017_v37, %v3016_v3  ;;  %v3033_v41 = vsel %vm4986_vm1, %v6105_v4, %v6102_v15 }
0x26e4   :  { %v3012_v28 = vsel %vm4990_vm3, %v6119_v62, %v6122_v52  ;;  %v3029_v59 = vsel %vm4986_vm1, %v6116_v21, %v6125_v29  ;;  %v6139_v53 = vsel %vm181_vm2, %v3025_v24, %v3024_v42  ;;  %v3031_v54 = vsel %vm4986_vm1, %v6125_v29, %v6116_v21 }
0x26e5   :  { %v3034_v51 = vsel %vm4990_vm3, %v6122_v52, %v6119_v62  ;;  %v3030_v7 = vsel %vm4990_vm3, %v6136_v31, %v6139_v53  ;;  %v3032_v11 = vsel %vm4990_vm3, %v6139_v53, %v6136_v31  ;;  %v3035_v34 = vsel %vm4986_vm1, %v6079_v22, %v6066_v1 }
0x26e6   :  { %v3106_v57 = vadd.f32 %v3105_v32, %v2977_v6  ;;  %v4460_v25 = vmul.f32 -1.442695, %v3108_v30 }
0x26e8   :  { %v4459_v47 = vmul.f32 -1.442695, %v3106_v57 }
0x26ea   :  { %4719 = vpow2.f32 %v4459_v47 }
0x26ef   :  { %v4718_v49 = vpop.eup %4717 }
0x26f0   :  { %3125 = vrot.lane.b32.xlu0 %v4718_v49, %s4851_s0 }
0x26f7   :  { %v4720_v19 = vpop.eup %4719 }
0x26f8   :  { %v3116_v18 = vadd.f32 1.0, %v4720_v19 }
0x26fa   :  { %4721 = vrcp.f32 %v3116_v18 }
0x2707   :  { %v4722_v48 = vpop.eup %4721 }
0x2708   :  { %v3123_v42 = vmul.f32 0.0, %v4722_v48 }
0x2762   :  { %v3126_v3 = vpop.permute.xlu0 %3125 }
0x2763   :  { %v3128_v37 = vmul.f32 %v4722_v48, %v3126_v3 }
0x2765   :  { %3130 = vrot.lane.b32.xlu1 %v3128_v37, %s4851_s0 }
0x27d7   :  { %v3131_v24 = vpop.permute.xlu1 %3130 }
0x27d8   :  { %v3133_v12 = vadd.f32 %v3131_v24, %v3123_v42 }
0x27da   :  { %4723 = vtanh.f32 %v3133_v12 }
0x27db   :  { %4725 = vpow2.f32 %v4460_v25 }
0x27e7   :  { %v4724_v60 = vpop.eup %4723 }
0x27e8   :  { %3136 = vrot.lane.b32.xlu0 %v4724_v60, %s4851_s0  ;;  %v4726_v32 = vpop.eup %4725 }
0x27e9   :  { %v3117_v6 = vadd.f32 1.0, %v4726_v32 }
0x27eb   :  { %4727 = vrcp.f32 %v3117_v6 }
0x27f8   :  { %v4728_v49 = vpop.eup %4727 }
0x285a   :  { %v3137_v57 = vpop.permute.xlu0 %3136 }
0x285b   :  { %v3139_v47 = vmul.f32 %v4728_v49, %v3137_v57 }
0x285d   :  { %v3147_v19 = vrot.slane %v3139_v47, %v5118_v5  ;;  %4461 = vmatmul.mubr.msk.f32.vlgmr.msra.gmra.mxu0 %vm257_vm4, %v3139_v47 }
0x285e   :  { %3494 = vmatpush1.msra.mxu0 %v5966_v39  ;;  %3541 = vmatprep.mubr.f32.mxu0 %v4850_v0 }
0x285f   :  { %v3148_v18 = vcombine.high %v3147_v19, %v3147_v19  ;;  %v6185_v48 = vrot.slane %v3147_v19, %v5118_v5  ;;  %3495 = vmatprep.subr.mxu0 %v5969_v40 }
0x2860   :  { %3496 = vmatpush1.msra.mxu0 %v5973_v43 }
0x2861   :  { %v6190_v30 = vrot.slane %v3148_v18, %v5118_v5  ;;  %3165 = vst.msk [vmem:[#allocation2] sm:$0x1] %vm387_vm5, %v6185_v48  ;;  %3497 = vmatprep.subr.mxu0 %v5976_v35  ;;  %v3170_v38 = vrot.slane %v6185_v48, %v4977_v26 }
0x2862   :  { %3498 = vmatpush1.msra.mxu0 %v5979_v56 }
0x2863   :  { %3166 = vst.msk [vmem:[#allocation2 + $0x8] sm:$0x1] %vm387_vm5, %v6190_v30  ;;  %3499 = vmatprep.subr.mxu0 %v5982_v2 }
0x2864   :  { %3500 = vmatpush1.msra.mxu0 %v5990_v27 }
0x2865   :  { %3501 = vmatprep.subr.mxu0 %v5993_v58 }
0x2866   :  { %3502 = vmatpush1.msra.mxu0 %v5995_v23 }
0x2867   :  { %3503 = vmatprep.subr.mxu0 %v5997_v10 }
0x2868   :  { %3504 = vmatpush1.msra.mxu0 %v6003_v44 }
0x2869   :  { %3505 = vmatprep.subr.mxu0 %v6007_v46 }
0x286a   :  { %3506 = vmatpush1.msra.mxu0 %v6009_v20 }
0x286b   :  { %3507 = vmatprep.subr.mxu0 %v6011_v33 }
0x286c   :  { %3508 = vmatpush1.msra.mxu0 %v6014_v8 }
0x286d   :  { %3785 = vmatprep.subr.mxu0 %v5964_v45 }
0x291d   :  { %v3251_v60 = vpop.f32.mrf.mxu0 }
0x291e   :  { %v3252_v25 = vadd.f32 %v3251_v60, %v2993_v50 }
0x291f   :  { %v3253_v3 = vpop.f32.mrf.mxu0 }
0x2920   :  { %v3254_v37 = vadd.f32 %v3253_v3, %v2994_v61  ;;  %v4462_v24 = vmul.f32 -1.442695, %v3252_v25 }
0x2922   :  { %4729 = vtanh.f32 %v3254_v37  ;;  %v4463_v61 = vmul.f32 -1.442695, %v3254_v37 }
0x2923   :  { %4731 = vpow2.f32 %v4462_v24 }
0x292f   :  { %v4730_v42 = vpop.eup %4729 }
0x2930   :  { %3271 = vrot.lane.b32.xlu1 %v4730_v42, %s4851_s0  ;;  %v4732_v32 = vpop.eup %4731 }
0x2931   :  { %v3262_v6 = vadd.f32 1.0, %v4732_v32 }
0x2933   :  { %4733 = vrcp.f32 %v3262_v6 }
0x2940   :  { %v4734_v49 = vpop.eup %4733 }
0x2941   :  { %v3269_v50 = vmul.f32 %v4734_v49, %v3133_v12 }
0x29a2   :  { %v3272_v57 = vpop.permute.xlu1 %3271 }
0x29a3   :  { %v3274_v47 = vmul.f32 %v4734_v49, %v3272_v57 }
0x29a5   :  { %3276 = vrot.lane.b32.xlu0 %v3274_v47, %s4851_s0 }
0x2a17   :  { %v3277_v19 = vpop.permute.xlu0 %3276 }
0x2a18   :  { %v3279_v18 = vadd.f32 %v3277_v19, %v3269_v50 }
0x2a1a   :  { %4735 = vtanh.f32 %v3279_v18 }
0x2a1b   :  { %4737 = vpow2.f32 %v4463_v61 }
0x2a27   :  { %v4736_v60 = vpop.eup %4735 }
0x2a28   :  { %3282 = vrot.lane.b32.xlu1 %v4736_v60, %s4851_s0  ;;  %v4738_v3 = vpop.eup %4737 }
0x2a29   :  { %v3263_v25 = vadd.f32 1.0, %v4738_v3 }
0x2a2b   :  { %4739 = vrcp.f32 %v3263_v25 }
0x2a38   :  { %v4740_v42 = vpop.eup %4739 }
0x2a9a   :  { %v3283_v24 = vpop.permute.xlu1 %3282 }
0x2a9b   :  { %v3285_v32 = vmul.f32 %v4740_v42, %v3283_v24 }
0x2a9d   :  { %v3293_v6 = vrot.slane %v3285_v32, %v5118_v5  ;;  %4464 = vmatmul.mubr.msk.f32.vlgmr.msra.gmra.mxu1 %vm257_vm4, %v3285_v32 }
0x2a9e   :  { %3640 = vmatpush1.msra.mxu1 %v5966_v39  ;;  %3687 = vmatprep.mubr.f32.mxu1 %v4850_v0 }
0x2a9f   :  { %v3294_v12 = vcombine.high %v3293_v6, %v3293_v6  ;;  %v6227_v49 = vrot.slane %v3293_v6, %v5118_v5  ;;  %3641 = vmatprep.subr.mxu1 %v5969_v40 }
0x2aa0   :  { %3642 = vmatpush1.msra.mxu1 %v5973_v43 }
0x2aa1   :  { %v6232_v37 = vrot.slane %v3294_v12, %v5118_v5  ;;  %3311 = vst.msk [vmem:[#allocation2 + $0x1] sm:$0x1] %vm387_vm5, %v6227_v49  ;;  %3643 = vmatprep.subr.mxu1 %v5976_v35 }
0x2aa2   :  { %3644 = vmatpush1.msra.mxu1 %v5979_v56 }
0x2aa3   :  { %3312 = vst.msk [vmem:[#allocation2 + $0x9] sm:$0x1] %vm387_vm5, %v6232_v37  ;;  %3645 = vmatprep.subr.mxu1 %v5982_v2 }
0x2aa4   :  { %3646 = vmatpush1.msra.mxu1 %v5990_v27 }
0x2aa5   :  { %3647 = vmatprep.subr.mxu1 %v5993_v58 }
0x2aa6   :  { %3648 = vmatpush1.msra.mxu1 %v5995_v23 }
0x2aa7   :  { %3649 = vmatprep.subr.mxu1 %v5997_v10 }
0x2aa8   :  { %3650 = vmatpush1.msra.mxu1 %v6003_v44 }
0x2aa9   :  { %3651 = vmatprep.subr.mxu1 %v6007_v46 }
0x2aaa   :  { %3652 = vmatpush1.msra.mxu1 %v6009_v20 }
0x2aab   :  { %3653 = vmatprep.subr.mxu1 %v6011_v33 }
0x2aac   :  { %3654 = vmatpush1.msra.mxu1 %v6014_v8 }
0x2aad   :  { %3931 = vmatprep.subr.mxu1 %v5964_v45 }
0x2b5d   :  { %v3397_v57 = vpop.f32.mrf.mxu1 }
0x2b5e   :  { %v3398_v47 = vadd.f32 %v3397_v57, %v3011_v14 }
0x2b5f   :  { %v3399_v50 = vpop.f32.mrf.mxu1 }
0x2b60   :  { %v3400_v19 = vadd.f32 %v3399_v50, %v3012_v28  ;;  %v4465_v61 = vmul.f32 -1.442695, %v3398_v47 }
0x2b62   :  { %4741 = vtanh.f32 %v3400_v19  ;;  %v4466_v28 = vmul.f32 -1.442695, %v3400_v19 }
0x2b63   :  { %4743 = vpow2.f32 %v4465_v61 }
0x2b6f   :  { %v4742_v60 = vpop.eup %4741 }
0x2b70   :  { %3417 = vrot.lane.b32.xlu0 %v4742_v60, %s4851_s0  ;;  %v4744_v3 = vpop.eup %4743 }
0x2b71   :  { %v3408_v25 = vadd.f32 1.0, %v4744_v3 }
0x2b73   :  { %4745 = vrcp.f32 %v3408_v25 }
0x2b80   :  { %v4746_v42 = vpop.eup %4745 }
0x2b81   :  { %v3415_v14 = vmul.f32 %v4746_v42, %v3279_v18 }
0x2be2   :  { %v3418_v24 = vpop.permute.xlu0 %3417 }
0x2be3   :  { %v3420_v32 = vmul.f32 %v4746_v42, %v3418_v24 }
0x2be5   :  { %3422 = vrot.lane.b32.xlu1 %v3420_v32, %s4851_s0 }
0x2c57   :  { %v3423_v6 = vpop.permute.xlu1 %3422 }
0x2c58   :  { %v3425_v12 = vadd.f32 %v3423_v6, %v3415_v14 }
0x2c5a   :  { %4747 = vtanh.f32 %v3425_v12 }
0x2c5b   :  { %4749 = vpow2.f32 %v4466_v28 }
0x2c67   :  { %v4748_v57 = vpop.eup %4747 }
0x2c68   :  { %3428 = vrot.lane.b32.xlu0 %v4748_v57, %s4851_s0  ;;  %v4750_v50 = vpop.eup %4749 }
0x2c69   :  { %v3409_v47 = vadd.f32 1.0, %v4750_v50 }
0x2c6b   :  { %4751 = vrcp.f32 %v3409_v47 }
0x2c78   :  { %v4752_v60 = vpop.eup %4751 }
0x2cda   :  { %v3429_v61 = vpop.permute.xlu0 %3428 }
0x2cdb   :  { %v3431_v3 = vmul.f32 %v4752_v60, %v3429_v61 }
0x2cdd   :  { %v3439_v25 = vrot.slane %v3431_v3, %v5118_v5  ;;  %4467 = vmatmul.mubr.msk.f32.vlgmr.msra.gmra.mxu0 %vm257_vm4, %v3431_v3 }
0x2cde   :  { %3786 = vmatpush1.msra.mxu0 %v5966_v39  ;;  %3833 = vmatprep.mubr.f32.mxu0 %v4850_v0 }
0x2cdf   :  { %v3440_v18 = vcombine.high %v3439_v25, %v3439_v25  ;;  %v6269_v42 = vrot.slane %v3439_v25, %v5118_v5  ;;  %3787 = vmatprep.subr.mxu0 %v5969_v40 }
0x2ce0   :  { %3788 = vmatpush1.msra.mxu0 %v5973_v43 }
0x2ce1   :  { %v6274_v19 = vrot.slane %v3440_v18, %v5118_v5  ;;  %3457 = vst.msk [vmem:[#allocation2 + $0x2] sm:$0x1] %vm387_vm5, %v6269_v42  ;;  %3789 = vmatprep.subr.mxu0 %v5976_v35 }
0x2ce2   :  { %3790 = vmatpush1.msra.mxu0 %v5979_v56 }
0x2ce3   :  { %3458 = vst.msk [vmem:[#allocation2 + $0xa] sm:$0x1] %vm387_vm5, %v6274_v19  ;;  %3791 = vmatprep.subr.mxu0 %v5982_v2  ;;  %v3466_v48 = vrot.slane %v6274_v19, %v4977_v26 }
0x2ce4   :  { %3792 = vmatpush1.msra.mxu0 %v5990_v27 }
0x2ce5   :  { %3793 = vmatprep.subr.mxu0 %v5993_v58 }
0x2ce6   :  { %3794 = vmatpush1.msra.mxu0 %v5995_v23 }
0x2ce7   :  { %3795 = vmatprep.subr.mxu0 %v5997_v10 }
0x2ce8   :  { %3796 = vmatpush1.msra.mxu0 %v6003_v44 }
0x2ce9   :  { %3797 = vmatprep.subr.mxu0 %v6007_v46 }
0x2cea   :  { %3798 = vmatpush1.msra.mxu0 %v6009_v20 }
0x2ceb   :  { %3799 = vmatprep.subr.mxu0 %v6011_v33 }
0x2cec   :  { %3800 = vmatpush1.msra.mxu0 %v6014_v8 }
0x2ced   :  { %4077 = vmatprep.subr.mxu0 %v5964_v45 }
0x2d9d   :  { %v3543_v24 = vpop.f32.mrf.mxu0 }
0x2d9e   :  { %v3544_v32 = vadd.f32 %v3543_v24, %v3029_v59 }
0x2d9f   :  { %v3545_v14 = vpop.f32.mrf.mxu0 }
0x2da0   :  { %v3546_v6 = vadd.f32 %v3545_v14, %v3030_v7  ;;  %v4468_v28 = vmul.f32 -1.442695, %v3544_v32 }
0x2da2   :  { %4753 = vtanh.f32 %v3546_v6  ;;  %v4469_v7 = vmul.f32 -1.442695, %v3546_v6 }
0x2da3   :  { %4755 = vpow2.f32 %v4468_v28 }
0x2daf   :  { %v4754_v57 = vpop.eup %4753 }
0x2db0   :  { %3563 = vrot.lane.b32.xlu1 %v4754_v57, %s4851_s0  ;;  %v4756_v45 = vpop.eup %4755 }
0x2db1   :  { %v3554_v50 = vadd.f32 1.0, %v4756_v45 }
0x2db3   :  { %4757 = vrcp.f32 %v3554_v50 }
0x2dc0   :  { %v4758_v47 = vpop.eup %4757 }
0x2dc1   :  { %v3561_v59 = vmul.f32 %v4758_v47, %v3425_v12 }
0x2e22   :  { %v3564_v60 = vpop.permute.xlu1 %3563 }
0x2e23   :  { %v3566_v61 = vmul.f32 %v4758_v47, %v3564_v60 }
0x2e25   :  { %3568 = vrot.lane.b32.xlu0 %v3566_v61, %s4851_s0 }
0x2e97   :  { %v3569_v3 = vpop.permute.xlu0 %3568 }
0x2e98   :  { %v3571_v25 = vadd.f32 %v3569_v3, %v3561_v59 }
0x2e9a   :  { %4759 = vtanh.f32 %v3571_v25 }
0x2e9b   :  { %4761 = vpow2.f32 %v4469_v7 }
0x2ea7   :  { %v4760_v18 = vpop.eup %4759 }
0x2ea8   :  { %3574 = vrot.lane.b32.xlu1 %v4760_v18, %s4851_s0  ;;  %v4762_v24 = vpop.eup %4761 }
0x2ea9   :  { %v3555_v32 = vadd.f32 1.0, %v4762_v24 }
0x2eab   :  { %4763 = vrcp.f32 %v3555_v32 }
0x2eb8   :  { %v4764_v14 = vpop.eup %4763 }
0x2f1a   :  { %v3575_v57 = vpop.permute.xlu1 %3574 }
0x2f1b   :  { %v3577_v28 = vmul.f32 %v4764_v14, %v3575_v57 }
0x2f1d   :  { %v3585_v45 = vrot.slane %v3577_v28, %v5118_v5  ;;  %4470 = vmatmul.mubr.msk.f32.vlgmr.msra.gmra.mxu1 %vm257_vm4, %v3577_v28 }
0x2f1e   :  { %3932 = vmatpush1.msra.mxu1 %v5966_v39  ;;  %3979 = vmatprep.mubr.f32.mxu1 %v4850_v0 }
0x2f1f   :  { %v3586_v12 = vcombine.high %v3585_v45, %v3585_v45  ;;  %v6311_v50 = vrot.slane %v3585_v45, %v5118_v5  ;;  %3933 = vmatprep.subr.mxu1 %v5969_v40 }
0x2f20   :  { %3934 = vmatpush1.msra.mxu1 %v5973_v43 }
0x2f21   :  { %v6316_v6 = vrot.slane %v3586_v12, %v5118_v5  ;;  %3603 = vst.msk [vmem:[#allocation2 + $0x3] sm:$0x1] %vm387_vm5, %v6311_v50  ;;  %3935 = vmatprep.subr.mxu1 %v5976_v35 }
0x2f22   :  { %3936 = vmatpush1.msra.mxu1 %v5979_v56 }
0x2f23   :  { %3604 = vst.msk [vmem:[#allocation2 + $0xb] sm:$0x1] %vm387_vm5, %v6316_v6  ;;  %3937 = vmatprep.subr.mxu1 %v5982_v2 }
0x2f24   :  { %3938 = vmatpush1.msra.mxu1 %v5990_v27 }
0x2f25   :  { %3939 = vmatprep.subr.mxu1 %v5993_v58 }
0x2f26   :  { %3940 = vmatpush1.msra.mxu1 %v5995_v23 }
0x2f27   :  { %3941 = vmatprep.subr.mxu1 %v5997_v10 }
0x2f28   :  { %3942 = vmatpush1.msra.mxu1 %v6003_v44 }
0x2f29   :  { %3943 = vmatprep.subr.mxu1 %v6007_v46 }
0x2f2a   :  { %3944 = vmatpush1.msra.mxu1 %v6009_v20 }
0x2f2b   :  { %3945 = vmatprep.subr.mxu1 %v6011_v33 }
0x2f2c   :  { %3946 = vmatpush1.msra.mxu1 %v6014_v8 }
0x2fdd   :  { %v3689_v47 = vpop.f32.mrf.mxu1 }
0x2fde   :  { %v3690_v60 = vadd.f32 %v3689_v47, %v3031_v54 }
0x2fdf   :  { %v3691_v61 = vpop.f32.mrf.mxu1 }
0x2fe0   :  { %v3692_v59 = vadd.f32 %v3691_v61, %v3032_v11  ;;  %v4471_v18 = vmul.f32 -1.442695, %v3690_v60 }
0x2fe2   :  { %4765 = vtanh.f32 %v3692_v59  ;;  %v4472_v53 = vmul.f32 -1.442695, %v3692_v59 }
0x2fe3   :  { %4767 = vpow2.f32 %v4471_v18 }
0x2fef   :  { %v4766_v3 = vpop.eup %4765 }
0x2ff0   :  { %3709 = vrot.lane.b32.xlu0 %v4766_v3, %s4851_s0  ;;  %v4768_v7 = vpop.eup %4767 }
0x2ff1   :  { %v3700_v24 = vadd.f32 1.0, %v4768_v7 }
0x2ff3   :  { %4769 = vrcp.f32 %v3700_v24 }
0x3000   :  { %v4770_v32 = vpop.eup %4769 }
0x3001   :  { %v3707_v29 = vmul.f32 %v4770_v32, %v3571_v25 }
0x3062   :  { %v3710_v14 = vpop.permute.xlu0 %3709 }
0x3063   :  { %v3712_v21 = vmul.f32 %v4770_v32, %v3710_v14 }
0x3065   :  { %3714 = vrot.lane.b32.xlu1 %v3712_v21, %s4851_s0  ;;  %v6567_v21 = vsel %vm4990_vm3, %v6099_v55, %v6082_v9 }
0x30d7   :  { %v3715_v54 = vpop.permute.xlu1 %3714 }
0x30d8   :  { %v3717_v57 = vadd.f32 %v3715_v54, %v3707_v29 }
0x30da   :  { %4771 = vtanh.f32 %v3717_v57 }
0x30db   :  { %4773 = vpow2.f32 %v4472_v53 }
0x30e7   :  { %v4772_v31 = vpop.eup %4771 }
0x30e8   :  { %3720 = vrot.lane.b32.xlu0 %v4772_v31, %s4851_s0  ;;  %v4774_v11 = vpop.eup %4773 }
0x30e9   :  { %v3701_v28 = vadd.f32 1.0, %v4774_v11 }
0x30eb   :  { %4775 = vrcp.f32 %v3701_v28 }
0x30f8   :  { %v4776_v45 = vpop.eup %4775 }
0x315a   :  { %v3721_v12 = vpop.permute.xlu0 %3720 }
0x315b   :  { %v3723_v47 = vmul.f32 %v4776_v45, %v3721_v12 }
0x315d   :  { %v3731_v60 = vrot.slane %v3723_v47, %v5118_v5  ;;  %4473 = vmatmul.mubr.msk.f32.vlgmr.msra.gmra.mxu0 %vm257_vm4, %v3723_v47 }
0x315e   :  { %4078 = vmatpush1.msra.mxu0 %v5966_v39  ;;  %4125 = vmatprep.mubr.f32.mxu0 %v4850_v0 }
0x315f   :  { %v3732_v25 = vcombine.high %v3731_v60, %v3731_v60  ;;  %v6352_v61 = vrot.slane %v3731_v60, %v5118_v5  ;;  %4079 = vmatprep.subr.mxu0 %v5969_v40 }
0x3160   :  { %4080 = vmatpush1.msra.mxu0 %v5973_v43 }
0x3161   :  { %v6357_v59 = vrot.slane %v3732_v25, %v5118_v5  ;;  %3749 = vst.msk [vmem:[#allocation2 + $0x4] sm:$0x1] %vm387_vm5, %v6352_v61  ;;  %4081 = vmatprep.subr.mxu0 %v5976_v35 }
0x3162   :  { %4082 = vmatpush1.msra.mxu0 %v5979_v56 }
0x3163   :  { %3750 = vst.msk [vmem:[#allocation2 + $0xc] sm:$0x1] %vm387_vm5, %v6357_v59  ;;  %4083 = vmatprep.subr.mxu0 %v5982_v2 }
0x3164   :  { %4084 = vmatpush1.msra.mxu0 %v5990_v27 }
0x3165   :  { %4085 = vmatprep.subr.mxu0 %v5993_v58 }
0x3166   :  { %4086 = vmatpush1.msra.mxu0 %v5995_v23 }
0x3167   :  { %4087 = vmatprep.subr.mxu0 %v5997_v10 }
0x3168   :  { %4088 = vmatpush1.msra.mxu0 %v6003_v44 }
0x3169   :  { %4089 = vmatprep.subr.mxu0 %v6007_v46 }
0x316a   :  { %4090 = vmatpush1.msra.mxu0 %v6009_v20 }
0x316b   :  { %4091 = vmatprep.subr.mxu0 %v6011_v33 }
0x316c   :  { %4092 = vmatpush1.msra.mxu0 %v6014_v8 }
0x321d   :  { %v3835_v0 = vpop.f32.mrf.mxu0 }
0x321e   :  { %v3836_v39 = vadd.f32 %v3835_v0, %v3033_v41 }
0x321f   :  { %v3837_v40 = vpop.f32.mrf.mxu0 }
0x3220   :  { %v3838_v43 = vadd.f32 %v3837_v40, %v3034_v51  ;;  %v4474_v56 = vmul.f32 -1.442695, %v3836_v39 }
0x3222   :  { %4777 = vtanh.f32 %v3838_v43  ;;  %v4475_v8 = vmul.f32 -1.442695, %v3838_v43 }
0x3223   :  { %4779 = vpow2.f32 %v4474_v56 }
0x322f   :  { %v4778_v35 = vpop.eup %4777 }
0x3230   :  { %3855 = vrot.lane.b32.xlu1 %v4778_v35, %s4851_s0  ;;  %v4780_v2 = vpop.eup %4779 }
0x3231   :  { %v3846_v27 = vadd.f32 1.0, %v4780_v2  ;;  %v6568_v2 = vsel %vm4986_vm1, %v6072_v16, %v6069_v13  ;;  %v3462_v16 = vrot.slane %v6269_v42, %v4977_v26  ;;  %v3758_v42 = vrot.slane %v6357_v59, %v4977_v26 }
0x3233   :  { %4781 = vrcp.f32 %v3846_v27 }
0x3240   :  { %v4782_v58 = vpop.eup %4781 }
0x3241   :  { %v3853_v44 = vmul.f32 %v4782_v58, %v3717_v57 }
0x32a2   :  { %v3856_v23 = vpop.permute.xlu1 %3855 }
0x32a3   :  { %v3858_v10 = vmul.f32 %v4782_v58, %v3856_v23  ;;  %v6569_v23 = vsel %vm4990_vm3, %v6088_v17, %v6085_v63  ;;  %v3754_v63 = vrot.slane %v6352_v61, %v4977_v26 }
0x32a5   :  { %3860 = vrot.lane.b32.xlu0 %v3858_v10, %s4851_s0 }
0x3317   :  { %v3861_v46 = vpop.permute.xlu0 %3860 }
0x3318   :  { %v3863_v20 = vadd.f32 %v3861_v46, %v3853_v44 }
0x331a   :  { %4783 = vtanh.f32 %v3863_v20 }
0x331b   :  { %4785 = vpow2.f32 %v4475_v8 }
0x3327   :  { %v4784_v33 = vpop.eup %4783 }
0x3328   :  { %3866 = vrot.lane.b32.xlu1 %v4784_v33, %s4851_s0  ;;  %v4786_v15 = vpop.eup %4785 }
0x3329   :  { %v3847_v4 = vadd.f32 1.0, %v4786_v15  ;;  %v3174_v15 = vrot.slane %v6190_v30, %v4977_v26 }
0x332b   :  { %4787 = vrcp.f32 %v3847_v4 }
0x3338   :  { %v4788_v62 = vpop.eup %4787 }
0x339a   :  { %v3867_v52 = vpop.permute.xlu1 %3866 }
0x339b   :  { %v3869_v41 = vmul.f32 %v4788_v62, %v3867_v52 }
0x339d   :  { %v3877_v51 = vrot.slane %v3869_v41, %v5118_v5  ;;  %4476 = vmatmul.mubr.msk.f32.vlgmr.msra.gmra.mxu1 %vm257_vm4, %v3869_v41 }
0x339f   :  { %v3878_v3 = vcombine.high %v3877_v51, %v3877_v51  ;;  %v6391_v18 = vrot.slane %v3877_v51, %v5118_v5 }
0x33a1   :  { %v6394_v7 = vrot.slane %v3878_v3, %v5118_v5  ;;  %3895 = vst.msk [vmem:[#allocation2 + $0x5] sm:$0x1] %vm387_vm5, %v6391_v18  ;;  %v3316_v3 = vrot.slane %v6227_v49, %v4977_v26  ;;  %v3320_v49 = vrot.slane %v6232_v37, %v4977_v26 }
0x33a3   :  { %3896 = vst.msk [vmem:[#allocation2 + $0xd] sm:$0x1] %vm387_vm5, %v6394_v7 }
0x345d   :  { %v3981_v24 = vpop.f32.mrf.mxu1 }
0x345e   :  { %v3982_v32 = vadd.f32 %v3981_v24, %v3035_v34 }
0x345f   :  { %v3983_v14 = vpop.f32.mrf.mxu1 }
0x3460   :  { %v3984_v29 = vadd.f32 %v3983_v14, %v6567_v21  ;;  %v4477_v57 = vmul.f32 -1.442695, %v3982_v32  ;;  %v3608_v32 = vrot.slane %v6311_v50, %v4977_v26  ;;  %v3900_v21 = vrot.slane %v6391_v18, %v4977_v26 }
0x3461   :  { %v3612_v50 = vrot.slane %v6316_v6, %v4977_v26  ;;  %v3904_v18 = vrot.slane %v6394_v7, %v4977_v26 }
0x3462   :  { %4789 = vtanh.f32 %v3984_v29  ;;  %v4478_v55 = vmul.f32 -1.442695, %v3984_v29 }
0x3463   :  { %4791 = vpow2.f32 %v4477_v57 }
0x346f   :  { %v4790_v54 = vpop.eup %4789 }
0x3470   :  { %4001 = vrot.lane.b32.xlu0 %v4790_v54, %s4851_s0  ;;  %v4792_v31 = vpop.eup %4791 }
0x3471   :  { %v3992_v53 = vadd.f32 1.0, %v4792_v31 }
0x3473   :  { %4793 = vrcp.f32 %v3992_v53 }
0x3480   :  { %v4794_v11 = vpop.eup %4793 }
0x3481   :  { %v3999_v22 = vmul.f32 %v4794_v11, %v3863_v20 }
0x34e2   :  { %v4002_v28 = vpop.permute.xlu0 %4001 }
0x34e3   :  { %v4004_v1 = vmul.f32 %v4794_v11, %v4002_v28 }
0x34e5   :  { %4006 = vrot.lane.b32.xlu1 %v4004_v1, %s4851_s0 }
0x3557   :  { %v4007_v34 = vpop.permute.xlu1 %4006 }
0x3558   :  { %v4009_v45 = vadd.f32 %v4007_v34, %v3999_v22 }
0x355a   :  { %4795 = vtanh.f32 %v4009_v45 }
0x355b   :  { %4797 = vpow2.f32 %v4478_v55  ;;  %v4226_v55 = vld [vmem:[%s6553_s2 + $0x38] sm:$0xff] }
0x355c   :  { %4498 = vmatprep.subr.mxu1 %v4226_v55 }
0x355d   :  { %4499 = vmatpush3.msra.mxu1 %v4226_v55 }
0x3567   :  { %v4796_v9 = vpop.eup %4795 }
0x3568   :  { %4012 = vrot.lane.b32.xlu0 %v4796_v9, %s4851_s0  ;;  %v4798_v12 = vpop.eup %4797 }
0x3569   :  { %v3993_v47 = vadd.f32 1.0, %v4798_v12  ;;  %v4225_v12 = vld [vmem:[%s6553_s2 + $0x30] sm:$0xff] }
0x356a   :  { %4500 = vmatprep.subr.mxu1 %v4225_v12 }
0x356b   :  { %4799 = vrcp.f32 %v3993_v47  ;;  %4501 = vmatpush3.msra.mxu1 %v4225_v12 }
0x3578   :  { %v4800_v60 = vpop.eup %4799 }
0x35da   :  { %v4013_v25 = vpop.permute.xlu0 %4012 }
0x35db   :  { %v4015_v0 = vmul.f32 %v4800_v60, %v4013_v25  ;;  %v4223_v25 = vld [vmem:[%s6553_s2 + $0x20] sm:$0xff] }
0x35dd   :  { %v4023_v39 = vrot.slane %v4015_v0, %v5118_v5  ;;  %4479 = vmatmul.mubr.msk.f32.vlgmr.msra.gmra.mxu0 %vm257_vm4, %v4015_v0  ;;  %v4222_v0 = vld [vmem:[%s6553_s2 + $0x18] sm:$0xff] }
0x35df   :  { %v4024_v40 = vcombine.high %v4023_v39, %v4023_v39  ;;  %v4031_v43 = vrot.slane %v4023_v39, %v5118_v5 }
0x35e1   :  { %v4038_v35 = vrot.slane %v4024_v40, %v5118_v5  ;;  %4041 = vst.msk [vmem:[#allocation2 + $0x6] sm:$0x1] %vm387_vm5, %v4031_v43  ;;  %v4046_v17 = vrot.slane %v4031_v43, %v4977_v26 }
0x35e3   :  { %4042 = vst.msk [vmem:[#allocation2 + $0xe] sm:$0x1] %vm387_vm5, %v4038_v35  ;;  %v4050_v61 = vrot.slane %v4038_v35, %v4977_v26  ;;  %v4220_v35 = vld [vmem:[%s6553_s2 + $0x8] sm:$0xff] }
0x369d   :  { %v4127_v56 = vpop.f32.mrf.mxu0 }
0x369e   :  { %v4128_v27 = vadd.f32 %v4127_v56, %v6568_v2  ;;  %v4219_v56 = vld [vmem:[%s6553_s2] sm:$0xff] }
0x369f   :  { %v4129_v58 = vpop.f32.mrf.mxu0 }
0x36a0   :  { %v4130_v10 = vadd.f32 %v4129_v58, %v6569_v23  ;;  %v4480_v46 = vmul.f32 -1.442695, %v4128_v27 }
0x36a2   :  { %4801 = vtanh.f32 %v4130_v10  ;;  %v4481_v57 = vmul.f32 -1.442695, %v4130_v10 }
0x36a3   :  { %4803 = vpow2.f32 %v4480_v46 }
0x36af   :  { %v4802_v44 = vpop.eup %4801 }
0x36b0   :  { %4147 = vrot.lane.b32.xlu1 %v4802_v44, %s4851_s0  ;;  %v4804_v20 = vpop.eup %4803 }
0x36b1   :  { %v4138_v33 = vadd.f32 1.0, %v4804_v20 }
0x36b3   :  { %4805 = vrcp.f32 %v4138_v33 }
0x36c0   :  { %v4806_v36 = vpop.eup %4805 }
0x36c1   :  { %v4145_v4 = vmul.f32 %v4806_v36, %v4009_v45 }
0x3722   :  { %v4148_v8 = vpop.permute.xlu1 %4147 }
0x3723   :  { %v4150_v13 = vmul.f32 %v4806_v36, %v4148_v8  ;;  %v4482_v8 = vld [vmem:[%s6553_s2 + $0x40] ss:$0 sm:$0xff] }
0x3725   :  { %4152 = vrot.lane.b32.xlu0 %v4150_v13, %s4851_s0 }
0x3729   :  { %3175 = vrot.lane.b32.xlu0 %v3170_v38, %s4853_s22 }
0x372d   :  { %3467 = vrot.lane.b32.xlu0 %v3462_v16, %s4853_s22 }
0x3731   :  { %3759 = vrot.lane.b32.xlu0 %v3754_v63, %s4853_s22 }
0x3735   :  { %4051 = vrot.lane.b32.xlu0 %v4046_v17, %s4853_s22  ;;  %v4485_v17 = vld [vmem:[%s6553_s2 + $0x41] ss:$0 sm:$0xff] }
0x3739   :  { %3177 = vrot.lane.b32.xlu0 %v3174_v15, %s4853_s22 }
0x373d   :  { %3469 = vrot.lane.b32.xlu0 %v3466_v48, %s4853_s22 }
0x3741   :  { %3761 = vrot.lane.b32.xlu0 %v3758_v42, %s4853_s22 }
0x3745   :  { %4053 = vrot.lane.b32.xlu0 %v4050_v61, %s4853_s22 }
0x3797   :  { %v4153_v62 = vpop.permute.xlu0 %4152 }
0x3798   :  { %v4155_v52 = vadd.f32 %v4153_v62, %v4145_v4 }
0x379a   :  { %4807 = vtanh.f32 %v4155_v52 }
0x379b   :  { %v3176_v30 = vpop.permute.xlu0 %3175  ;;  %4809 = vpow2.f32 %v4481_v57 }
0x379c   :  { %3181 = vst.msk [vmem:[#allocation3 + $0x7] sm:$0x1] %vm387_vm5, %v3176_v30 }
0x379f   :  { %v3468_v41 = vpop.permute.xlu0 %3467 }
0x37a0   :  { %3473 = vst.msk [vmem:[#allocation3 + $0x5] sm:$0x1] %vm387_vm5, %v3468_v41 }
0x37a3   :  { %v3760_v19 = vpop.permute.xlu0 %3759 }
0x37a4   :  { %3765 = vst.msk [vmem:[#allocation3 + $0x3] sm:$0x1] %vm387_vm5, %v3760_v19 }
0x37a7   :  { %v4808_v59 = vpop.eup %4807  ;;  %v4052_v51 = vpop.permute.xlu0 %4051 }
0x37a8   :  { %4057 = vst.msk [vmem:[#allocation3 + $0x1] sm:$0x1] %vm387_vm5, %v4052_v51  ;;  %4158 = vrot.lane.b32.xlu1 %v4808_v59, %s4851_s0  ;;  %v4810_v31 = vpop.eup %4809 }
0x37a9   :  { %v4139_v53 = vadd.f32 1.0, %v4810_v31 }
0x37ab   :  { %v3178_v24 = vpop.permute.xlu0 %3177  ;;  %4811 = vrcp.f32 %v4139_v53 }
0x37ac   :  { %3182 = vst.msk [vmem:[#allocation3 + $0xf] sm:$0x1] %vm387_vm5, %v3178_v24  ;;  %3321 = vrot.lane.b32.xlu1 %v3316_v3, %s4853_s22 }
0x37af   :  { %v3470_v14 = vpop.permute.xlu0 %3469 }
0x37b0   :  { %3474 = vst.msk [vmem:[#allocation3 + $0xd] sm:$0x1] %vm387_vm5, %v3470_v14  ;;  %3613 = vrot.lane.b32.xlu1 %v3608_v32, %s4853_s22 }
0x37b3   :  { %v3762_v29 = vpop.permute.xlu0 %3761 }
0x37b4   :  { %3766 = vst.msk [vmem:[#allocation3 + $0xb] sm:$0x1] %vm387_vm5, %v3762_v29  ;;  %3905 = vrot.lane.b32.xlu1 %v3900_v21, %s4853_s22 }
0x37b7   :  { %v4054_v54 = vpop.permute.xlu0 %4053 }
0x37b8   :  { %4058 = vst.msk [vmem:[#allocation3 + $0x9] sm:$0x1] %vm387_vm5, %v4054_v54  ;;  %3323 = vrot.lane.b32.xlu1 %v3320_v49, %s4853_s22  ;;  %v4812_v37 = vpop.eup %4811 }
0x37bc   :  { %3615 = vrot.lane.b32.xlu1 %v3612_v50, %s4853_s22 }
0x37c0   :  { %3907 = vrot.lane.b32.xlu1 %v3904_v18, %s4853_s22 }
0x381a   :  { %v4159_v11 = vpop.permute.xlu1 %4158 }
0x381b   :  { %v4161_v28 = vmul.f32 %v4812_v37, %v4159_v11 }
0x381d   :  { %v4169_v1 = vrot.slane %v4161_v28, %v5118_v5 }
0x381e   :  { %v3322_v22 = vpop.permute.xlu1 %3321 }
0x381f   :  { %v4170_v34 = vcombine.high %v4169_v1, %v4169_v1  ;;  %v4177_v6 = vrot.slane %v4169_v1, %v5118_v5  ;;  %3327 = vst.msk [vmem:[#allocation3 + $0x6] sm:$0x1] %vm387_vm5, %v3322_v22 }
0x3821   :  { %v4184_v7 = vrot.slane %v4170_v34, %v5118_v5  ;;  %4187 = vst.msk [vmem:[#allocation2 + $0x7] sm:$0x1] %vm387_vm5, %v4177_v6  ;;  %v4192_v45 = vrot.slane %v4177_v6, %v4977_v26  ;;  %v4224_v5 = vld [vmem:[%s6553_s2 + $0x28] sm:$0xff] }
0x3822   :  { %v3614_v9 = vpop.permute.xlu1 %3613  ;;  %4502 = vmatprep.subr.mxu1 %v4224_v5 }
0x3823   :  { %4188 = vst.msk [vmem:[#allocation2 + $0xf] sm:$0x1] %vm387_vm5, %v4184_v7  ;;  %3619 = vst.msk [vmem:[#allocation3 + $0x4] sm:$0x1] %vm387_vm5, %v3614_v9  ;;  %4197 = vrot.lane.b32.xlu1 %v4192_v45, %s4853_s22  ;;  %v4196_v47 = vrot.slane %v4184_v7, %v4977_v26  ;;  %4503 = vmatpush3.msra.mxu1 %v4224_v5  ;;  %v4221_v26 = vld [vmem:[%s6553_s2 + $0x10] sm:$0xff] }
0x3824   :  { %4504 = vmatprep.subr.mxu1 %v4223_v25 }
0x3825   :  { %4505 = vmatpush3.msra.mxu1 %v4223_v25 }
0x3826   :  { %v3906_v60 = vpop.permute.xlu1 %3905  ;;  %4506 = vmatprep.subr.mxu1 %v4222_v0 }
0x3827   :  { %3911 = vst.msk [vmem:[#allocation3 + $0x2] sm:$0x1] %vm387_vm5, %v3906_v60  ;;  %4199 = vrot.lane.b32.xlu1 %v4196_v47, %s4853_s22  ;;  %4507 = vmatpush3.msra.mxu1 %v4222_v0 }
0x3828   :  { %4508 = vmatprep.subr.mxu1 %v4221_v26  ;;  %v4205_v10 = vld [vmem:[#allocation2] sm:$0xff] }
0x3829   :  { %4509 = vmatpush3.msra.mxu1 %v4221_v26 }
0x382a   :  { %v3324_v39 = vpop.permute.xlu1 %3323  ;;  %4510 = vmatprep.subr.mxu1 %v4220_v35  ;;  %v4206_v33 = vld [vmem:[#allocation2 + $0x8] sm:$0xff] }
0x382b   :  { %3328 = vst.msk [vmem:[#allocation3 + $0xe] sm:$0x1] %vm387_vm5, %v3324_v39  ;;  %4511 = vmatpush3.msra.mxu1 %v4220_v35 }
0x382c   :  { %4512 = vmatprep.subr.mxu1 %v4219_v56 }
0x382d   :  { %4513 = vmatpush3.msra.mxu1 %v4219_v56 }
0x382e   :  { %v3616_v40 = vpop.permute.xlu1 %3615 }
0x382f   :  { %3620 = vst.msk [vmem:[#allocation3 + $0xc] sm:$0x1] %vm387_vm5, %v3616_v40 }
0x3832   :  { %v3908_v43 = vpop.permute.xlu1 %3907 }
0x3833   :  { %3912 = vst.msk [vmem:[#allocation3 + $0xa] sm:$0x1] %vm387_vm5, %v3908_v43 }
0x3895   :  { %v4198_v2 = vpop.permute.xlu1 %4197 }
0x3896   :  { %4203 = vst.msk [vmem:[#allocation3] sm:$0x1] %vm387_vm5, %v4198_v2 }
0x3899   :  { %v4200_v27 = vpop.permute.xlu1 %4199 }
0x389a   :  { %4204 = vst.msk [vmem:[#allocation3 + $0x8] sm:$0x1] %vm387_vm5, %v4200_v27 }
0x389d   :  { %v4207_v58 = vld [vmem:[#allocation3] sm:$0xff] }
0x389e   :  { %4211 = vrot.lane.b32.xlu0 %v4207_v58, %s4854_s23 }
0x38a1   :  { %v4208_v23 = vld [vmem:[#allocation3 + $0x8] sm:$0xff] }
0x38a2   :  { %4213 = vrot.lane.b32.xlu1 %v4208_v23, %s4854_s23 }
0x3910   :  { %v4212_v44 = vpop.permute.xlu0 %4211 }
0x3911   :  { %v6524_v46 = vsel %vm1440_vm6, %v4205_v10, %v4212_v44 }
0x3912   :  { %4514 = vmatprep.mubr.msk.f32.mxu1 %vm257_vm4, %v6524_v46 }
0x3914   :  { %v4214_v20 = vpop.permute.xlu1 %4213 }
0x3915   :  { %v4218_v36 = vsel %vm1440_vm6, %v4206_v33, %v4214_v20  ;;  %v4486_v33 = vld [vmem:[%s6553_s2 + $0x42] ss:$0 sm:$0xff] }
0x3916   :  { %4515 = vmatmul.mubr.msk.f32.vlgmr.msra.gmra.mxu1 %vm257_vm4, %v4218_v36 }
0x39d6   :  { %v4516_v13 = vpop.f32.mrf.mxu1 }
0x39d7   :  { %v4313_v38 = vadd.f32 %v4516_v13, %v4482_v8 }
0x39d8   :  { %v4307_v16 = vpop.f32.mrf.mxu1 }
0x39d9   :  { %4813 = vtanh.f32 %v4313_v38  ;;  %v4308_v63 = vadd.f32 %v4482_v8, %v4307_v16 }
0x39db   :  { %4815 = vtanh.f32 %v4308_v63 }
0x39e6   :  { %v4814_v15 = vpop.eup %4813 }
0x39e7   :  { %v4323_v48 = vmul.f32 %v4814_v15, %v4485_v17  ;;  %v4487_v15 = vld [vmem:[%s6553_s2 + $0x43] ss:$0 sm:$0xff] }
0x39e8   :  { %v4816_v42 = vpop.eup %4815 }
0x39e9   :  { %v4327_v61 = vsel %vm257_vm4, %v4323_v48, 0.0  ;;  %v4322_v4 = vmul.f32 %v4816_v42, %v4485_v17 }
0x39ea   :  { %4328 = vadd.xlane.f32.xlu0 %v4327_v61 }
0x39eb   :  { %v4324_v62 = vsel %vm257_vm4, %v4322_v4, 0.0 }
0x39ec   :  { %4325 = vadd.xlane.f32.xlu1 %v4324_v62 }
0x3a73   :  { %v4329_v52 = vpop.xlane.xlu0 %4328 }
0x3a74   :  { %v4336_v30 = vrot.slane %v4329_v52, 4 }
0x3a75   :  { %v4326_v41 = vpop.xlane.xlu1 %4325 }
0x3a76   :  { %v4337_v19 = vmax.f32 %v4329_v52, %v4336_v30  ;;  %v4330_v59 = vrot.slane %v4326_v41, 4 }
0x3a78   :  { %v4338_v51 = vrot.slane %v4337_v19, 2  ;;  %v4331_v3 = vmax.f32 %v4326_v41, %v4330_v59 }
0x3a7a   :  { %v4339_v24 = vmax.f32 %v4337_v19, %v4338_v51  ;;  %v4332_v32 = vrot.slane %v4331_v3, 2 }
0x3a7c   :  { %v4340_v14 = vrot.slane %v4339_v24, 1  ;;  %v4333_v21 = vmax.f32 %v4331_v3, %v4332_v32 }
0x3a7e   :  { %v4341_v29 = vmax.f32 %v4339_v24, %v4340_v14  ;;  %v4334_v49 = vrot.slane %v4333_v21, 1 }
0x3a80   :  { %v4343_v54 = vsub.f32 %v4329_v52, %v4341_v29  ;;  %v4335_v50 = vmax.f32 %v4333_v21, %v4334_v49 }
0x3a82   :  { %v4346_v18 = vmul.f32 1.442695, %v4343_v54  ;;  %v4342_v57 = vsub.f32 %v4326_v41, %v4335_v50 }
0x3a84   :  { %4817 = vpow2.f32 %v4346_v18  ;;  %v4344_v31 = vmul.f32 1.442695, %v4342_v57 }
0x3a86   :  { %4819 = vpow2.f32 %v4344_v31 }
0x3a91   :  { %v4818_v53 = vpop.eup %4817 }
0x3a92   :  { %v4354_v37 = vrot.slane %v4818_v53, 4 }
0x3a93   :  { %v4820_v11 = vpop.eup %4819 }
0x3a94   :  { %v4355_v28 = vadd.f32 %v4818_v53, %v4354_v37  ;;  %v4348_v1 = vrot.slane %v4820_v11, 4 }
0x3a96   :  { %v4349_v22 = vadd.f32 %v4820_v11, %v4348_v1  ;;  %v4356_v34 = vrot.slane %v4355_v28, 2 }
0x3a98   :  { %v4350_v6 = vrot.slane %v4349_v22, 2  ;;  %v4357_v7 = vadd.f32 %v4356_v34, %v4355_v28 }
0x3a9a   :  { %v4351_v45 = vadd.f32 %v4350_v6, %v4349_v22  ;;  %v4358_v9 = vrot.slane %v4357_v7, 1 }
0x3a9c   :  { %v4352_v55 = vrot.slane %v4351_v45, 1  ;;  %v4359_v12 = vadd.f32 %v4358_v9, %v4357_v7 }
0x3a9e   :  { %v4353_v5 = vadd.f32 %v4352_v55, %v4351_v45  ;;  %4821 = vrcp.f32 %v4359_v12 }
0x3aa0   :  { %4823 = vrcp.f32 %v4353_v5 }
0x3aab   :  { %v4822_v47 = vpop.eup %4821 }
0x3aac   :  { %v4363_v60 = vmul.f32 %v4822_v47, %v4818_v53 }
0x3aad   :  { %v4824_v25 = vpop.eup %4823 }
0x3aae   :  { %v4361_v0 = vmul.f32 %v4824_v25, %v4820_v11  ;;  %v4365_v39 = vmul.f32 %v4363_v60, %v4218_v36 }
0x3ab0   :  { %v4364_v26 = vmul.f32 %v4361_v0, %v6524_v46  ;;  %v4373_v40 = vsel %vm257_vm4, %v4365_v39, 0.0 }
0x3ab1   :  { %v4374_v43 = vrot.slane %v4373_v40, 4 }
0x3ab2   :  { %v4366_v35 = vsel %vm257_vm4, %v4364_v26, 0.0 }
0x3ab3   :  { %v4367_v56 = vrot.slane %v4366_v35, 4  ;;  %v4375_v2 = vadd.f32 %v4374_v43, %v4373_v40 }
0x3ab5   :  { %v4368_v27 = vadd.f32 %v4367_v56, %v4366_v35  ;;  %v4376_v58 = vrot.slane %v4375_v2, 2 }
0x3ab7   :  { %v4369_v23 = vrot.slane %v4368_v27, 2  ;;  %v4377_v10 = vadd.f32 %v4376_v58, %v4375_v2 }
0x3ab9   :  { %v4370_v44 = vadd.f32 %v4369_v23, %v4368_v27  ;;  %v4378_v20 = vrot.slane %v4377_v10, 1 }
0x3abb   :  { %v4371_v36 = vrot.slane %v4370_v44, 1  ;;  %v4379_v8 = vadd.f32 %v4378_v20, %v4377_v10 }
0x3abd   :  { %v4372_v46 = vadd.f32 %v4371_v36, %v4370_v44  ;;  %v4385_v13 = vmul.f32 %v4486_v33, %v4379_v8 }
0x3abf   :  { %v4384_v38 = vmul.f32 %v4486_v33, %v4372_v46  ;;  %v4388_v16 = vrot.slane %v4385_v13, 7 }
0x3ac1   :  { %v4389_v63 = vsel %vm181_vm2, %v4388_v16, %v4384_v38 }
0x3ac2   :  { %v4392_v17 = vsel %vm4391_vm7, %v4389_v63, 0.0 }
0x3ac3   :  { %4393 = vadd.xlane.f32.xlu0 %v4392_v17 }
0x3b4c   :  { %v4394_v48 = vpop.xlane.xlu0 %4393 }
0x3b4d   :  { %v4399_v42 = vadd.f32 %v4487_v15, %v4394_v48 }
0x3b4f   :  { %4401 = vst.msk [vmem:[%s6554_s3] sm:$0x3] %vm4400_vm8, %v4399_v42 }
0x3b50   :  { %4406 = vsyncpa [#allocation5], 1 }

</bundles_post_ra>
